<compile_context>
chip_gen: v7x
topology: tpu7x:2x2x1
jax: 0.10.0
libtpu: 0.0.40
codegen_flags: <defaults>
</compile_context>

<pallas_src>
import jax
import jax.numpy as jnp
from jax.experimental import pallas as pl
from jax.experimental.pallas import tpu as pltpu

NOISE_DIM = 100
COND_DIM = 10
FC1_IN = NOISE_DIM + COND_DIM          # 110
FC1_IN_PAD = 128                       # zero-padded K for a single lane-aligned fc1 dot
HIDDEN = 1024
OUT_DIM = 28 * 28                      # 784 (not padded: extra W3 bytes > masked tail store)


# ----------------------------- kernels --------------------------------------

def _generator_kernel(x_ref, w1_ref, b1_ref, w2_ref, b2_ref, w3_ref, b3_ref, o_ref):
    """bf16 weights / bf16 activation feeds, f32 accumulation, f32 bias/ReLU/tanh."""
    h1 = jnp.dot(x_ref[...], w1_ref[...], preferred_element_type=jnp.float32) + b1_ref[...]
    h1 = jnp.maximum(h1, 0.0).astype(jnp.bfloat16)
    h2 = jnp.dot(h1, w2_ref[...], preferred_element_type=jnp.float32) + b2_ref[...]
    h2 = jnp.maximum(h2, 0.0).astype(jnp.bfloat16)
    h3 = jnp.dot(h2, w3_ref[...], preferred_element_type=jnp.float32) + b3_ref[...]
    o_ref[...] = jnp.tanh(h3).astype(o_ref.dtype)


def _generator_kernel_int8(x_ref, w1_ref, b1_ref, w2q_ref, s2_ref, b2_ref,
                           w3q_ref, s3_ref, b3_ref, o_ref):
    """Small-batch variant: fc2/fc3 weights are int8 with per-output-channel
    scales (small-B calls are pure weight DMA -> ~2x fewer bytes). The int8 ->
    f32 -> bf16 widening is exact (|q| <= 127) and the scale is applied to the
    f32 accumulator after the dot, which is mathematically equivalent to
    dequantizing the weights first."""
    h1 = jnp.dot(x_ref[...], w1_ref[...], preferred_element_type=jnp.float32) + b1_ref[...]
    h1 = jnp.maximum(h1, 0.0).astype(jnp.bfloat16)
    w2 = w2q_ref[...].astype(jnp.float32).astype(jnp.bfloat16)
    h2 = jnp.dot(h1, w2, preferred_element_type=jnp.float32) * s2_ref[...] + b2_ref[...]
    h2 = jnp.maximum(h2, 0.0).astype(jnp.bfloat16)
    w3 = w3q_ref[...].astype(jnp.float32).astype(jnp.bfloat16)
    h3 = jnp.dot(h2, w3, preferred_element_type=jnp.float32) * s3_ref[...] + b3_ref[...]
    o_ref[...] = jnp.tanh(h3).astype(o_ref.dtype)


# --------------------------- pallas_call wrappers ----------------------------

def _call_tiled(x, p, B, tm, out_dtype, single_buffer_weights):
    """Large-batch path: ragged 1-D grid over batch rows; weights VMEM-resident
    (constant block index); 'parallel' batch axis so both v7x TCs get work and
    x/out DMA pipelines behind the matmuls."""
    rowmap = lambda i: (i, 0)
    fixed = lambda i: (0, 0)

    def wspec(shape):
        # Constant-index blocks: the default pipeline still allocates 2 buffers;
        # Buffered(1) drops the pointless second copy (~3.9 MiB VMEM saved).
        if single_buffer_weights:
            return pl.BlockSpec(shape, fixed, pipeline_mode=pl.Buffered(1))
        return pl.BlockSpec(shape, fixed)

    return pl.pallas_call(
        _generator_kernel,
        out_shape=jax.ShapeDtypeStruct((B, OUT_DIM), out_dtype),
        grid=(pl.cdiv(B, tm),),            # ragged: partial last block is masked
        in_specs=[
            pl.BlockSpec((tm, FC1_IN_PAD), rowmap),
            wspec((FC1_IN_PAD, HIDDEN)),
            wspec((1, HIDDEN)),
            wspec((HIDDEN, HIDDEN)),
            wspec((1, HIDDEN)),
            wspec((HIDDEN, OUT_DIM)),
            wspec((1, OUT_DIM)),
        ],
        out_specs=pl.BlockSpec((tm, OUT_DIM), rowmap),
        compiler_params=pltpu.CompilerParams(
            dimension_semantics=("parallel",)),
    )(x, p["w1"], p["b1"], p["w2"], p["b2"], p["w3"], p["b3"])


def _call_small(x, p, B, out_dtype, quantized):
    """Small-batch path: grid-free fused kernel, whole working set in VMEM
    (~2-4 MiB; default scoped VMEM is plenty, no vmem_limit override)."""
    vmem = pl.BlockSpec(memory_space=pltpu.MemorySpace.VMEM)
    if quantized:
        kernel = _generator_kernel_int8
        args = (x, p["w1"], p["b1"], p["w2q"], p["s2"], p["b2"],
                p["w3q"], p["s3"], p["b3"])
    else:
        kernel = _generator_kernel
        args = (x, p["w1"], p["b1"], p["w2"], p["b2"], p["w3"], p["b3"])
    return pl.pallas_call(
        kernel,
        out_shape=jax.ShapeDtypeStruct((B, OUT_DIM), out_dtype),
        in_specs=[vmem] * len(args),
        out_specs=vmem,
    )(*args)


def _pick_block_b(B):
    """Largest row tile that still gives >= 2 grid steps (amortizes the
    ~0.35 us/step overhead and keeps both v7x TensorCores busy).
    None -> small-batch grid-free kernel (weight-DMA bound anyway)."""
    for tm in (512, 256, 128):
        if B >= 2 * tm:
            return tm
    return None


def generator_forward(noise, y, prepared_params, *, block_b=None,
                      out_dtype=jnp.float32, quantize_small_batch=False):
    """noise: (B, 100), y: (B, 10) -> (B, 1, 28, 28), matching the PyTorch module.

    prepared_params: output of prepare_params().
    block_b: batch row tile for the grid path; auto-selected if None.
    out_dtype: jnp.float32 (default, matches PyTorch) or jnp.bfloat16 to halve
               output writeback at large B.
    quantize_small_batch: use int8 fc2/fc3 weights on the small-batch path.
    """
    B = noise.shape[0]
    # Single fused fc1 input: [noise | y | zero-pad] as bf16, K = 128.
    x = jnp.concatenate([noise, y], axis=1).astype(jnp.bfloat16)
    x = jnp.pad(x, ((0, 0), (0, FC1_IN_PAD - FC1_IN)))

    tm = block_b if block_b is not None else _pick_block_b(B)
    if tm is not None and B > tm:
        try:
            out = _call_tiled(x, prepared_params, B, tm, out_dtype,
                              single_buffer_weights=True)
        except Exception:
            # pl.Buffered(1) unsupported on this jax/libtpu build -> fall back
            # to default double-buffered weight specs (identical math).
            out = _call_tiled(x, prepared_params, B, tm, out_dtype,
                              single_buffer_weights=False)
    else:
        out = _call_small(x, prepared_params, B, out_dtype, quantize_small_batch)
    return out.reshape(B, 1, 28, 28)


# --------------------------- parameter handling ------------------------------

def init_params(key):
    """PyTorch nn.Linear default init: U(-1/sqrt(fan_in), 1/sqrt(fan_in));
    weights stored transposed as (in, out)."""
    keys = jax.random.split(key, 6)

    def linear(kw, kb, fan_in, fan_out):
        bound = 1.0 / jnp.sqrt(jnp.float32(fan_in))
        w = jax.random.uniform(kw, (fan_in, fan_out), jnp.float32, -bound, bound)
        b = jax.random.uniform(kb, (1, fan_out), jnp.float32, -bound, bound)
        return w, b

    w1, b1 = linear(keys[0], keys[1], FC1_IN, HIDDEN)
    w2, b2 = linear(keys[2], keys[3], HIDDEN, HIDDEN)
    w3, b3 = linear(keys[4], keys[5], HIDDEN, OUT_DIM)
    return (w1, b1, w2, b2, w3, b3)


def _quantize_per_channel(w):
    """Symmetric int8 weight quantization, one scale per output channel."""
    amax = jnp.max(jnp.abs(w), axis=0, keepdims=True)          # (1, out)
    scale = jnp.where(amax > 0, amax / 127.0, 1.0)
    wq = jnp.clip(jnp.round(w / scale), -127, 127).astype(jnp.int8)
    return wq, scale.astype(jnp.float32)


def prepare_params(params):
    """One-time conversion for the kernel:
      * W1 zero-padded to (128, 1024): fc1 is a single lane-aligned dot on the
        fused [noise | y | 0] input (no concat and no second dot in the kernel).
      * bf16 weights (halves the dominant weight-DMA bytes), f32 biases.
      * int8 per-output-channel copies of W2/W3 for the small-batch path.
    TODO(synk): fp8 (e4m3) weights for v7x (no integer MXU path there) and a
    cross-pallas_call weight-residency scheme for repeated small-B calls."""
    w1, b1, w2, b2, w3, b3 = params
    w1p = jnp.pad(w1, ((0, FC1_IN_PAD - FC1_IN), (0, 0))).astype(jnp.bfloat16)
    w2q, s2 = _quantize_per_channel(w2)
    w3q, s3 = _quantize_per_channel(w3)
    return {
        "w1": w1p, "b1": b1,
        "w2": w2.astype(jnp.bfloat16), "b2": b2,
        "w3": w3.astype(jnp.bfloat16), "b3": b3,
        "w2q": w2q, "s2": s2, "w3q": w3q, "s3": s3,
    }


# --------------------------------- demo --------------------------------------

if __name__ == "__main__":
    key = jax.random.PRNGKey(0)
    k_params, k_noise, k_y = jax.random.split(key, 3)
    params = prepare_params(init_params(k_params))

    # --- small batch: grid-free fused kernel (bf16 weights) ---
    B = 8
    noise = jax.random.normal(k_noise, (B, NOISE_DIM), jnp.float32)
    labels = jax.random.randint(k_y, (B,), 0, COND_DIM)
    y = jax.nn.one_hot(labels, COND_DIM, dtype=jnp.float32)

    out = jax.block_until_ready(generator_forward(noise, y, params))
    assert out.shape == (B, 1, 28, 28), out.shape
    assert out.dtype == jnp.float32
    assert bool(jnp.all(jnp.isfinite(out)))
    assert bool(jnp.all(jnp.abs(out) <= 1.0 + 1e-6))

    # --- small batch, int8-weight variant (weight-DMA halved) ---
    out_q = jax.block_until_ready(
        generator_forward(noise, y, params, quantize_small_batch=True))
    assert out_q.shape == (B, 1, 28, 28)
    assert bool(jnp.all(jnp.isfinite(out_q)))
    assert bool(jnp.all(jnp.abs(out_q) <= 1.0 + 1e-6))
    # Weight-only int8 (per-channel) should stay close to the bf16 path.
    assert float(jnp.max(jnp.abs(out_q - out))) < 0.25

    # --- larger, NON-multiple batch: ragged batch-tiled grid path ---
    B2 = 300  # cdiv(300, 128) = 3 steps; last block is a masked partial tile
    noise2 = jax.random.normal(k_noise, (B2, NOISE_DIM), jnp.float32)
    labels2 = jax.random.randint(k_y, (B2,), 0, COND_DIM)
    y2 = jax.nn.one_hot(labels2, COND_DIM, dtype=jnp.float32)

    out2 = jax.block_until_ready(generator_forward(noise2, y2, params))
    assert out2.shape == (B2, 1, 28, 28), out2.shape
    assert bool(jnp.all(jnp.isfinite(out2)))
    assert bool(jnp.all(jnp.abs(out2) <= 1.0 + 1e-6))

    print("KERNEL_OK")
</pallas_src>

<mosaic_0001>
module attributes {stable_mosaic.version = 11 : i64} {
  func.func @_generator_kernel(%arg0: memref<8x128xbf16, #tpu.memory_space<vmem>>, %arg1: memref<128x1024xbf16, #tpu.memory_space<vmem>>, %arg2: memref<1x1024xf32, #tpu.memory_space<vmem>>, %arg3: memref<1024x1024xbf16, #tpu.memory_space<vmem>>, %arg4: memref<1x1024xf32, #tpu.memory_space<vmem>>, %arg5: memref<1024x784xbf16, #tpu.memory_space<vmem>>, %arg6: memref<1x784xf32, #tpu.memory_space<vmem>>, %arg7: memref<8x784xf32, #tpu.memory_space<vmem>>) attributes {dimension_semantics = [], scalar_prefetch = 0 : i64, scratch_operands = 0 : i64, tpu.core_type = #tpu.core_type<tc>} {
    %c0 = arith.constant 0 : index
    %c0_0 = arith.constant 0 : index
    %0 = vector.load %arg0[%c0, %c0_0] : memref<8x128xbf16, #tpu.memory_space<vmem>>, vector<8x128xbf16>
    %c0_1 = arith.constant 0 : index
    %c0_2 = arith.constant 0 : index
    %1 = vector.load %arg1[%c0_1, %c0_2] : memref<128x1024xbf16, #tpu.memory_space<vmem>>, vector<128x1024xbf16>
    %cst = arith.constant dense<0.000000e+00> : vector<8x1024xf32>
    %2 = tpu.matmul %0, %1, %cst {dimension_numbers = #tpu.dot_dimension_numbers<[1], [0], [0], [1], [0, 0, 1, 1], [], []>} : vector<8x128xbf16>, vector<128x1024xbf16>, vector<8x1024xf32> -> vector<8x1024xf32>
    %c0_3 = arith.constant 0 : index
    %c0_4 = arith.constant 0 : index
    %3 = vector.load %arg2[%c0_3, %c0_4] : memref<1x1024xf32, #tpu.memory_space<vmem>>, vector<1x1024xf32>
    %4 = vector.broadcast %3 : vector<1x1024xf32> to vector<8x1024xf32>
    %5 = arith.addf %2, %4 : vector<8x1024xf32>
    %cst_5 = arith.constant 0.000000e+00 : f32
    %6 = vector.broadcast %cst_5 : f32 to vector<8x1024xf32>
    %7 = arith.maximumf %5, %6 : vector<8x1024xf32>
    %8 = arith.truncf %7 : vector<8x1024xf32> to vector<8x1024xbf16>
    %c0_6 = arith.constant 0 : index
    %c0_7 = arith.constant 0 : index
    %9 = vector.load %arg3[%c0_6, %c0_7] : memref<1024x1024xbf16, #tpu.memory_space<vmem>>, vector<1024x1024xbf16>
    %cst_8 = arith.constant dense<0.000000e+00> : vector<8x1024xf32>
    %10 = tpu.matmul %8, %9, %cst_8 {dimension_numbers = #tpu.dot_dimension_numbers<[1], [0], [0], [1], [0, 0, 1, 1], [], []>} : vector<8x1024xbf16>, vector<1024x1024xbf16>, vector<8x1024xf32> -> vector<8x1024xf32>
    %c0_9 = arith.constant 0 : index
    %c0_10 = arith.constant 0 : index
    %11 = vector.load %arg4[%c0_9, %c0_10] : memref<1x1024xf32, #tpu.memory_space<vmem>>, vector<1x1024xf32>
    %12 = vector.broadcast %11 : vector<1x1024xf32> to vector<8x1024xf32>
    %13 = arith.addf %10, %12 : vector<8x1024xf32>
    %cst_11 = arith.constant 0.000000e+00 : f32
    %14 = vector.broadcast %cst_11 : f32 to vector<8x1024xf32>
    %15 = arith.maximumf %13, %14 : vector<8x1024xf32>
    %16 = arith.truncf %15 : vector<8x1024xf32> to vector<8x1024xbf16>
    %c0_12 = arith.constant 0 : index
    %c0_13 = arith.constant 0 : index
    %17 = vector.load %arg5[%c0_12, %c0_13] : memref<1024x784xbf16, #tpu.memory_space<vmem>>, vector<1024x784xbf16>
    %cst_14 = arith.constant dense<0.000000e+00> : vector<8x784xf32>
    %18 = tpu.matmul %16, %17, %cst_14 {dimension_numbers = #tpu.dot_dimension_numbers<[1], [0], [0], [1], [0, 0, 1, 1], [], []>} : vector<8x1024xbf16>, vector<1024x784xbf16>, vector<8x784xf32> -> vector<8x784xf32>
    %c0_15 = arith.constant 0 : index
    %c0_16 = arith.constant 0 : index
    %19 = vector.load %arg6[%c0_15, %c0_16] : memref<1x784xf32, #tpu.memory_space<vmem>>, vector<1x784xf32>
    %20 = vector.broadcast %19 : vector<1x784xf32> to vector<8x784xf32>
    %21 = arith.addf %18, %20 : vector<8x784xf32>
    %22 = math.tanh %21 : vector<8x784xf32>
    %c0_17 = arith.constant 0 : index
    %c0_18 = arith.constant 0 : index
    %23 = vector.load %arg7[%c0_17, %c0_18] : memref<8x784xf32, #tpu.memory_space<vmem>>, vector<8x784xf32>
    tpu.vector_store %arg7[%c0_17, %c0_18], %22 {strides = array<i32>} : memref<8x784xf32, #tpu.memory_space<vmem>>, vector<8x784xf32>,
    return
  }
}

</mosaic_0001>

<bundles_post_ra>
// kernel: tpu_custom_call.1
= control target key start
LH: loop header
LB: loop body
LE: loop exit
PB: predicated region body
PF: predicated region fallthrough
CT: control target
= control target key end

     0   :  { %v9844_v8 = vmov 0   ;;  %s13199_s0 = inlined_call_operand.vmem [shape: bf16[8,128], index: 0, kind: input, shape index: {}]   ;;  %s13200_s1 = inlined_call_operand.vmem [shape: bf16[128,1024], index: 1, kind: input, shape index: {}]   ;;  %s13201_s2 = inlined_call_operand.vmem [shape: f32[1,1024], index: 2, kind: input, shape index: {}]   ;;  %s13202_s3 = inlined_call_operand.vmem [shape: bf16[1024,1024], index: 3, kind: input, shape index: {}]   ;;  %s13203_s4 = inlined_call_operand.vmem [shape: f32[1,1024], index: 4, kind: input, shape index: {}]   ;;  %s13204_s5 = inlined_call_operand.vmem [shape: bf16[1024,784], index: 5, kind: input, shape index: {}]   ;;  %s13205_s6 = inlined_call_operand.vmem [shape: f32[1,784], index: 6, kind: input, shape index: {}]   ;;  %s13206_s7 = inlined_call_operand.hbm [shape: f32[8,784], index: 7, kind: output, shape index: {}]  }
   0x1   :  { %v29_v0 = vld [vmem:[%s13200_s1] sm:$0xff]  ;;  %v30_v2 = vld [vmem:[%s13200_s1 + $0x8] sm:$0xff]  ;;  %487 = vmatprep.mubr.bf16.mxu0 %v9844_v8  ;;  %528 = vmatprep.mubr.bf16.mxu1 %v9844_v8  ;;  %v31_v63 = vld [vmem:[%s13200_s1 + $0x10] sm:$0xff] }
   0x2   :  { %v33_v1 = vld [vmem:[%s13200_s1 + $0x20] sm:$0xff]  ;;  %v34_v4 = vld [vmem:[%s13200_s1 + $0x28] sm:$0xff] }
   0x3   :  { %v7956_v3 = vcombine.high %v29_v0, %v33_v1  ;;  %v7955_v5 = vcombine.low %v29_v0, %v33_v1  ;;  %v37_v6 = vld [vmem:[%s13200_s1 + $0x40] sm:$0xff]  ;;  %v7958_v9 = vcombine.high %v30_v2, %v34_v4  ;;  %v7957_v10 = vcombine.low %v30_v2, %v34_v4  ;;  %v38_v12 = vld [vmem:[%s13200_s1 + $0x48] sm:$0xff]  ;;  %v35_v0 = vld [vmem:[%s13200_s1 + $0x30] sm:$0xff] }
   0x4   :  { %v41_v7 = vld [vmem:[%s13200_s1 + $0x60] sm:$0xff]  ;;  %v42_v13 = vld [vmem:[%s13200_s1 + $0x68] sm:$0xff]  ;;  %v32_v1 = vld [vmem:[%s13200_s1 + $0x18] sm:$0xff] }
   0x5   :  { %v7964_v11 = vcombine.high %v37_v6, %v41_v7  ;;  %v45_v14 = vld [vmem:[%s13200_s1 + $0x80] sm:$0xff]  ;;  %455 = vmatprep.subr.bf16.mxu0 %v7956_v3  ;;  %v7966_v15 = vcombine.high %v38_v12, %v42_v13  ;;  %v46_v17 = vld [vmem:[%s13200_s1 + $0x88] sm:$0xff]  ;;  %496 = vmatprep.subr.bf16.mxu1 %v7958_v9  ;;  %v7963_v19 = vcombine.low %v37_v6, %v41_v7  ;;  %v36_v2 = vld [vmem:[%s13200_s1 + $0x38] sm:$0xff] }
   0x6   :  { %v49_v16 = vld [vmem:[%s13200_s1 + $0xa0] sm:$0xff]  ;;  %v50_v18 = vld [vmem:[%s13200_s1 + $0xa8] sm:$0xff]  ;;  %456 = vmatpush1.bf16.msra.mxu0 %v7955_v5  ;;  %497 = vmatpush1.bf16.msra.mxu1 %v7957_v10  ;;  %v7965_v20 = vcombine.low %v38_v12, %v42_v13  ;;  %v7960_v5 = vcombine.high %v31_v63, %v35_v0  ;;  %v39_v6 = vld [vmem:[%s13200_s1 + $0x50] sm:$0xff]  ;;  %v7962_v9 = vcombine.high %v32_v1, %v36_v2 }
   0x7   :  { %457 = vmatprep.subr.bf16.mxu0 %v7964_v11  ;;  %v7972_v21 = vcombine.high %v45_v14, %v49_v16  ;;  %498 = vmatprep.subr.bf16.mxu1 %v7966_v15  ;;  %v7974_v22 = vcombine.high %v46_v17, %v50_v18  ;;  %v53_v23 = vld [vmem:[%s13200_s1 + $0xc0] sm:$0xff]  ;;  %v54_v25 = vld [vmem:[%s13200_s1 + $0xc8] sm:$0xff]  ;;  %v7971_v27 = vcombine.low %v45_v14, %v49_v16  ;;  %v43_v7 = vld [vmem:[%s13200_s1 + $0x70] sm:$0xff] }
   0x8   :  { %v57_v24 = vld [vmem:[%s13200_s1 + $0xe0] sm:$0xff]  ;;  %v58_v26 = vld [vmem:[%s13200_s1 + $0xe8] sm:$0xff]  ;;  %v7973_v28 = vcombine.low %v46_v17, %v50_v18  ;;  %v7959_v11 = vcombine.low %v31_v63, %v35_v0  ;;  %v40_v12 = vld [vmem:[%s13200_s1 + $0x58] sm:$0xff]  ;;  %v7968_v14 = vcombine.high %v39_v6, %v43_v7  ;;  %v7961_v17 = vcombine.low %v32_v1, %v36_v2 }
   0x9   :  { %v7980_v29 = vcombine.high %v53_v23, %v57_v24  ;;  %v7982_v30 = vcombine.high %v54_v25, %v58_v26  ;;  %v61_v31 = vld [vmem:[%s13200_s1 + $0x100] sm:$0xff]  ;;  %v62_v33 = vld [vmem:[%s13200_s1 + $0x108] sm:$0xff]  ;;  %v7979_v35 = vcombine.low %v53_v23, %v57_v24  ;;  %v7981_v36 = vcombine.low %v54_v25, %v58_v26  ;;  %v44_v13 = vld [vmem:[%s13200_s1 + $0x78] sm:$0xff] }
   0xa   :  { %458 = vmatpush1.bf16.msra.mxu0 %v7963_v19  ;;  %499 = vmatpush1.bf16.msra.mxu1 %v7965_v20  ;;  %v65_v32 = vld [vmem:[%s13200_s1 + $0x120] sm:$0xff]  ;;  %v66_v34 = vld [vmem:[%s13200_s1 + $0x128] sm:$0xff]  ;;  %v47_v15 = vld [vmem:[%s13200_s1 + $0x90] sm:$0xff]  ;;  %v7970_v18 = vcombine.high %v40_v12, %v44_v13  ;;  %v7967_v19 = vcombine.low %v39_v6, %v43_v7  ;;  %v7969_v25 = vcombine.low %v40_v12, %v44_v13 }
   0xb   :  { %459 = vmatprep.subr.bf16.mxu0 %v7972_v21  ;;  %500 = vmatprep.subr.bf16.mxu1 %v7974_v22  ;;  %v7988_v37 = vcombine.high %v61_v31, %v65_v32  ;;  %v7990_v38 = vcombine.high %v62_v33, %v66_v34  ;;  %v69_v39 = vld [vmem:[%s13200_s1 + $0x140] sm:$0xff]  ;;  %v70_v41 = vld [vmem:[%s13200_s1 + $0x148] sm:$0xff]  ;;  %v7987_v43 = vcombine.low %v61_v31, %v65_v32  ;;  %v51_v16 = vld [vmem:[%s13200_s1 + $0xb0] sm:$0xff] }
   0xc   :  { %v73_v40 = vld [vmem:[%s13200_s1 + $0x160] sm:$0xff]  ;;  %v74_v42 = vld [vmem:[%s13200_s1 + $0x168] sm:$0xff]  ;;  %v7989_v44 = vcombine.low %v62_v33, %v66_v34  ;;  %v48_v20 = vld [vmem:[%s13200_s1 + $0x98] sm:$0xff]  ;;  %v7976_v22 = vcombine.high %v47_v15, %v51_v16 }
   0xd   :  { %v7996_v45 = vcombine.high %v69_v39, %v73_v40  ;;  %v7998_v46 = vcombine.high %v70_v41, %v74_v42  ;;  %v77_v47 = vld [vmem:[%s13200_s1 + $0x180] sm:$0xff]  ;;  %v78_v49 = vld [vmem:[%s13200_s1 + $0x188] sm:$0xff]  ;;  %v7995_v51 = vcombine.low %v69_v39, %v73_v40  ;;  %v7997_v52 = vcombine.low %v70_v41, %v74_v42  ;;  %v52_v21 = vld [vmem:[%s13200_s1 + $0xb8] sm:$0xff] }
   0xe   :  { %460 = vmatpush1.bf16.msra.mxu0 %v7971_v27  ;;  %501 = vmatpush1.bf16.msra.mxu1 %v7973_v28  ;;  %v81_v48 = vld [vmem:[%s13200_s1 + $0x1a0] sm:$0xff]  ;;  %v82_v50 = vld [vmem:[%s13200_s1 + $0x1a8] sm:$0xff]  ;;  %v55_v23 = vld [vmem:[%s13200_s1 + $0xd0] sm:$0xff]  ;;  %v7978_v26 = vcombine.high %v48_v20, %v52_v21  ;;  %v7975_v27 = vcombine.low %v47_v15, %v51_v16  ;;  %v7977_v32 = vcombine.low %v48_v20, %v52_v21 }
   0xf   :  { %461 = vmatprep.subr.bf16.mxu0 %v7980_v29  ;;  %502 = vmatprep.subr.bf16.mxu1 %v7982_v30  ;;  %v8004_v53 = vcombine.high %v77_v47, %v81_v48  ;;  %v8006_v54 = vcombine.high %v78_v49, %v82_v50  ;;  %v85_v55 = vld [vmem:[%s13200_s1 + $0x1c0] sm:$0xff]  ;;  %v86_v57 = vld [vmem:[%s13200_s1 + $0x1c8] sm:$0xff]  ;;  %v8003_v59 = vcombine.low %v77_v47, %v81_v48  ;;  %v59_v24 = vld [vmem:[%s13200_s1 + $0xf0] sm:$0xff] }
  0x10   :  { %v89_v56 = vld [vmem:[%s13200_s1 + $0x1e0] sm:$0xff]  ;;  %v90_v58 = vld [vmem:[%s13200_s1 + $0x1e8] sm:$0xff]  ;;  %v8005_v60 = vcombine.low %v78_v49, %v82_v50  ;;  %v63_v28 = vld [vmem:[%s13200_s1 + $0x110] sm:$0xff]  ;;  %v7984_v31 = vcombine.high %v55_v23, %v59_v24 }
  0x11   :  { %v8012_v61 = vcombine.high %v85_v55, %v89_v56  ;;  %v8014_v62 = vcombine.high %v86_v57, %v90_v58  ;;  %v8011_v3 = vcombine.low %v85_v55, %v89_v56  ;;  %v8013_v4 = vcombine.low %v86_v57, %v90_v58  ;;  %v10005_v10 = vld [vmem:[%s13199_s0] sm:$0xf]  ;;  %v67_v29 = vld [vmem:[%s13200_s1 + $0x130] sm:$0xff]  ;;  %v56_v30 = vld [vmem:[%s13200_s1 + $0xd8] sm:$0xff] }
  0x12   :  { %462 = vmatpush1.bf16.msra.mxu0 %v7979_v35  ;;  %503 = vmatpush1.bf16.msra.mxu1 %v7981_v36  ;;  %v64_v33 = vld [vmem:[%s13200_s1 + $0x118] sm:$0xff]  ;;  %v7983_v36 = vcombine.low %v55_v23, %v59_v24  ;;  %v7992_v39 = vcombine.high %v63_v28, %v67_v29  ;;  %v635_v1 = vld [vmem:[%s13202_s3] sm:$0xff] }
  0x13   :  { %463 = vmatprep.subr.bf16.mxu0 %v7988_v37  ;;  %504 = vmatprep.subr.bf16.mxu1 %v7990_v38  ;;  %v68_v34 = vld [vmem:[%s13200_s1 + $0x138] sm:$0xff]  ;;  %v71_v37 = vld [vmem:[%s13200_s1 + $0x150] sm:$0xff]  ;;  %v639_v2 = vld [vmem:[%s13202_s3 + $0x20] sm:$0xff] }
  0x14   :  { %v75_v38 = vld [vmem:[%s13200_s1 + $0x170] sm:$0xff]  ;;  %v72_v41 = vld [vmem:[%s13200_s1 + $0x158] sm:$0xff]  ;;  %v7993_v48 = vcombine.low %v64_v33, %v68_v34  ;;  %v775_v6 = vld [vmem:[%s13202_s3 + $0x460] sm:$0xff]  ;;  %v8020_v13 = vcombine.high %v635_v1, %v639_v2 }
  0x15   :  { %v76_v42 = vld [vmem:[%s13200_s1 + $0x178] sm:$0xff]  ;;  %v8000_v47 = vcombine.high %v71_v37, %v75_v38  ;;  %v647_v12 = vld [vmem:[%s13202_s3 + $0x60] sm:$0xff] }
  0x16   :  { %464 = vmatpush1.bf16.msra.mxu0 %v7987_v43  ;;  %505 = vmatpush1.bf16.msra.mxu1 %v7989_v44  ;;  %v7994_v43 = vcombine.high %v64_v33, %v68_v34  ;;  %v7991_v44 = vcombine.low %v63_v28, %v67_v29  ;;  %v80_v49 = vld [vmem:[%s13200_s1 + $0x198] sm:$0xff]  ;;  %v8001_v56 = vcombine.low %v72_v41, %v76_v42  ;;  %v779_v15 = vld [vmem:[%s13202_s3 + $0x480] sm:$0xff] }
  0x17   :  { %465 = vmatprep.subr.bf16.mxu0 %v7996_v45  ;;  %506 = vmatprep.subr.bf16.mxu1 %v7998_v46  ;;  %v79_v45 = vld [vmem:[%s13200_s1 + $0x190] sm:$0xff]  ;;  %v84_v50 = vld [vmem:[%s13200_s1 + $0x1b8] sm:$0xff]  ;;  %v783_v16 = vld [vmem:[%s13202_s3 + $0x4a0] sm:$0xff] }
  0x18   :  { %v83_v46 = vld [vmem:[%s13200_s1 + $0x1b0] sm:$0xff]  ;;  %v88_v57 = vld [vmem:[%s13200_s1 + $0x1d8] sm:$0xff]  ;;  %v8009_v0 = vcombine.low %v80_v49, %v84_v50  ;;  %v655_v20 = vld [vmem:[%s13202_s3 + $0xa0] sm:$0xff] }
  0x19   :  { %v8008_v55 = vcombine.high %v79_v45, %v83_v46  ;;  %v92_v58 = vld [vmem:[%s13200_s1 + $0x1f8] sm:$0xff]  ;;  %v787_v23 = vld [vmem:[%s13202_s3 + $0x4c0] sm:$0xff] }
  0x1a   :  { %466 = vmatpush1.bf16.msra.mxu0 %v7995_v51  ;;  %507 = vmatpush1.bf16.msra.mxu1 %v7997_v52  ;;  %v8002_v51 = vcombine.high %v72_v41, %v76_v42  ;;  %v7999_v52 = vcombine.low %v71_v37, %v75_v38  ;;  %v791_v24 = vld [vmem:[%s13202_s3 + $0x4e0] sm:$0xff] }
  0x1b   :  { %467 = vmatprep.subr.bf16.mxu0 %v8004_v53  ;;  %508 = vmatprep.subr.bf16.mxu1 %v8006_v54  ;;  %v87_v53 = vld [vmem:[%s13200_s1 + $0x1d0] sm:$0xff]  ;;  %v663_v28 = vld [vmem:[%s13202_s3 + $0xe0] sm:$0xff] }
  0x1c   :  { %v91_v54 = vld [vmem:[%s13200_s1 + $0x1f0] sm:$0xff]  ;;  %v667_v33 = vld [vmem:[%s13202_s3 + $0x100] sm:$0xff] }
  0x1d   :  { %v8016_v63 = vcombine.high %v87_v53, %v91_v54  ;;  %v671_v34 = vld [vmem:[%s13202_s3 + $0x120] sm:$0xff] }
  0x1e   :  { %468 = vmatpush1.bf16.msra.mxu0 %v8003_v59  ;;  %509 = vmatpush1.bf16.msra.mxu1 %v8005_v60  ;;  %v8010_v59 = vcombine.high %v80_v49, %v84_v50  ;;  %v8007_v60 = vcombine.low %v79_v45, %v83_v46  ;;  %v803_v37 = vld [vmem:[%s13202_s3 + $0x540] sm:$0xff] }
  0x1f   :  { %469 = vmatprep.subr.bf16.mxu0 %v8012_v61  ;;  %510 = vmatprep.subr.bf16.mxu1 %v8014_v62  ;;  %v763_v61 = vld [vmem:[%s13202_s3 + $0x400] sm:$0xff] }
  0x20   :  { %v767_v62 = vld [vmem:[%s13202_s3 + $0x420] sm:$0xff] }
  0x21   :  { %v8148_v7 = vcombine.high %v763_v61, %v767_v62  ;;  %v807_v38 = vld [vmem:[%s13202_s3 + $0x560] sm:$0xff] }
  0x22   :  { %470 = vmatpush1.bf16.msra.mxu0 %v8011_v3  ;;  %511 = vmatpush1.bf16.msra.mxu1 %v8013_v4  ;;  %v8018_v3 = vcombine.high %v88_v57, %v92_v58  ;;  %v8015_v4 = vcombine.low %v87_v53, %v91_v54  ;;  %v675_v41 = vld [vmem:[%s13202_s3 + $0x140] sm:$0xff] }
  0x23   :  { %537 = vmatprep.subr.bf16.mxu0 %v7960_v5  ;;  %578 = vmatprep.subr.bf16.mxu1 %v7962_v9  ;;  %v771_v5 = vld [vmem:[%s13202_s3 + $0x440] sm:$0xff]  ;;  %v8017_v9 = vcombine.low %v88_v57, %v92_v58 }
  0x24   :  { %v679_v42 = vld [vmem:[%s13202_s3 + $0x160] sm:$0xff] }
  0x25   :  { %488 = vmatmul.mubr.bf16.vlgmr.msra.gmra.mrb[0].mxu0 %v10005_v10  ;;  %529 = vmatmul.mubr.bf16.vlgmr.msra.gmra.mrb[0].mxu1 %v10005_v10  ;;  %v811_v45 = vld [vmem:[%s13202_s3 + $0x580] sm:$0xff] }
  0x26   :  { %538 = vmatpush1.bf16.msra.mxu0 %v7959_v11  ;;  %569 = vmatprep.mubr.bf16.mxu0 %v9844_v8  ;;  %v643_v11 = vld [vmem:[%s13202_s3 + $0x40] sm:$0xff] }
  0x27   :  { %539 = vmatprep.subr.bf16.mxu0 %v7968_v14  ;;  %579 = vmatpush1.bf16.msra.mxu1 %v7961_v17  ;;  %v8147_v14 = vcombine.low %v763_v61, %v767_v62  ;;  %v8156_v17 = vcombine.high %v771_v5, %v775_v6  ;;  %v8028_v21 = vcombine.high %v643_v11, %v647_v12  ;;  %v815_v46 = vld [vmem:[%s13202_s3 + $0x5a0] sm:$0xff] }
  0x28   :  { %610 = vmatprep.mubr.bf16.mxu1 %v9844_v8  ;;  %580 = vmatprep.subr.bf16.mxu1 %v7970_v18  ;;  %v60_v8 = vld [vmem:[%s13200_s1 + $0xf8] sm:$0xff]  ;;  %v8019_v18 = vcombine.low %v635_v1, %v639_v2  ;;  %v683_v49 = vld [vmem:[%s13202_s3 + $0x180] sm:$0xff] }
  0x29   :  { %v7986_v35 = vcombine.high %v56_v30, %v60_v8  ;;  %v7985_v40 = vcombine.low %v56_v30, %v60_v8  ;;  %v8163_v30 = vcombine.low %v779_v15, %v783_v16  ;;  %v799_v8 = vld [vmem:[%s13202_s3 + $0x520] sm:$0xff] }
  0x2a   :  { %540 = vmatpush1.bf16.msra.mxu0 %v7967_v19  ;;  %v651_v19 = vld [vmem:[%s13202_s3 + $0x80] sm:$0xff] }
  0x2b   :  { %541 = vmatprep.subr.bf16.mxu0 %v7976_v22  ;;  %581 = vmatpush1.bf16.msra.mxu1 %v7969_v25  ;;  %v8155_v22 = vcombine.low %v771_v5, %v775_v6  ;;  %v8164_v25 = vcombine.high %v779_v15, %v783_v16  ;;  %v8036_v29 = vcombine.high %v651_v19, %v655_v20  ;;  %v687_v50 = vld [vmem:[%s13202_s3 + $0x1a0] sm:$0xff] }
  0x2c   :  { %582 = vmatprep.subr.bf16.mxu1 %v7978_v26  ;;  %v8027_v26 = vcombine.low %v643_v11, %v647_v12  ;;  %v819_v53 = vld [vmem:[%s13202_s3 + $0x5c0] sm:$0xff] }
  0x2d   :  { %v823_v54 = vld [vmem:[%s13202_s3 + $0x5e0] sm:$0xff] }
  0x2e   :  { %542 = vmatpush1.bf16.msra.mxu0 %v7975_v27  ;;  %v659_v27 = vld [vmem:[%s13202_s3 + $0xc0] sm:$0xff] }
  0x2f   :  { %543 = vmatprep.subr.bf16.mxu0 %v7984_v31  ;;  %583 = vmatpush1.bf16.msra.mxu1 %v7977_v32  ;;  %v8172_v31 = vcombine.high %v787_v23, %v791_v24  ;;  %v8035_v32 = vcombine.low %v651_v19, %v655_v20  ;;  %v691_v57 = vld [vmem:[%s13202_s3 + $0x1c0] sm:$0xff] }
  0x30   :  { %584 = vmatprep.subr.bf16.mxu1 %v7986_v35  ;;  %v8044_v35 = vcombine.high %v659_v27, %v663_v28  ;;  %v695_v58 = vld [vmem:[%s13202_s3 + $0x1e0] sm:$0xff] }
  0x31   :  { %v827_v61 = vld [vmem:[%s13202_s3 + $0x600] sm:$0xff] }
  0x32   :  { %544 = vmatpush1.bf16.msra.mxu0 %v7983_v36  ;;  %v8171_v36 = vcombine.low %v787_v23, %v791_v24  ;;  %v831_v62 = vld [vmem:[%s13202_s3 + $0x620] sm:$0xff] }
  0x33   :  { %545 = vmatprep.subr.bf16.mxu0 %v7992_v39  ;;  %585 = vmatpush1.bf16.msra.mxu1 %v7985_v40  ;;  %v8043_v40 = vcombine.low %v659_v27, %v663_v28  ;;  %v699_v1 = vld [vmem:[%s13202_s3 + $0x200] sm:$0xff] }
  0x34   :  { %586 = vmatprep.subr.bf16.mxu1 %v7994_v43  ;;  %v8052_v43 = vcombine.high %v667_v33, %v671_v34  ;;  %v703_v2 = vld [vmem:[%s13202_s3 + $0x220] sm:$0xff] }
  0x35   :  { %v835_v5 = vld [vmem:[%s13202_s3 + $0x640] sm:$0xff] }
  0x36   :  { %546 = vmatpush1.bf16.msra.mxu0 %v7991_v44  ;;  %v839_v6 = vld [vmem:[%s13202_s3 + $0x660] sm:$0xff] }
  0x37   :  { %547 = vmatprep.subr.bf16.mxu0 %v8000_v47  ;;  %587 = vmatpush1.bf16.msra.mxu1 %v7993_v48  ;;  %v8188_v47 = vcombine.high %v803_v37, %v807_v38  ;;  %v8051_v48 = vcombine.low %v667_v33, %v671_v34  ;;  %v707_v11 = vld [vmem:[%s13202_s3 + $0x240] sm:$0xff] }
  0x38   :  { %588 = vmatprep.subr.bf16.mxu1 %v8002_v51  ;;  %v8060_v51 = vcombine.high %v675_v41, %v679_v42  ;;  %v711_v12 = vld [vmem:[%s13202_s3 + $0x260] sm:$0xff] }
  0x39   :  { %v843_v15 = vld [vmem:[%s13202_s3 + $0x680] sm:$0xff] }
  0x3a   :  { %548 = vmatpush1.bf16.msra.mxu0 %v7999_v52  ;;  %v8187_v52 = vcombine.low %v803_v37, %v807_v38  ;;  %v847_v16 = vld [vmem:[%s13202_s3 + $0x6a0] sm:$0xff] }
  0x3b   :  { %549 = vmatprep.subr.bf16.mxu0 %v8008_v55  ;;  %589 = vmatpush1.bf16.msra.mxu1 %v8001_v56  ;;  %v8196_v55 = vcombine.high %v811_v45, %v815_v46  ;;  %v8059_v56 = vcombine.low %v675_v41, %v679_v42  ;;  %v715_v19 = vld [vmem:[%s13202_s3 + $0x280] sm:$0xff] }
  0x3c   :  { %590 = vmatprep.subr.bf16.mxu1 %v8010_v59  ;;  %v8068_v59 = vcombine.high %v683_v49, %v687_v50  ;;  %v719_v20 = vld [vmem:[%s13202_s3 + $0x2a0] sm:$0xff] }
  0x3d   :  { %v851_v23 = vld [vmem:[%s13202_s3 + $0x6c0] sm:$0xff] }
  0x3e   :  { %550 = vmatpush1.bf16.msra.mxu0 %v8007_v60  ;;  %v8195_v60 = vcombine.low %v811_v45, %v815_v46  ;;  %v855_v24 = vld [vmem:[%s13202_s3 + $0x6e0] sm:$0xff] }
  0x3f   :  { %551 = vmatprep.subr.bf16.mxu0 %v8016_v63  ;;  %591 = vmatpush1.bf16.msra.mxu1 %v8009_v0  ;;  %v8204_v63 = vcombine.high %v819_v53, %v823_v54  ;;  %v8067_v0 = vcombine.low %v683_v49, %v687_v50  ;;  %v723_v27 = vld [vmem:[%s13202_s3 + $0x2c0] sm:$0xff] }
  0x40   :  { %592 = vmatprep.subr.bf16.mxu1 %v8018_v3  ;;  %v8076_v3 = vcombine.high %v691_v57, %v695_v58  ;;  %v727_v28 = vld [vmem:[%s13202_s3 + $0x2e0] sm:$0xff] }
  0x41   :  { %v731_v33 = vld [vmem:[%s13202_s3 + $0x300] sm:$0xff] }
  0x42   :  { %552 = vmatpush1.bf16.msra.mxu0 %v8015_v4  ;;  %v8203_v4 = vcombine.low %v819_v53, %v823_v54  ;;  %v735_v34 = vld [vmem:[%s13202_s3 + $0x320] sm:$0xff] }
  0x43   :  { %3790 = vmatprep.subr.bf16.mxu0 %v8148_v7  ;;  %593 = vmatpush1.bf16.msra.mxu1 %v8017_v9  ;;  %v8212_v7 = vcombine.high %v827_v61, %v831_v62  ;;  %v8075_v9 = vcombine.low %v691_v57, %v695_v58  ;;  %v867_v37 = vld [vmem:[%s13202_s3 + $0x740] sm:$0xff]  ;;  %v8115_v46 = vcombine.low %v731_v33, %v735_v34 }
  0x44   :  { %3749 = vmatprep.subr.bf16.mxu1 %v8020_v13  ;;  %v8084_v13 = vcombine.high %v699_v1, %v703_v2  ;;  %v871_v38 = vld [vmem:[%s13202_s3 + $0x760] sm:$0xff] }
  0x45   :  { %570 = vmatmul.mubr.bf16.vlgmr.msra.gmra.mrb[4].mxu0 %v10005_v10  ;;  %v739_v41 = vld [vmem:[%s13202_s3 + $0x340] sm:$0xff]  ;;  %v8252_v45 = vcombine.high %v867_v37, %v871_v38 }
  0x46   :  { %3791 = vmatpush1.bf16.msra.mxu0 %v8147_v14  ;;  %611 = vmatmul.mubr.bf16.vlgmr.msra.gmra.mrb[4].mxu1 %v10005_v10  ;;  %v795_v10 = vld [vmem:[%s13202_s3 + $0x500] sm:$0xff]  ;;  %v8211_v14 = vcombine.low %v827_v61, %v831_v62 }
  0x47   :  { %3792 = vmatprep.subr.bf16.mxu0 %v8156_v17  ;;  %3750 = vmatpush1.bf16.msra.mxu1 %v8019_v18  ;;  %v8180_v39 = vcombine.high %v795_v10, %v799_v8  ;;  %v8179_v44 = vcombine.low %v795_v10, %v799_v8  ;;  %v8220_v17 = vcombine.high %v835_v5, %v839_v6  ;;  %v859_v10 = vld [vmem:[%s13202_s3 + $0x700] sm:$0xff] }
  0x48   :  { %3751 = vmatprep.subr.bf16.mxu1 %v8028_v21  ;;  %v8083_v18 = vcombine.low %v699_v1, %v703_v2  ;;  %v8092_v21 = vcombine.high %v707_v11, %v711_v12  ;;  %v863_v8 = vld [vmem:[%s13202_s3 + $0x720] sm:$0xff] }
  0x49   :  { %v743_v42 = vld [vmem:[%s13202_s3 + $0x360] sm:$0xff] }
  0x4a   :  { %3793 = vmatpush1.bf16.msra.mxu0 %v8155_v22  ;;  %v8219_v22 = vcombine.low %v835_v5, %v839_v6  ;;  %v747_v49 = vld [vmem:[%s13202_s3 + $0x380] sm:$0xff]  ;;  %v8123_v53 = vcombine.low %v739_v41, %v743_v42  ;;  %v640_v5 = vld [vmem:[%s13202_s3 + $0x28] sm:$0xff] }
  0x4b   :  { %3794 = vmatprep.subr.bf16.mxu0 %v8164_v25  ;;  %3752 = vmatpush1.bf16.msra.mxu1 %v8027_v26  ;;  %v8228_v25 = vcombine.high %v843_v15, %v847_v16  ;;  %v8091_v26 = vcombine.low %v707_v11, %v711_v12  ;;  %v751_v50 = vld [vmem:[%s13202_s3 + $0x3a0] sm:$0xff]  ;;  %v95_v12 = vlaneseq }
  0x4c   :  { %3753 = vmatprep.subr.bf16.mxu1 %v8036_v29  ;;  %v8100_v29 = vcombine.high %v715_v19, %v719_v20  ;;  %v755_v57 = vld [vmem:[%s13202_s3 + $0x3c0] sm:$0xff]  ;;  %v8131_v61 = vcombine.low %v747_v49, %v751_v50 }
  0x4d   :  { %v759_v58 = vld [vmem:[%s13202_s3 + $0x3e0] sm:$0xff] }
  0x4e   :  { %3795 = vmatpush1.bf16.msra.mxu0 %v8163_v30  ;;  %v8227_v30 = vcombine.low %v843_v15, %v847_v16  ;;  %v10286_v1 = vld [vmem:[%s13202_s3 + $0x800] sm:$0xff]  ;;  %v8139_v6 = vcombine.low %v755_v57, %v759_v58 }
  0x4f   :  { %3796 = vmatprep.subr.bf16.mxu0 %v8172_v31  ;;  %3754 = vmatpush1.bf16.msra.mxu1 %v8035_v32  ;;  %v8236_v31 = vcombine.high %v851_v23, %v855_v24  ;;  %v8099_v32 = vcombine.low %v715_v19, %v719_v20  ;;  %v895_v2 = vld [vmem:[%s13202_s3 + $0x820] sm:$0xff] }
  0x50   :  { %3755 = vmatprep.subr.bf16.mxu1 %v8044_v35  ;;  %v8108_v35 = vcombine.high %v723_v27, %v727_v28 }
  0x52   :  { %3797 = vmatpush1.bf16.msra.mxu0 %v8171_v36  ;;  %v8235_v36 = vcombine.low %v851_v23, %v855_v24 }
  0x53   :  { %3798 = vmatprep.subr.bf16.mxu0 %v8180_v39  ;;  %3756 = vmatpush1.bf16.msra.mxu1 %v8043_v40  ;;  %v8244_v39 = vcombine.high %v859_v10, %v863_v8  ;;  %v8107_v40 = vcombine.low %v723_v27, %v727_v28 }
  0x54   :  { %3757 = vmatprep.subr.bf16.mxu1 %v8052_v43  ;;  %v8116_v43 = vcombine.high %v731_v33, %v735_v34  ;;  %v903_v33 = vld [vmem:[%s13202_s3 + $0x860] sm:$0xff]  ;;  %v644_v34 = vld [vmem:[%s13202_s3 + $0x48] sm:$0xff] }
  0x56   :  { %3799 = vmatpush1.bf16.msra.mxu0 %v8179_v44  ;;  %v8243_v44 = vcombine.low %v859_v10, %v863_v8 }
  0x57   :  { %3800 = vmatprep.subr.bf16.mxu0 %v8188_v47  ;;  %3758 = vmatpush1.bf16.msra.mxu1 %v8051_v48  ;;  %v8124_v47 = vcombine.high %v739_v41, %v743_v42  ;;  %v8251_v48 = vcombine.low %v867_v37, %v871_v38  ;;  %v648_v38 = vld [vmem:[%s13202_s3 + $0x68] sm:$0xff] }
  0x58   :  { %3759 = vmatprep.subr.bf16.mxu1 %v8060_v51  ;;  %v875_v51 = vld [vmem:[%s13202_s3 + $0x780] sm:$0xff] }
  0x5a   :  { %3801 = vmatpush1.bf16.msra.mxu0 %v8187_v52  ;;  %v879_v52 = vld [vmem:[%s13202_s3 + $0x7a0] sm:$0xff] }
  0x5b   :  { %3802 = vmatprep.subr.bf16.mxu0 %v8196_v55  ;;  %3760 = vmatpush1.bf16.msra.mxu1 %v8059_v56  ;;  %v8260_v54 = vcombine.high %v875_v51, %v879_v52  ;;  %v8132_v55 = vcombine.high %v747_v49, %v751_v50  ;;  %v8259_v56 = vcombine.low %v875_v51, %v879_v52  ;;  %v656_v50 = vld [vmem:[%s13202_s3 + $0xa8] sm:$0xff] }
  0x5c   :  { %3761 = vmatprep.subr.bf16.mxu1 %v8068_v59  ;;  %v883_v59 = vld [vmem:[%s13202_s3 + $0x7c0] sm:$0xff]  ;;  %v8030_v49 = vcombine.high %v644_v34, %v648_v38  ;;  %v8029_v51 = vcombine.low %v644_v34, %v648_v38 }
  0x5e   :  { %3803 = vmatpush1.bf16.msra.mxu0 %v8195_v60  ;;  %v887_v60 = vld [vmem:[%s13202_s3 + $0x7e0] sm:$0xff] }
  0x5f   :  { %3804 = vmatprep.subr.bf16.mxu0 %v8204_v63  ;;  %3762 = vmatpush1.bf16.msra.mxu1 %v8067_v0  ;;  %v8268_v62 = vcombine.high %v883_v59, %v887_v60  ;;  %v8140_v63 = vcombine.high %v755_v57, %v759_v58  ;;  %v8267_v0 = vcombine.low %v883_v59, %v887_v60  ;;  %v915_v57 = vld [vmem:[%s13202_s3 + $0x8c0] sm:$0xff] }
  0x60   :  { %3763 = vmatprep.subr.bf16.mxu1 %v8076_v3  ;;  %v636_v3 = vld [vmem:[%s13202_s3 + $0x8] sm:$0xff]  ;;  %v919_v58 = vld [vmem:[%s13202_s3 + $0x8e0] sm:$0xff] }
  0x61   :  { %v8022_v11 = vcombine.high %v636_v3, %v640_v5 }
  0x62   :  { %3805 = vmatpush1.bf16.msra.mxu0 %v8203_v4  ;;  %v8276_v4 = vcombine.high %v10286_v1, %v895_v2 }
  0x63   :  { %3806 = vmatprep.subr.bf16.mxu0 %v8212_v7  ;;  %3764 = vmatpush1.bf16.msra.mxu1 %v8075_v9  ;;  %v8275_v7 = vcombine.low %v10286_v1, %v895_v2  ;;  %v8021_v9 = vcombine.low %v636_v3, %v640_v5 }
  0x64   :  { %3765 = vmatprep.subr.bf16.mxu1 %v8084_v13  ;;  %v10299_v13 = vshrl.u32 %v95_v12, 7 }
  0x66   :  { %3807 = vmatpush1.bf16.msra.mxu0 %v8211_v14  ;;  %v10304_v14 = vld [vmem:[%s13201_s2] sm:$0xff]  ;;  %v10307_v15 = vsub.s32 0, %v10299_v13  ;;  %v10310_v16 = vsub.s32 2, %v10299_v13 }
  0x67   :  { %3808 = vmatprep.subr.bf16.mxu0 %v8220_v17  ;;  %3766 = vmatpush1.bf16.msra.mxu1 %v8083_v18  ;;  %v10313_v17 = vsub.s32 1, %v10299_v13  ;;  %v10316_v18 = vsub.s32 3, %v10299_v13 }
  0x68   :  { %3767 = vmatprep.subr.bf16.mxu1 %v8092_v21  ;;  %v98_v19 = vrot.slane %v10304_v14, %v10307_v15  ;;  %v106_v20 = vrot.slane %v10304_v14, %v10310_v16 }
  0x69   :  { %v102_v21 = vrot.slane %v10304_v14, %v10313_v17 }
  0x6a   :  { %3809 = vmatpush1.bf16.msra.mxu0 %v8219_v22  ;;  %v110_v22 = vrot.slane %v10304_v14, %v10316_v18 }
  0x6b   :  { %3810 = vmatprep.subr.bf16.mxu0 %v8228_v25  ;;  %3768 = vmatpush1.bf16.msra.mxu1 %v8091_v26 }
  0x6c   :  { %3769 = vmatprep.subr.bf16.mxu1 %v8100_v29 }
  0x6e   :  { %3811 = vmatpush1.bf16.msra.mxu0 %v8227_v30 }
  0x6f   :  { %3812 = vmatprep.subr.bf16.mxu0 %v8236_v31  ;;  %3770 = vmatpush1.bf16.msra.mxu1 %v8099_v32  ;;  %v899_v32 = vld [vmem:[%s13202_s3 + $0x840] sm:$0xff] }
  0x70   :  { %3771 = vmatprep.subr.bf16.mxu1 %v8108_v35  ;;  %v8283_v52 = vcombine.low %v899_v32, %v903_v33 }
  0x72   :  { %3813 = vmatpush1.bf16.msra.mxu0 %v8235_v36 }
  0x73   :  { %3814 = vmatprep.subr.bf16.mxu0 %v8244_v39  ;;  %3772 = vmatpush1.bf16.msra.mxu1 %v8107_v40 }
  0x74   :  { %3773 = vmatprep.subr.bf16.mxu1 %v8116_v43 }
  0x76   :  { %3815 = vmatpush1.bf16.msra.mxu0 %v8243_v44 }
  0x77   :  { %3816 = vmatprep.subr.bf16.mxu0 %v8252_v45  ;;  %3774 = vmatpush1.bf16.msra.mxu1 %v8115_v46  ;;  %v907_v45 = vld [vmem:[%s13202_s3 + $0x880] sm:$0xff] }
  0x78   :  { %3775 = vmatprep.subr.bf16.mxu1 %v8124_v47  ;;  %v911_v46 = vld [vmem:[%s13202_s3 + $0x8a0] sm:$0xff]  ;;  %v652_v47 = vld [vmem:[%s13202_s3 + $0x88] sm:$0xff] }
  0x7a   :  { %3817 = vmatpush1.bf16.msra.mxu0 %v8251_v48  ;;  %v8284_v48 = vcombine.high %v899_v32, %v903_v33 }
  0x7b   :  { %3818 = vmatprep.subr.bf16.mxu0 %v8260_v54  ;;  %3776 = vmatpush1.bf16.msra.mxu1 %v8123_v53  ;;  %v8038_v53 = vcombine.high %v652_v47, %v656_v50  ;;  %v8292_v54 = vcombine.high %v907_v45, %v911_v46 }
  0x7c   :  { %3777 = vmatprep.subr.bf16.mxu1 %v8132_v55  ;;  %v660_v55 = vld [vmem:[%s13202_s3 + $0xc8] sm:$0xff] }
  0x7e   :  { %3819 = vmatpush1.bf16.msra.mxu0 %v8259_v56  ;;  %v664_v56 = vld [vmem:[%s13202_s3 + $0xe8] sm:$0xff] }
  0x7f   :  { %3820 = vmatprep.subr.bf16.mxu0 %v8268_v62  ;;  %3778 = vmatpush1.bf16.msra.mxu1 %v8131_v61 }
  0x80   :  { %3779 = vmatprep.subr.bf16.mxu1 %v8140_v63 }
  0x82   :  { %3821 = vmatpush1.bf16.msra.mxu0 %v8267_v0 }
  0x83   :  { %3831 = vmatprep.subr.bf16.mxu0 %v8276_v4  ;;  %3780 = vmatpush1.bf16.msra.mxu1 %v8139_v6 }
  0x84   :  { %3913 = vmatprep.subr.bf16.mxu1 %v8022_v11 }
  0xf8   :  { %v489_v23 = vpop.f32.mrb[0].mxu0  ;;  %v530_v25 = vpop.f32.mrb[0].mxu1 }
  0xf9   :  { %v490_v24 = vadd.f32 %v489_v23, %v98_v19  ;;  %v491_v26 = vpop.f32.mrb[1].mxu0  ;;  %v531_v27 = vadd.f32 %v530_v25, %v106_v20  ;;  %v532_v29 = vpop.f32.mrb[1].mxu1 }
  0xfa   :  { %v492_v28 = vadd.f32 %v491_v26, %v102_v21  ;;  %v493_v30 = vpop.f32.mrb[2].mxu0  ;;  %v533_v8 = vadd.f32 %v532_v29, %v110_v22  ;;  %v534_v35 = vpop.f32.mrb[2].mxu1 }
  0xfb   :  { %v619_v10 = vmax.f32 %v490_v24, 0.0  ;;  %v494_v31 = vpop.f32.mrb[3].mxu0  ;;  %v621_v36 = vmax.f32 %v531_v27, 0.0  ;;  %v535_v39 = vpop.f32.mrb[3].mxu1 }
  0xfc   :  { %v620_v37 = vmax.f32 %v492_v28, 0.0  ;;  %v622_v40 = vmax.f32 %v533_v8, 0.0 }
  0xfd   :  { %v10338_v41 = vpack.c.bf16 %v621_v36, %v621_v36  ;;  %v10342_v43 = vpack.c.bf16 %v619_v10, %v619_v10 }
  0xfe   :  { %v10340_v42 = vpack.c.bf16 %v620_v37, %v620_v37  ;;  %v10344_v44 = vpack.c.bf16 %v622_v40, %v622_v40 }
 0x100   :  { %3781 = vmatprep.mubr.bf16.mxu1 %v10340_v42  ;;  %3822 = vmatprep.mubr.bf16.mxu0 %v10344_v44 }
 0x101   :  { %3782 = vmatmul.mubr.bf16.vlgmr.msra.gmra.mrb[8].mxu1 %v10342_v43  ;;  %3823 = vmatmul.mubr.bf16.vlgmr.msra.gmra.mrb[8].mxu0 %v10338_v41 }
 0x102   :  { %3914 = vmatpush1.bf16.msra.mxu1 %v8021_v9  ;;  %3832 = vmatpush1.bf16.msra.mxu0 %v8275_v7 }
 0x103   :  { %3945 = vmatprep.mubr.bf16.mxu1 %v10340_v42  ;;  %3833 = vmatprep.subr.bf16.mxu0 %v8284_v48 }
 0x104   :  { %3915 = vmatprep.subr.bf16.mxu1 %v8030_v49 }
 0x105   :  { %12 = vsyncpa [#allocation3], 0  ;;  %v8037_v59 = vcombine.low %v652_v47, %v656_v50  ;;  %v8291_v60 = vcombine.low %v907_v45, %v911_v46  ;;  %v8046_v61 = vcombine.high %v660_v55, %v664_v56  ;;  %v8300_v62 = vcombine.high %v915_v57, %v919_v58  ;;  %v668_v63 = vld [vmem:[%s13202_s3 + $0x108] sm:$0xff]  ;;  %v923_v1 = vld [vmem:[%s13202_s3 + $0x900] sm:$0xff] }
 0x106   :  { %3916 = vmatpush1.bf16.msra.mxu1 %v8029_v51  ;;  %3834 = vmatpush1.bf16.msra.mxu0 %v8283_v52  ;;  %v672_v0 = vld [vmem:[%s13202_s3 + $0x128] sm:$0xff]  ;;  %v927_v2 = vld [vmem:[%s13202_s3 + $0x920] sm:$0xff]  ;;  %v8045_v3 = vcombine.low %v660_v55, %v664_v56  ;;  %v8299_v4 = vcombine.low %v915_v57, %v919_v58  ;;  %v10412_v28 = vsub.s32 5, %v10299_v13  ;;  %vm7939_vm0 = vcmask 130048  }
 0x107   :  { %3917 = vmatprep.subr.bf16.mxu1 %v8038_v53  ;;  %3835 = vmatprep.subr.bf16.mxu0 %v8292_v54  ;;  %v8054_v5 = vcombine.high %v668_v63, %v672_v0  ;;  %v8308_v6 = vcombine.high %v923_v1, %v927_v2  ;;  %v676_v7 = vld [vmem:[%s13202_s3 + $0x148] sm:$0xff]  ;;  %v931_v11 = vld [vmem:[%s13202_s3 + $0x940] sm:$0xff]  ;;  %v8053_v19 = vcombine.low %v668_v63, %v672_v0 }
 0x108   :  { %v680_v9 = vld [vmem:[%s13202_s3 + $0x168] sm:$0xff]  ;;  %v935_v12 = vld [vmem:[%s13202_s3 + $0x960] sm:$0xff]  ;;  %v8307_v20 = vcombine.low %v923_v1, %v927_v2  ;;  %v118_v35 = vrot.slane %v10304_v14, %v10412_v28 }
 0x109   :  { %v8062_v21 = vcombine.high %v676_v7, %v680_v9  ;;  %v8316_v22 = vcombine.high %v931_v11, %v935_v12  ;;  %v684_v23 = vld [vmem:[%s13202_s3 + $0x188] sm:$0xff]  ;;  %v939_v25 = vld [vmem:[%s13202_s3 + $0x980] sm:$0xff]  ;;  %v8061_v27 = vcombine.low %v676_v7, %v680_v9  ;;  %v8315_v29 = vcombine.low %v931_v11, %v935_v12 }
 0x10a   :  { %3918 = vmatpush1.bf16.msra.mxu1 %v8037_v59  ;;  %3836 = vmatpush1.bf16.msra.mxu0 %v8291_v60  ;;  %v688_v24 = vld [vmem:[%s13202_s3 + $0x1a8] sm:$0xff]  ;;  %v943_v26 = vld [vmem:[%s13202_s3 + $0x9a0] sm:$0xff] }
 0x10b   :  { %3919 = vmatprep.subr.bf16.mxu1 %v8046_v61  ;;  %3837 = vmatprep.subr.bf16.mxu0 %v8300_v62  ;;  %v8070_v30 = vcombine.high %v684_v23, %v688_v24  ;;  %v8324_v10 = vcombine.high %v939_v25, %v943_v26  ;;  %v692_v8 = vld [vmem:[%s13202_s3 + $0x1c8] sm:$0xff]  ;;  %v947_v32 = vld [vmem:[%s13202_s3 + $0x9c0] sm:$0xff]  ;;  %v8069_v34 = vcombine.low %v684_v23, %v688_v24 }
 0x10c   :  { %v696_v31 = vld [vmem:[%s13202_s3 + $0x1e8] sm:$0xff]  ;;  %v951_v33 = vld [vmem:[%s13202_s3 + $0x9e0] sm:$0xff]  ;;  %v8323_v36 = vcombine.low %v939_v25, %v943_v26 }
 0x10d   :  { %v8078_v37 = vcombine.high %v692_v8, %v696_v31  ;;  %v8332_v38 = vcombine.high %v947_v32, %v951_v33  ;;  %v700_v39 = vld [vmem:[%s13202_s3 + $0x208] sm:$0xff]  ;;  %v955_v46 = vld [vmem:[%s13202_s3 + $0xa00] sm:$0xff]  ;;  %v8077_v49 = vcombine.low %v692_v8, %v696_v31  ;;  %v8331_v53 = vcombine.low %v947_v32, %v951_v33 }
 0x10e   :  { %3920 = vmatpush1.bf16.msra.mxu1 %v8045_v3  ;;  %3838 = vmatpush1.bf16.msra.mxu0 %v8299_v4  ;;  %v704_v40 = vld [vmem:[%s13202_s3 + $0x228] sm:$0xff]  ;;  %v959_v47 = vld [vmem:[%s13202_s3 + $0xa20] sm:$0xff] }
 0x10f   :  { %3921 = vmatprep.subr.bf16.mxu1 %v8054_v5  ;;  %3839 = vmatprep.subr.bf16.mxu0 %v8308_v6  ;;  %v8086_v54 = vcombine.high %v700_v39, %v704_v40  ;;  %v8340_v57 = vcombine.high %v955_v46, %v959_v47  ;;  %v708_v58 = vld [vmem:[%s13202_s3 + $0x248] sm:$0xff]  ;;  %v963_v62 = vld [vmem:[%s13202_s3 + $0xa40] sm:$0xff]  ;;  %v8085_v1 = vcombine.low %v700_v39, %v704_v40 }
 0x110   :  { %v712_v59 = vld [vmem:[%s13202_s3 + $0x268] sm:$0xff]  ;;  %v967_v63 = vld [vmem:[%s13202_s3 + $0xa60] sm:$0xff]  ;;  %v8339_v3 = vcombine.low %v955_v46, %v959_v47  ;;  %v10510_v47 = vsub.s32 4, %v10299_v13 }
 0x111   :  { %v8094_v4 = vcombine.high %v708_v58, %v712_v59  ;;  %v8348_v5 = vcombine.high %v963_v62, %v967_v63  ;;  %v716_v6 = vld [vmem:[%s13202_s3 + $0x288] sm:$0xff]  ;;  %v971_v9 = vld [vmem:[%s13202_s3 + $0xa80] sm:$0xff]  ;;  %v8093_v12 = vcombine.low %v708_v58, %v712_v59 }
 0x112   :  { %3922 = vmatpush1.bf16.msra.mxu1 %v8053_v19  ;;  %3840 = vmatpush1.bf16.msra.mxu0 %v8307_v20  ;;  %v720_v7 = vld [vmem:[%s13202_s3 + $0x2a8] sm:$0xff]  ;;  %v975_v11 = vld [vmem:[%s13202_s3 + $0xaa0] sm:$0xff]  ;;  %v8347_v19 = vcombine.low %v963_v62, %v967_v63  ;;  %v114_v59 = vrot.slane %v10304_v14, %v10510_v47 }
 0x113   :  { %3923 = vmatprep.subr.bf16.mxu1 %v8062_v21  ;;  %3841 = vmatprep.subr.bf16.mxu0 %v8316_v22  ;;  %v8102_v20 = vcombine.high %v716_v6, %v720_v7  ;;  %v8356_v21 = vcombine.high %v971_v9, %v975_v11  ;;  %v724_v22 = vld [vmem:[%s13202_s3 + $0x2c8] sm:$0xff]  ;;  %v979_v24 = vld [vmem:[%s13202_s3 + $0xac0] sm:$0xff]  ;;  %v8101_v26 = vcombine.low %v716_v6, %v720_v7 }
 0x114   :  { %v728_v23 = vld [vmem:[%s13202_s3 + $0x2e8] sm:$0xff]  ;;  %v983_v25 = vld [vmem:[%s13202_s3 + $0xae0] sm:$0xff] }
 0x115   :  { %v736_v8 = vld [vmem:[%s13202_s3 + $0x328] sm:$0xff]  ;;  %v987_v31 = vld [vmem:[%s13202_s3 + $0xb00] sm:$0xff]  ;;  %v8109_v33 = vcombine.low %v724_v22, %v728_v23 }
 0x116   :  { %3924 = vmatpush1.bf16.msra.mxu1 %v8061_v27  ;;  %3842 = vmatpush1.bf16.msra.mxu0 %v8315_v29  ;;  %v8355_v27 = vcombine.low %v971_v9, %v975_v11  ;;  %v8110_v29 = vcombine.high %v724_v22, %v728_v23  ;;  %v991_v32 = vld [vmem:[%s13202_s3 + $0xb20] sm:$0xff]  ;;  %v756_v63 = vld [vmem:[%s13202_s3 + $0x3c8] sm:$0xff] }
 0x117   :  { %3925 = vmatprep.subr.bf16.mxu1 %v8070_v30  ;;  %3843 = vmatprep.subr.bf16.mxu0 %v8324_v10  ;;  %v8364_v30 = vcombine.high %v979_v24, %v983_v25  ;;  %v732_v10 = vld [vmem:[%s13202_s3 + $0x308] sm:$0xff]  ;;  %v995_v39 = vld [vmem:[%s13202_s3 + $0xb40] sm:$0xff] }
 0x118   :  { %v10434_v45 = vpop.f32.mrb[4].mxu0  ;;  %v999_v40 = vld [vmem:[%s13202_s3 + $0xb60] sm:$0xff]  ;;  %v8117_v46 = vcombine.low %v732_v10, %v736_v8 }
 0x119   :  { %v573_v48 = vpop.f32.mrb[5].mxu0  ;;  %v10442_v52 = vpop.f32.mrb[4].mxu1 }
 0x11a   :  { %3926 = vmatpush1.bf16.msra.mxu1 %v8069_v34  ;;  %v574_v50 = vadd.f32 %v573_v48, %v118_v35  ;;  %v575_v51 = vpop.f32.mrb[6].mxu0  ;;  %3844 = vmatpush1.bf16.msra.mxu0 %v8323_v36  ;;  %v10444_v56 = vpop.f32.mrb[5].mxu1  ;;  %v8363_v34 = vcombine.low %v979_v24, %v983_v25  ;;  %v8118_v35 = vcombine.high %v732_v10, %v736_v8 }
 0x11b   :  { %3927 = vmatprep.subr.bf16.mxu1 %v8078_v37  ;;  %v576_v55 = vpop.f32.mrb[7].mxu0  ;;  %3845 = vmatprep.subr.bf16.mxu0 %v8332_v38  ;;  %v616_v61 = vpop.f32.mrb[6].mxu1  ;;  %v8372_v36 = vcombine.high %v987_v31, %v991_v32  ;;  %v740_v37 = vld [vmem:[%s13202_s3 + $0x348] sm:$0xff]  ;;  %v8371_v48 = vcombine.low %v987_v31, %v991_v32 }
 0x11c   :  { %v624_v60 = vmax.f32 %v574_v50, 0.0  ;;  %v617_v0 = vpop.f32.mrb[7].mxu1  ;;  %v744_v38 = vld [vmem:[%s13202_s3 + $0x368] sm:$0xff]  ;;  %v8380_v50 = vcombine.high %v995_v39, %v999_v40  ;;  %v1007_v55 = vld [vmem:[%s13202_s3 + $0xba0] sm:$0xff] }
 0x11d   :  { %v748_v51 = vld [vmem:[%s13202_s3 + $0x388] sm:$0xff]  ;;  %v8125_v58 = vcombine.low %v740_v37, %v744_v38 }
 0x11e   :  { %3928 = vmatpush1.bf16.msra.mxu1 %v8077_v49  ;;  %v10458_v2 = vpack.c.bf16 %v624_v60, %v624_v60  ;;  %3846 = vmatpush1.bf16.msra.mxu0 %v8331_v53  ;;  %v8126_v49 = vcombine.high %v740_v37, %v744_v38  ;;  %v752_v53 = vld [vmem:[%s13202_s3 + $0x3a8] sm:$0xff]  ;;  %v8379_v60 = vcombine.low %v995_v39, %v999_v40  ;;  %v1035_v37 = vld [vmem:[%s13202_s3 + $0xc80] sm:$0xff] }
 0x11f   :  { %3929 = vmatprep.subr.bf16.mxu1 %v8086_v54  ;;  %3847 = vmatprep.subr.bf16.mxu0 %v8340_v57  ;;  %v1003_v54 = vld [vmem:[%s13202_s3 + $0xb80] sm:$0xff]  ;;  %v125_v57 = vsub.s32 7, %v10299_v13  ;;  %v8134_v61 = vcombine.high %v748_v51, %v752_v53  ;;  %v760_v0 = vld [vmem:[%s13202_s3 + $0x3e8] sm:$0xff]  ;;  %v8133_v6 = vcombine.low %v748_v51, %v752_v53 }
 0x120   :  { %3863 = vmatprep.mubr.bf16.mxu0 %v10458_v2  ;;  %v8388_v62 = vcombine.high %v1003_v54, %v1007_v55  ;;  %v8387_v7 = vcombine.low %v1003_v54, %v1007_v55  ;;  %v8142_v9 = vcombine.high %v756_v63, %v760_v0  ;;  %v8141_v23 = vcombine.low %v756_v63, %v760_v0  ;;  %v1039_v38 = vld [vmem:[%s13202_s3 + $0xca0] sm:$0xff]  ;;  %v792_v51 = vld [vmem:[%s13202_s3 + $0x4e8] sm:$0xff] }
 0x121   :  { %v1043_v53 = vld [vmem:[%s13202_s3 + $0xcc0] sm:$0xff] }
 0x122   :  { %3930 = vmatpush1.bf16.msra.mxu1 %v8085_v1  ;;  %3848 = vmatpush1.bf16.msra.mxu0 %v8339_v3  ;;  %v1011_v1 = vld [vmem:[%s13202_s3 + $0xbc0] sm:$0xff] }
 0x123   :  { %3931 = vmatprep.subr.bf16.mxu1 %v8094_v4  ;;  %3849 = vmatprep.subr.bf16.mxu0 %v8348_v5  ;;  %v1015_v3 = vld [vmem:[%s13202_s3 + $0xbe0] sm:$0xff]  ;;  %v126_v4 = vrot.slane %v10304_v14, %v125_v57  ;;  %v572_v5 = vadd.f32 %v10434_v45, %v114_v59 }
 0x124   :  { %v8396_v11 = vcombine.high %v1011_v1, %v1015_v3  ;;  %v1023_v45 = vld [vmem:[%s13202_s3 + $0xc20] sm:$0xff]  ;;  %v8395_v24 = vcombine.low %v1011_v1, %v1015_v3 }
 0x125   :  { %v623_v22 = vmax.f32 %v572_v5, 0.0  ;;  %v1047_v54 = vld [vmem:[%s13202_s3 + $0xce0] sm:$0xff] }
 0x126   :  { %3932 = vmatpush1.bf16.msra.mxu1 %v8093_v12  ;;  %3850 = vmatpush1.bf16.msra.mxu0 %v8347_v19  ;;  %v764_v12 = vld [vmem:[%s13202_s3 + $0x408] sm:$0xff]  ;;  %v1051_v63 = vld [vmem:[%s13202_s3 + $0xd00] sm:$0xff]  ;;  %v8427_v3 = vcombine.low %v1043_v53, %v1047_v54 }
 0x127   :  { %3933 = vmatprep.subr.bf16.mxu1 %v8102_v20  ;;  %3851 = vmatprep.subr.bf16.mxu0 %v8356_v21  ;;  %v768_v19 = vld [vmem:[%s13202_s3 + $0x428] sm:$0xff]  ;;  %v1019_v20 = vld [vmem:[%s13202_s3 + $0xc00] sm:$0xff]  ;;  %v615_v21 = vadd.f32 %v10444_v56, %v126_v4  ;;  %v10568_v8 = vpack.c.bf16 %v623_v22, %v623_v22 }
 0x128   :  { %v8150_v25 = vcombine.high %v764_v12, %v768_v19  ;;  %v772_v56 = vld [vmem:[%s13202_s3 + $0x448] sm:$0xff]  ;;  %v8149_v31 = vcombine.low %v764_v12, %v768_v19  ;;  %v8403_v32 = vcombine.low %v1019_v20, %v1023_v45  ;;  %v1055_v0 = vld [vmem:[%s13202_s3 + $0xd20] sm:$0xff] }
 0x129   :  { %v626_v10 = vmax.f32 %v615_v21, 0.0  ;;  %v8436_v5 = vcombine.high %v1051_v63, %v1055_v0  ;;  %v8435_v19 = vcombine.low %v1051_v63, %v1055_v0  ;;  %v812_v21 = vld [vmem:[%s13202_s3 + $0x588] sm:$0xff]  ;;  %v1099_v0 = vld [vmem:[%s13202_s3 + $0xe80] sm:$0xff] }
 0x12a   :  { %3934 = vmatpush1.bf16.msra.mxu1 %v8101_v26  ;;  %3852 = vmatpush1.bf16.msra.mxu0 %v8355_v27  ;;  %v8404_v26 = vcombine.high %v1019_v20, %v1023_v45  ;;  %v1027_v27 = vld [vmem:[%s13202_s3 + $0xc40] sm:$0xff]  ;;  %v816_v22 = vld [vmem:[%s13202_s3 + $0x5a8] sm:$0xff] }
 0x12b   :  { %3935 = vmatprep.subr.bf16.mxu1 %v8110_v29  ;;  %3853 = vmatprep.subr.bf16.mxu0 %v8364_v30  ;;  %v1031_v29 = vld [vmem:[%s13202_s3 + $0xc60] sm:$0xff]  ;;  %v776_v30 = vld [vmem:[%s13202_s3 + $0x468] sm:$0xff]  ;;  %v10583_v39 = vpack.c.bf16 %v626_v10, %v626_v10 }
 0x12c   :  { %v8157_v40 = vcombine.low %v772_v56, %v776_v30  ;;  %v1075_v10 = vld [vmem:[%s13202_s3 + $0xdc0] sm:$0xff]  ;;  %v848_v63 = vld [vmem:[%s13202_s3 + $0x6a8] sm:$0xff] }
 0x12e   :  { %3936 = vmatpush1.bf16.msra.mxu1 %v8109_v33  ;;  %3854 = vmatpush1.bf16.msra.mxu0 %v8363_v34  ;;  %v8412_v33 = vcombine.high %v1027_v27, %v1031_v29  ;;  %v8158_v34 = vcombine.high %v772_v56, %v776_v30  ;;  %v820_v56 = vld [vmem:[%s13202_s3 + $0x5c8] sm:$0xff] }
 0x12f   :  { %3937 = vmatprep.subr.bf16.mxu1 %v8118_v35  ;;  %3855 = vmatprep.subr.bf16.mxu0 %v8372_v36  ;;  %v780_v35 = vld [vmem:[%s13202_s3 + $0x488] sm:$0xff] }
 0x130   :  { %v784_v36 = vld [vmem:[%s13202_s3 + $0x4a8] sm:$0xff] }
 0x131   :  { %v8165_v55 = vcombine.low %v780_v35, %v784_v36  ;;  %v824_v30 = vld [vmem:[%s13202_s3 + $0x5e8] sm:$0xff] }
 0x132   :  { %3938 = vmatpush1.bf16.msra.mxu1 %v8117_v46  ;;  %3856 = vmatpush1.bf16.msra.mxu0 %v8371_v48  ;;  %v8411_v46 = vcombine.low %v1027_v27, %v1031_v29  ;;  %v8166_v48 = vcombine.high %v780_v35, %v784_v36  ;;  %v8198_v27 = vcombine.high %v812_v21, %v816_v22  ;;  %v828_v36 = vld [vmem:[%s13202_s3 + $0x608] sm:$0xff] }
 0x133   :  { %3939 = vmatprep.subr.bf16.mxu1 %v8126_v49  ;;  %3857 = vmatprep.subr.bf16.mxu0 %v8380_v50  ;;  %v8420_v49 = vcombine.high %v1035_v37, %v1039_v38  ;;  %v788_v50 = vld [vmem:[%s13202_s3 + $0x4c8] sm:$0xff] }
 0x134   :  { %v8174_v59 = vcombine.high %v788_v50, %v792_v51  ;;  %v8173_v1 = vcombine.low %v788_v50, %v792_v51  ;;  %v836_v51 = vld [vmem:[%s13202_s3 + $0x648] sm:$0xff] }
 0x136   :  { %3940 = vmatpush1.bf16.msra.mxu1 %v8125_v58  ;;  %3858 = vmatpush1.bf16.msra.mxu0 %v8379_v60  ;;  %v8419_v58 = vcombine.low %v1035_v37, %v1039_v38  ;;  %v8428_v60 = vcombine.high %v1043_v53, %v1047_v54  ;;  %v832_v37 = vld [vmem:[%s13202_s3 + $0x628] sm:$0xff]  ;;  %v1083_v38 = vld [vmem:[%s13202_s3 + $0xe00] sm:$0xff] }
 0x137   :  { %3941 = vmatprep.subr.bf16.mxu1 %v8134_v61  ;;  %3859 = vmatprep.subr.bf16.mxu0 %v8388_v62  ;;  %v796_v61 = vld [vmem:[%s13202_s3 + $0x508] sm:$0xff]  ;;  %v1091_v54 = vld [vmem:[%s13202_s3 + $0xe40] sm:$0xff] }
 0x138   :  { %v800_v62 = vld [vmem:[%s13202_s3 + $0x528] sm:$0xff] }
 0x139   :  { %v8182_v4 = vcombine.high %v796_v61, %v800_v62  ;;  %v8181_v12 = vcombine.low %v796_v61, %v800_v62  ;;  %v840_v53 = vld [vmem:[%s13202_s3 + $0x668] sm:$0xff] }
 0x13a   :  { %3942 = vmatpush1.bf16.msra.mxu1 %v8133_v6  ;;  %3860 = vmatpush1.bf16.msra.mxu0 %v8387_v7  ;;  %v804_v6 = vld [vmem:[%s13202_s3 + $0x548] sm:$0xff] }
 0x13b   :  { %3943 = vmatprep.subr.bf16.mxu1 %v8142_v9  ;;  %3861 = vmatprep.subr.bf16.mxu0 %v8396_v11  ;;  %v808_v7 = vld [vmem:[%s13202_s3 + $0x568] sm:$0xff]  ;;  %v1059_v9 = vld [vmem:[%s13202_s3 + $0xd40] sm:$0xff] }
 0x13c   :  { %v1063_v11 = vld [vmem:[%s13202_s3 + $0xd60] sm:$0xff]  ;;  %v8190_v20 = vcombine.high %v804_v6, %v808_v7  ;;  %v844_v62 = vld [vmem:[%s13202_s3 + $0x688] sm:$0xff] }
 0x13d   :  { %v8444_v45 = vcombine.high %v1059_v9, %v1063_v11 }
 0x13e   :  { %3944 = vmatpush1.bf16.msra.mxu1 %v8141_v23  ;;  %3862 = vmatpush1.bf16.msra.mxu0 %v8395_v24  ;;  %v1067_v23 = vld [vmem:[%s13202_s3 + $0xd80] sm:$0xff] }
 0x13f   :  { %3954 = vmatprep.subr.bf16.mxu1 %v8150_v25  ;;  %3872 = vmatprep.subr.bf16.mxu0 %v8404_v26  ;;  %v1071_v24 = vld [vmem:[%s13202_s3 + $0xda0] sm:$0xff]  ;;  %v8189_v25 = vcombine.low %v804_v6, %v808_v7  ;;  %v8443_v26 = vcombine.low %v1059_v9, %v1063_v11  ;;  %v852_v7 = vld [vmem:[%s13202_s3 + $0x6c8] sm:$0xff] }
 0x140   :  { %v8452_v29 = vcombine.high %v1067_v23, %v1071_v24  ;;  %v856_v9 = vld [vmem:[%s13202_s3 + $0x6e8] sm:$0xff]  ;;  %v1107_v11 = vld [vmem:[%s13202_s3 + $0xec0] sm:$0xff] }
 0x141   :  { %3946 = vmatmul.mubr.bf16.vlgmr.msra.gmra.mrb[12].mxu1 %v10342_v43  ;;  %3864 = vmatmul.mubr.bf16.vlgmr.msra.gmra.mrb[8].mxu0 %v10568_v8 }
 0x142   :  { %3955 = vmatpush1.bf16.msra.mxu1 %v8149_v31  ;;  %3873 = vmatpush1.bf16.msra.mxu0 %v8403_v32  ;;  %v1079_v31 = vld [vmem:[%s13202_s3 + $0xde0] sm:$0xff]  ;;  %v8197_v32 = vcombine.low %v812_v21, %v816_v22  ;;  %v860_v22 = vld [vmem:[%s13202_s3 + $0x708] sm:$0xff] }
 0x143   :  { %3986 = vmatprep.mubr.bf16.mxu1 %v10344_v44  ;;  %3874 = vmatprep.subr.bf16.mxu0 %v8412_v33  ;;  %v8451_v33 = vcombine.low %v1067_v23, %v1071_v24  ;;  %v8460_v35 = vcombine.high %v1075_v10, %v1079_v31  ;;  %v864_v23 = vld [vmem:[%s13202_s3 + $0x728] sm:$0xff]  ;;  %v1115_v24 = vld [vmem:[%s13202_s3 + $0xf00] sm:$0xff] }
 0x144   :  { %3956 = vmatprep.subr.bf16.mxu1 %v8158_v34  ;;  %3904 = vmatprep.mubr.bf16.mxu0 %v10583_v39  ;;  %v8206_v34 = vcombine.high %v820_v56, %v824_v30 }
 0x146   :  { %3957 = vmatpush1.bf16.msra.mxu1 %v8157_v40  ;;  %3875 = vmatpush1.bf16.msra.mxu0 %v8411_v46  ;;  %v1087_v40 = vld [vmem:[%s13202_s3 + $0xe20] sm:$0xff]  ;;  %v8205_v46 = vcombine.low %v820_v56, %v824_v30  ;;  %v868_v30 = vld [vmem:[%s13202_s3 + $0x748] sm:$0xff] }
 0x147   :  { %3958 = vmatprep.subr.bf16.mxu1 %v8166_v48  ;;  %3876 = vmatprep.subr.bf16.mxu0 %v8420_v49  ;;  %v8459_v48 = vcombine.low %v1075_v10, %v1079_v31  ;;  %v8214_v49 = vcombine.high %v828_v36, %v832_v37  ;;  %v8468_v50 = vcombine.high %v1083_v38, %v1087_v40  ;;  %v872_v10 = vld [vmem:[%s13202_s3 + $0x768] sm:$0xff]  ;;  %v1123_v31 = vld [vmem:[%s13202_s3 + $0xf40] sm:$0xff] }
 0x14a   :  { %3959 = vmatpush1.bf16.msra.mxu1 %v8165_v55  ;;  %3877 = vmatpush1.bf16.msra.mxu0 %v8419_v58  ;;  %v1095_v55 = vld [vmem:[%s13202_s3 + $0xe60] sm:$0xff]  ;;  %v8213_v58 = vcombine.low %v828_v36, %v832_v37  ;;  %v8254_v36 = vcombine.high %v868_v30, %v872_v10 }
 0x14b   :  { %3960 = vmatprep.subr.bf16.mxu1 %v8174_v59  ;;  %3878 = vmatprep.subr.bf16.mxu0 %v8428_v60  ;;  %v8467_v59 = vcombine.low %v1083_v38, %v1087_v40  ;;  %v8222_v60 = vcombine.high %v836_v51, %v840_v53  ;;  %v8476_v61 = vcombine.high %v1091_v54, %v1095_v55  ;;  %v876_v38 = vld [vmem:[%s13202_s3 + $0x788] sm:$0xff] }
 0x14c   :  { %v880_v40 = vld [vmem:[%s13202_s3 + $0x7a8] sm:$0xff] }
 0x14e   :  { %3961 = vmatpush1.bf16.msra.mxu1 %v8173_v1  ;;  %3879 = vmatpush1.bf16.msra.mxu0 %v8427_v3  ;;  %v1103_v1 = vld [vmem:[%s13202_s3 + $0xea0] sm:$0xff]  ;;  %v8221_v3 = vcombine.low %v836_v51, %v840_v53  ;;  %v8262_v53 = vcombine.high %v876_v38, %v880_v40 }
 0x14f   :  { %3962 = vmatprep.subr.bf16.mxu1 %v8182_v4  ;;  %3880 = vmatprep.subr.bf16.mxu0 %v8436_v5  ;;  %v8475_v4 = vcombine.low %v1091_v54, %v1095_v55  ;;  %v8230_v5 = vcombine.high %v844_v62, %v848_v63  ;;  %v8484_v6 = vcombine.high %v1099_v0, %v1103_v1  ;;  %v884_v55 = vld [vmem:[%s13202_s3 + $0x7c8] sm:$0xff] }
 0x152   :  { %3963 = vmatpush1.bf16.msra.mxu1 %v8181_v12  ;;  %3881 = vmatpush1.bf16.msra.mxu0 %v8435_v19  ;;  %v1111_v12 = vld [vmem:[%s13202_s3 + $0xee0] sm:$0xff]  ;;  %v8229_v19 = vcombine.low %v844_v62, %v848_v63 }
 0x153   :  { %3964 = vmatprep.subr.bf16.mxu1 %v8190_v20  ;;  %3882 = vmatprep.subr.bf16.mxu0 %v8444_v45  ;;  %v8483_v20 = vcombine.low %v1099_v0, %v1103_v1  ;;  %v8238_v45 = vcombine.high %v852_v7, %v856_v9  ;;  %v8492_v21 = vcombine.high %v1107_v11, %v1111_v12  ;;  %v892_v1 = vld [vmem:[%s13202_s3 + $0x808] sm:$0xff] }
 0x156   :  { %3965 = vmatpush1.bf16.msra.mxu1 %v8189_v25  ;;  %3883 = vmatpush1.bf16.msra.mxu0 %v8443_v26  ;;  %v1119_v25 = vld [vmem:[%s13202_s3 + $0xf20] sm:$0xff]  ;;  %v8237_v26 = vcombine.low %v852_v7, %v856_v9 }
 0x157   :  { %3966 = vmatprep.subr.bf16.mxu1 %v8198_v27  ;;  %3884 = vmatprep.subr.bf16.mxu0 %v8452_v29  ;;  %v8491_v27 = vcombine.low %v1107_v11, %v1111_v12  ;;  %v8246_v29 = vcombine.high %v860_v22, %v864_v23  ;;  %v8500_v56 = vcombine.high %v1115_v24, %v1119_v25  ;;  %v900_v12 = vld [vmem:[%s13202_s3 + $0x848] sm:$0xff] }
 0x15a   :  { %3967 = vmatpush1.bf16.msra.mxu1 %v8197_v32  ;;  %3885 = vmatpush1.bf16.msra.mxu0 %v8451_v33  ;;  %v1127_v32 = vld [vmem:[%s13202_s3 + $0xf60] sm:$0xff]  ;;  %v8245_v33 = vcombine.low %v860_v22, %v864_v23  ;;  %v649_v22 = vld [vmem:[%s13202_s3 + $0x70] sm:$0xff] }
 0x15b   :  { %3968 = vmatprep.subr.bf16.mxu1 %v8206_v34  ;;  %3886 = vmatprep.subr.bf16.mxu0 %v8460_v35  ;;  %v10721_v34 = vsub.s32 6, %v10299_v13  ;;  %v8499_v35 = vcombine.low %v1115_v24, %v1119_v25  ;;  %v8508_v37 = vcombine.high %v1123_v31, %v1127_v32  ;;  %v8507_v51 = vcombine.low %v1123_v31, %v1127_v32  ;;  %v908_v25 = vld [vmem:[%s13202_s3 + $0x888] sm:$0xff]  ;;  %v9519_v13 = vld [vmem:[%s13204_s5 + $0xbd8] ss:$28 sps:$4 sm:$0xff]  }
 0x15e   :  { %3969 = vmatpush1.bf16.msra.mxu1 %v8205_v46  ;;  %3887 = vmatpush1.bf16.msra.mxu0 %v8459_v48  ;;  %v1131_v46 = vld [vmem:[%s13202_s3 + $0xf80] sm:$0xff] }
 0x15f   :  { %3970 = vmatprep.subr.bf16.mxu1 %v8214_v49  ;;  %3888 = vmatprep.subr.bf16.mxu0 %v8468_v50  ;;  %v1135_v48 = vld [vmem:[%s13202_s3 + $0xfa0] sm:$0xff]  ;;  %v8253_v49 = vcombine.low %v868_v30, %v872_v10  ;;  %v122_v50 = vrot.slane %v10304_v14, %v10721_v34 }
 0x160   :  { %v8516_v54 = vcombine.high %v1131_v46, %v1135_v48  ;;  %v1143_v14 = vld [vmem:[%s13202_s3 + $0xfe0] sm:$0xff]  ;;  %v8515_v62 = vcombine.low %v1131_v46, %v1135_v48 }
 0x162   :  { %3971 = vmatpush1.bf16.msra.mxu1 %v8213_v58  ;;  %3889 = vmatpush1.bf16.msra.mxu0 %v8467_v59  ;;  %v888_v58 = vld [vmem:[%s13202_s3 + $0x7e8] sm:$0xff]  ;;  %v1139_v59 = vld [vmem:[%s13202_s3 + $0xfc0] sm:$0xff] }
 0x163   :  { %3972 = vmatprep.subr.bf16.mxu1 %v8222_v60  ;;  %3890 = vmatprep.subr.bf16.mxu0 %v8476_v61  ;;  %v613_v60 = vadd.f32 %v10442_v52, %v122_v50  ;;  %v8261_v61 = vcombine.low %v876_v38, %v880_v40  ;;  %v8270_v63 = vcombine.high %v884_v55, %v888_v58  ;;  %v641_v52 = vld [vmem:[%s13202_s3 + $0x30] sm:$0xff]  ;;  %v928_v50 = vld [vmem:[%s13202_s3 + $0x928] sm:$0xff] }
 0x164   :  { %v8524_v0 = vcombine.high %v1139_v59, %v1143_v14  ;;  %v8523_v7 = vcombine.low %v1139_v59, %v1143_v14  ;;  %v932_v14 = vld [vmem:[%s13202_s3 + $0x948] sm:$0xff] }
 0x166   :  { %3973 = vmatpush1.bf16.msra.mxu1 %v8221_v3  ;;  %3891 = vmatpush1.bf16.msra.mxu0 %v8475_v4  ;;  %v896_v3 = vld [vmem:[%s13202_s3 + $0x828] sm:$0xff]  ;;  %v637_v4 = vld [vmem:[%s13202_s3 + $0x10] sm:$0xff] }
 0x167   :  { %3974 = vmatprep.subr.bf16.mxu1 %v8230_v5  ;;  %3892 = vmatprep.subr.bf16.mxu0 %v8484_v6  ;;  %v625_v5 = vmax.f32 %v613_v60, 0.0  ;;  %v8269_v6 = vcombine.low %v884_v55, %v888_v58  ;;  %v8278_v9 = vcombine.high %v892_v1, %v896_v3  ;;  %v8024_v11 = vcombine.high %v637_v4, %v641_v52  ;;  %v936_v60 = vld [vmem:[%s13202_s3 + $0x968] sm:$0xff] }
 0x168   :  { %v8023_v23 = vcombine.low %v637_v4, %v641_v52  ;;  %v940_v4 = vld [vmem:[%s13202_s3 + $0x988] sm:$0xff] }
 0x169   :  { %v944_v52 = vld [vmem:[%s13202_s3 + $0x9a8] sm:$0xff] }
 0x16a   :  { %3975 = vmatpush1.bf16.msra.mxu1 %v8229_v19  ;;  %3893 = vmatpush1.bf16.msra.mxu0 %v8483_v20  ;;  %v904_v19 = vld [vmem:[%s13202_s3 + $0x868] sm:$0xff]  ;;  %v10768_v20 = vpack.c.bf16 %v625_v5, %v625_v5  ;;  %v685_v5 = vld [vmem:[%s13202_s3 + $0x190] sm:$0xff] }
 0x16b   :  { %3976 = vmatprep.subr.bf16.mxu1 %v8238_v45  ;;  %3894 = vmatprep.subr.bf16.mxu0 %v8492_v21  ;;  %v8277_v45 = vcombine.low %v892_v1, %v896_v3  ;;  %v645_v21 = vld [vmem:[%s13202_s3 + $0x50] sm:$0xff]  ;;  %v8286_v24 = vcombine.high %v900_v12, %v904_v19  ;;  %v8285_v30 = vcombine.low %v900_v12, %v904_v19  ;;  %v948_v19 = vld [vmem:[%s13202_s3 + $0x9c8] sm:$0xff] }
 0x16c   :  { %v8031_v10 = vcombine.low %v645_v21, %v649_v22  ;;  %v8318_v1 = vcombine.high %v932_v14, %v936_v60 }
 0x16e   :  { %3977 = vmatpush1.bf16.msra.mxu1 %v8237_v26  ;;  %3895 = vmatpush1.bf16.msra.mxu0 %v8491_v27  ;;  %v912_v26 = vld [vmem:[%s13202_s3 + $0x8a8] sm:$0xff]  ;;  %v8032_v27 = vcombine.high %v645_v21, %v649_v22  ;;  %v693_v21 = vld [vmem:[%s13202_s3 + $0x1d0] sm:$0xff] }
 0x16f   :  { %3978 = vmatprep.subr.bf16.mxu1 %v8246_v29  ;;  %3896 = vmatprep.subr.bf16.mxu0 %v8500_v56  ;;  %v653_v29 = vld [vmem:[%s13202_s3 + $0x90] sm:$0xff]  ;;  %v8294_v31 = vcombine.high %v908_v25, %v912_v26  ;;  %v8293_v38 = vcombine.low %v908_v25, %v912_v26 }
 0x170   :  { %v657_v56 = vld [vmem:[%s13202_s3 + $0xb0] sm:$0xff] }
 0x171   :  { %v8040_v32 = vcombine.high %v653_v29, %v657_v56  ;;  %v8039_v40 = vcombine.low %v653_v29, %v657_v56  ;;  %v697_v22 = vld [vmem:[%s13202_s3 + $0x1f0] sm:$0xff]  ;;  %v960_v29 = vld [vmem:[%s13202_s3 + $0xa28] sm:$0xff] }
 0x172   :  { %3979 = vmatpush1.bf16.msra.mxu1 %v8245_v33  ;;  %3897 = vmatpush1.bf16.msra.mxu0 %v8499_v35  ;;  %v916_v33 = vld [vmem:[%s13202_s3 + $0x8c8] sm:$0xff]  ;;  %v8080_v26 = vcombine.high %v693_v21, %v697_v22  ;;  %v701_v56 = vld [vmem:[%s13202_s3 + $0x210] sm:$0xff] }
 0x173   :  { %3980 = vmatprep.subr.bf16.mxu1 %v8254_v36  ;;  %3898 = vmatprep.subr.bf16.mxu0 %v8508_v37  ;;  %v920_v35 = vld [vmem:[%s13202_s3 + $0x8e8] sm:$0xff]  ;;  %v661_v36 = vld [vmem:[%s13202_s3 + $0xd0] sm:$0xff] }
 0x174   :  { %v665_v37 = vld [vmem:[%s13202_s3 + $0xf0] sm:$0xff]  ;;  %v8302_v46 = vcombine.high %v916_v33, %v920_v35 }
 0x175   :  { %v8048_v48 = vcombine.high %v661_v36, %v665_v37  ;;  %v8047_v55 = vcombine.low %v661_v36, %v665_v37  ;;  %v968_v36 = vld [vmem:[%s13202_s3 + $0xa68] sm:$0xff]  ;;  %v709_v37 = vld [vmem:[%s13202_s3 + $0x250] sm:$0xff] }
 0x176   :  { %3981 = vmatpush1.bf16.msra.mxu1 %v8253_v49  ;;  %3899 = vmatpush1.bf16.msra.mxu0 %v8507_v51  ;;  %v924_v49 = vld [vmem:[%s13202_s3 + $0x908] sm:$0xff]  ;;  %v669_v51 = vld [vmem:[%s13202_s3 + $0x110] sm:$0xff] }
 0x177   :  { %3982 = vmatprep.subr.bf16.mxu1 %v8262_v53  ;;  %3900 = vmatprep.subr.bf16.mxu0 %v8516_v54  ;;  %v673_v53 = vld [vmem:[%s13202_s3 + $0x130] sm:$0xff]  ;;  %v8301_v54 = vcombine.low %v916_v33, %v920_v35  ;;  %v8310_v58 = vcombine.high %v924_v49, %v928_v50  ;;  %v964_v35 = vld [vmem:[%s13202_s3 + $0xa48] sm:$0xff] }
 0x178   :  { %v8056_v59 = vcombine.high %v669_v51, %v673_v53 }
 0x17a   :  { %3983 = vmatpush1.bf16.msra.mxu1 %v8261_v61  ;;  %3901 = vmatpush1.bf16.msra.mxu0 %v8515_v62  ;;  %v677_v61 = vld [vmem:[%s13202_s3 + $0x150] sm:$0xff] }
 0x17b   :  { %3984 = vmatprep.subr.bf16.mxu1 %v8270_v63  ;;  %3902 = vmatprep.subr.bf16.mxu0 %v8524_v0  ;;  %v681_v62 = vld [vmem:[%s13202_s3 + $0x170] sm:$0xff]  ;;  %v8309_v63 = vcombine.low %v924_v49, %v928_v50  ;;  %v8055_v0 = vcombine.low %v669_v51, %v673_v53  ;;  %v972_v50 = vld [vmem:[%s13202_s3 + $0xa88] sm:$0xff] }
 0x17c   :  { %v8064_v3 = vcombine.high %v677_v61, %v681_v62  ;;  %v976_v51 = vld [vmem:[%s13202_s3 + $0xaa8] sm:$0xff]  ;;  %v717_v53 = vld [vmem:[%s13202_s3 + $0x290] sm:$0xff] }
 0x17e   :  { %3985 = vmatpush1.bf16.msra.mxu1 %v8269_v6  ;;  %3903 = vmatpush1.bf16.msra.mxu0 %v8523_v7  ;;  %v689_v6 = vld [vmem:[%s13202_s3 + $0x1b0] sm:$0xff]  ;;  %v8317_v7 = vcombine.low %v932_v14, %v936_v60  ;;  %v980_v60 = vld [vmem:[%s13202_s3 + $0xac8] sm:$0xff] }
 0x17f   :  { %3995 = vmatprep.subr.bf16.mxu1 %v8278_v9  ;;  %4077 = vmatprep.subr.bf16.mxu0 %v8024_v11  ;;  %v8063_v9 = vcombine.low %v677_v61, %v681_v62  ;;  %v8326_v11 = vcombine.high %v940_v4, %v944_v52  ;;  %v8072_v12 = vcombine.high %v685_v5, %v689_v6  ;;  %v984_v61 = vld [vmem:[%s13202_s3 + $0xae8] sm:$0xff]  ;;  %v725_v62 = vld [vmem:[%s13202_s3 + $0x2d0] sm:$0xff] }
 0x181   :  { %3987 = vmatmul.mubr.bf16.vlgmr.msra.gmra.mrb[12].mxu1 %v10338_v41  ;;  %3905 = vmatmul.mubr.bf16.vlgmr.msra.gmra.mrb[8].mxu0 %v10768_v20 }
 0x182   :  { %3996 = vmatpush1.bf16.msra.mxu1 %v8277_v45  ;;  %4027 = vmatprep.mubr.bf16.mxu1 %v10458_v2  ;;  %v952_v45 = vld [vmem:[%s13202_s3 + $0x9e8] sm:$0xff] }
 0x183   :  { %4078 = vmatpush1.bf16.msra.mxu0 %v8023_v23  ;;  %4109 = vmatprep.mubr.bf16.mxu0 %v10340_v42  ;;  %v8325_v23 = vcombine.low %v940_v4, %v944_v52  ;;  %v8334_v25 = vcombine.high %v948_v19, %v952_v45  ;;  %v988_v52 = vld [vmem:[%s13202_s3 + $0xb08] sm:$0xff] }
 0x184   :  { %3997 = vmatprep.subr.bf16.mxu1 %v8286_v24  ;;  %4079 = vmatprep.subr.bf16.mxu0 %v8032_v27  ;;  %v8071_v24 = vcombine.low %v685_v5, %v689_v6  ;;  %v956_v27 = vld [vmem:[%s13202_s3 + $0xa08] sm:$0xff]  ;;  %v733_v6 = vld [vmem:[%s13202_s3 + $0x310] sm:$0xff] }
 0x185   :  { %v992_v5 = vld [vmem:[%s13202_s3 + $0xb28] sm:$0xff] }
 0x186   :  { %3998 = vmatpush1.bf16.msra.mxu1 %v8285_v30  ;;  %v705_v30 = vld [vmem:[%s13202_s3 + $0x230] sm:$0xff] }
 0x187   :  { %4080 = vmatpush1.bf16.msra.mxu0 %v8031_v10  ;;  %3999 = vmatprep.subr.bf16.mxu1 %v8294_v31  ;;  %v8333_v10 = vcombine.low %v948_v19, %v952_v45  ;;  %v8079_v31 = vcombine.low %v693_v21, %v697_v22  ;;  %v8088_v33 = vcombine.high %v701_v56, %v705_v30  ;;  %v996_v45 = vld [vmem:[%s13202_s3 + $0xb48] sm:$0xff]  ;;  %v741_v22 = vld [vmem:[%s13202_s3 + $0x350] sm:$0xff] }
 0x188   :  { %4081 = vmatprep.subr.bf16.mxu0 %v8040_v32  ;;  %v8342_v32 = vcombine.high %v956_v27, %v960_v29  ;;  %v1000_v21 = vld [vmem:[%s13202_s3 + $0xb68] sm:$0xff] }
 0x18a   :  { %4000 = vmatpush1.bf16.msra.mxu1 %v8293_v38  ;;  %v713_v38 = vld [vmem:[%s13202_s3 + $0x270] sm:$0xff] }
 0x18b   :  { %4082 = vmatpush1.bf16.msra.mxu0 %v8039_v40  ;;  %4001 = vmatprep.subr.bf16.mxu1 %v8302_v46  ;;  %v8341_v40 = vcombine.low %v956_v27, %v960_v29  ;;  %v8087_v46 = vcombine.low %v701_v56, %v705_v30  ;;  %v8096_v49 = vcombine.high %v709_v37, %v713_v38  ;;  %v1004_v29 = vld [vmem:[%s13202_s3 + $0xb88] sm:$0xff]  ;;  %v749_v30 = vld [vmem:[%s13202_s3 + $0x390] sm:$0xff] }
 0x18c   :  { %4083 = vmatprep.subr.bf16.mxu0 %v8048_v48  ;;  %v8350_v48 = vcombine.high %v964_v35, %v968_v36  ;;  %v1008_v56 = vld [vmem:[%s13202_s3 + $0xba8] sm:$0xff] }
 0x18e   :  { %4002 = vmatpush1.bf16.msra.mxu1 %v8301_v54  ;;  %v721_v54 = vld [vmem:[%s13202_s3 + $0x2b0] sm:$0xff] }
 0x18f   :  { %4084 = vmatpush1.bf16.msra.mxu0 %v8047_v55  ;;  %4003 = vmatprep.subr.bf16.mxu1 %v8310_v58  ;;  %v8349_v55 = vcombine.low %v964_v35, %v968_v36  ;;  %v8095_v58 = vcombine.low %v709_v37, %v713_v38  ;;  %v8104_v14 = vcombine.high %v717_v53, %v721_v54  ;;  %v1012_v36 = vld [vmem:[%s13202_s3 + $0xbc8] sm:$0xff]  ;;  %v757_v38 = vld [vmem:[%s13202_s3 + $0x3d0] sm:$0xff] }
 0x190   :  { %4085 = vmatprep.subr.bf16.mxu0 %v8056_v59  ;;  %v8358_v59 = vcombine.high %v972_v50, %v976_v51  ;;  %v1016_v37 = vld [vmem:[%s13202_s3 + $0xbe8] sm:$0xff] }
 0x192   :  { %4004 = vmatpush1.bf16.msra.mxu1 %v8309_v63  ;;  %v729_v63 = vld [vmem:[%s13202_s3 + $0x2f0] sm:$0xff] }
 0x193   :  { %4086 = vmatpush1.bf16.msra.mxu0 %v8055_v0  ;;  %4005 = vmatprep.subr.bf16.mxu1 %v8318_v1  ;;  %v8357_v0 = vcombine.low %v972_v50, %v976_v51  ;;  %v8103_v1 = vcombine.low %v717_v53, %v721_v54  ;;  %v8112_v4 = vcombine.high %v725_v62, %v729_v63  ;;  %v1020_v51 = vld [vmem:[%s13202_s3 + $0xc08] sm:$0xff]  ;;  %v765_v54 = vld [vmem:[%s13202_s3 + $0x410] sm:$0xff] }
 0x194   :  { %4087 = vmatprep.subr.bf16.mxu0 %v8064_v3  ;;  %v8366_v3 = vcombine.high %v980_v60, %v984_v61  ;;  %v1024_v53 = vld [vmem:[%s13202_s3 + $0xc28] sm:$0xff] }
 0x196   :  { %4006 = vmatpush1.bf16.msra.mxu1 %v8317_v7  ;;  %v737_v7 = vld [vmem:[%s13202_s3 + $0x330] sm:$0xff] }
 0x197   :  { %4088 = vmatpush1.bf16.msra.mxu0 %v8063_v9  ;;  %4007 = vmatprep.subr.bf16.mxu1 %v8326_v11  ;;  %v8365_v9 = vcombine.low %v980_v60, %v984_v61  ;;  %v8111_v11 = vcombine.low %v725_v62, %v729_v63  ;;  %v8120_v19 = vcombine.high %v733_v6, %v737_v7  ;;  %v1028_v61 = vld [vmem:[%s13202_s3 + $0xc48] sm:$0xff] }
 0x198   :  { %4089 = vmatprep.subr.bf16.mxu0 %v8072_v12  ;;  %v8374_v12 = vcombine.high %v988_v52, %v992_v5  ;;  %v1032_v62 = vld [vmem:[%s13202_s3 + $0xc68] sm:$0xff]  ;;  %v8405_v63 = vcombine.low %v1020_v51, %v1024_v53 }
 0x19a   :  { %4008 = vmatpush1.bf16.msra.mxu1 %v8325_v23  ;;  %v745_v23 = vld [vmem:[%s13202_s3 + $0x370] sm:$0xff] }
 0x19b   :  { %4090 = vmatpush1.bf16.msra.mxu0 %v8071_v24  ;;  %4009 = vmatprep.subr.bf16.mxu1 %v8334_v25  ;;  %v8373_v24 = vcombine.low %v988_v52, %v992_v5  ;;  %v8119_v25 = vcombine.low %v733_v6, %v737_v7  ;;  %v8128_v27 = vcombine.high %v741_v22, %v745_v23  ;;  %v1036_v52 = vld [vmem:[%s13202_s3 + $0xc88] sm:$0xff]  ;;  %v781_v7 = vld [vmem:[%s13202_s3 + $0x490] sm:$0xff] }
 0x19c   :  { %4091 = vmatprep.subr.bf16.mxu0 %v8080_v26  ;;  %v8382_v26 = vcombine.high %v996_v45, %v1000_v21  ;;  %v1040_v5 = vld [vmem:[%s13202_s3 + $0xca8] sm:$0xff] }
 0x19e   :  { %4010 = vmatpush1.bf16.msra.mxu1 %v8333_v10  ;;  %v753_v10 = vld [vmem:[%s13202_s3 + $0x3b0] sm:$0xff] }
 0x19f   :  { %4092 = vmatpush1.bf16.msra.mxu0 %v8079_v31  ;;  %4011 = vmatprep.subr.bf16.mxu1 %v8342_v32  ;;  %v8381_v31 = vcombine.low %v996_v45, %v1000_v21  ;;  %v8127_v32 = vcombine.low %v741_v22, %v745_v23  ;;  %v8136_v35 = vcombine.high %v749_v30, %v753_v10  ;;  %v1044_v21 = vld [vmem:[%s13202_s3 + $0xcc8] sm:$0xff]  ;;  %v789_v23 = vld [vmem:[%s13202_s3 + $0x4d0] sm:$0xff] }
 0x1a0   :  { %4093 = vmatprep.subr.bf16.mxu0 %v8088_v33  ;;  %v8390_v33 = vcombine.high %v1004_v29, %v1008_v56  ;;  %v1048_v22 = vld [vmem:[%s13202_s3 + $0xce8] sm:$0xff] }
 0x1a2   :  { %4012 = vmatpush1.bf16.msra.mxu1 %v8341_v40  ;;  %v761_v40 = vld [vmem:[%s13202_s3 + $0x3f0] sm:$0xff] }
 0x1a3   :  { %4094 = vmatpush1.bf16.msra.mxu0 %v8087_v46  ;;  %4013 = vmatprep.subr.bf16.mxu1 %v8350_v48  ;;  %v8389_v46 = vcombine.low %v1004_v29, %v1008_v56  ;;  %v8135_v48 = vcombine.low %v749_v30, %v753_v10  ;;  %v8144_v50 = vcombine.high %v757_v38, %v761_v40  ;;  %v1052_v56 = vld [vmem:[%s13202_s3 + $0xd08] sm:$0xff]  ;;  %v797_v10 = vld [vmem:[%s13202_s3 + $0x510] sm:$0xff] }
 0x1a4   :  { %4095 = vmatprep.subr.bf16.mxu0 %v8096_v49  ;;  %v8398_v49 = vcombine.high %v1012_v36, %v1016_v37  ;;  %v1056_v30 = vld [vmem:[%s13202_s3 + $0xd28] sm:$0xff] }
 0x1a6   :  { %4014 = vmatpush1.bf16.msra.mxu1 %v8349_v55  ;;  %v769_v55 = vld [vmem:[%s13202_s3 + $0x430] sm:$0xff] }
 0x1a7   :  { %4096 = vmatpush1.bf16.msra.mxu0 %v8095_v58  ;;  %4015 = vmatprep.subr.bf16.mxu1 %v8358_v59  ;;  %v8397_v58 = vcombine.low %v1012_v36, %v1016_v37  ;;  %v8143_v59 = vcombine.low %v757_v38, %v761_v40  ;;  %v8152_v60 = vcombine.high %v765_v54, %v769_v55  ;;  %v1060_v37 = vld [vmem:[%s13202_s3 + $0xd48] sm:$0xff]  ;;  %v805_v40 = vld [vmem:[%s13202_s3 + $0x550] sm:$0xff] }
 0x1a8   :  { %4097 = vmatprep.subr.bf16.mxu0 %v8104_v14  ;;  %v8406_v14 = vcombine.high %v1020_v51, %v1024_v53  ;;  %v1064_v38 = vld [vmem:[%s13202_s3 + $0xd68] sm:$0xff] }
 0x1a9   :  { %v1068_v53 = vld [vmem:[%s13202_s3 + $0xd88] sm:$0xff] }
 0x1aa   :  { %4016 = vmatpush1.bf16.msra.mxu1 %v8357_v0  ;;  %v773_v0 = vld [vmem:[%s13202_s3 + $0x450] sm:$0xff] }
 0x1ab   :  { %4098 = vmatpush1.bf16.msra.mxu0 %v8103_v1  ;;  %4017 = vmatprep.subr.bf16.mxu1 %v8366_v3  ;;  %v777_v1 = vld [vmem:[%s13202_s3 + $0x470] sm:$0xff]  ;;  %v8151_v3 = vcombine.low %v765_v54, %v769_v55  ;;  %v1072_v54 = vld [vmem:[%s13202_s3 + $0xda8] sm:$0xff] }
 0x1ac   :  { %4099 = vmatprep.subr.bf16.mxu0 %v8112_v4  ;;  %v8414_v4 = vcombine.high %v1028_v61, %v1032_v62  ;;  %v8160_v6 = vcombine.high %v773_v0, %v777_v1  ;;  %v813_v55 = vld [vmem:[%s13202_s3 + $0x590] sm:$0xff] }
 0x1ae   :  { %4018 = vmatpush1.bf16.msra.mxu1 %v8365_v9  ;;  %v785_v9 = vld [vmem:[%s13202_s3 + $0x4b0] sm:$0xff] }
 0x1af   :  { %4100 = vmatpush1.bf16.msra.mxu0 %v8111_v11  ;;  %4019 = vmatprep.subr.bf16.mxu1 %v8374_v12  ;;  %v8413_v11 = vcombine.low %v1028_v61, %v1032_v62  ;;  %v8159_v12 = vcombine.low %v773_v0, %v777_v1  ;;  %v8168_v45 = vcombine.high %v781_v7, %v785_v9  ;;  %v1080_v0 = vld [vmem:[%s13202_s3 + $0xde8] sm:$0xff] }
 0x1b0   :  { %4101 = vmatprep.subr.bf16.mxu0 %v8120_v19  ;;  %v8422_v19 = vcombine.high %v1036_v52, %v1040_v5 }
 0x1b2   :  { %4020 = vmatpush1.bf16.msra.mxu1 %v8373_v24  ;;  %v793_v24 = vld [vmem:[%s13202_s3 + $0x4f0] sm:$0xff] }
 0x1b3   :  { %4102 = vmatpush1.bf16.msra.mxu0 %v8119_v25  ;;  %4021 = vmatprep.subr.bf16.mxu1 %v8382_v26  ;;  %v8421_v25 = vcombine.low %v1036_v52, %v1040_v5  ;;  %v8167_v26 = vcombine.low %v781_v7, %v785_v9  ;;  %v8176_v29 = vcombine.high %v789_v23, %v793_v24 }
 0x1b4   :  { %4103 = vmatprep.subr.bf16.mxu0 %v8128_v27  ;;  %v8430_v27 = vcombine.high %v1044_v21, %v1048_v22  ;;  %v8453_v5 = vcombine.low %v1068_v53, %v1072_v54 }
 0x1b6   :  { %4022 = vmatpush1.bf16.msra.mxu1 %v8381_v31  ;;  %v801_v31 = vld [vmem:[%s13202_s3 + $0x530] sm:$0xff] }
 0x1b7   :  { %4104 = vmatpush1.bf16.msra.mxu0 %v8127_v32  ;;  %4023 = vmatprep.subr.bf16.mxu1 %v8390_v33  ;;  %v8429_v32 = vcombine.low %v1044_v21, %v1048_v22  ;;  %v8175_v33 = vcombine.low %v789_v23, %v793_v24  ;;  %v8184_v36 = vcombine.high %v797_v10, %v801_v31  ;;  %v833_v21 = vld [vmem:[%s13202_s3 + $0x630] sm:$0xff] }
 0x1b8   :  { %4105 = vmatprep.subr.bf16.mxu0 %v8136_v35  ;;  %v8438_v35 = vcombine.high %v1052_v56, %v1056_v30 }
 0x1ba   :  { %4024 = vmatpush1.bf16.msra.mxu1 %v8389_v46  ;;  %v809_v46 = vld [vmem:[%s13202_s3 + $0x570] sm:$0xff] }
 0x1bb   :  { %4106 = vmatpush1.bf16.msra.mxu0 %v8135_v48  ;;  %4025 = vmatprep.subr.bf16.mxu1 %v8398_v49  ;;  %v8437_v48 = vcombine.low %v1052_v56, %v1056_v30  ;;  %v8183_v49 = vcombine.low %v797_v10, %v801_v31  ;;  %v8192_v51 = vcombine.high %v805_v40, %v809_v46  ;;  %v841_v56 = vld [vmem:[%s13202_s3 + $0x670] sm:$0xff] }
 0x1bc   :  { %4107 = vmatprep.subr.bf16.mxu0 %v8144_v50  ;;  %v8446_v50 = vcombine.high %v1060_v37, %v1064_v38 }
 0x1be   :  { %4026 = vmatpush1.bf16.msra.mxu1 %v8397_v58  ;;  %v817_v58 = vld [vmem:[%s13202_s3 + $0x5b0] sm:$0xff] }
 0x1bf   :  { %4108 = vmatpush1.bf16.msra.mxu0 %v8143_v59  ;;  %4036 = vmatprep.subr.bf16.mxu1 %v8406_v14  ;;  %v8445_v59 = vcombine.low %v1060_v37, %v1064_v38  ;;  %v8191_v14 = vcombine.low %v805_v40, %v809_v46  ;;  %v8200_v62 = vcombine.high %v813_v55, %v817_v58  ;;  %v849_v37 = vld [vmem:[%s13202_s3 + $0x6b0] sm:$0xff] }
 0x1c0   :  { %4118 = vmatprep.subr.bf16.mxu0 %v8152_v60  ;;  %v8454_v60 = vcombine.high %v1068_v53, %v1072_v54  ;;  %v8199_v7 = vcombine.low %v813_v55, %v817_v58  ;;  %v857_v53 = vld [vmem:[%s13202_s3 + $0x6f0] sm:$0xff] }
 0x1c1   :  { %4028 = vmatmul.mubr.bf16.vlgmr.msra.gmra.mrb[12].mxu1 %v10568_v8 }
 0x1c2   :  { %4110 = vmatmul.mubr.bf16.vlgmr.msra.gmra.mrb[12].mxu0 %v10342_v43  ;;  %4037 = vmatpush1.bf16.msra.mxu1 %v8405_v63  ;;  %v1076_v63 = vld [vmem:[%s13202_s3 + $0xdc8] sm:$0xff] }
 0x1c3   :  { %4068 = vmatprep.mubr.bf16.mxu1 %v10583_v39  ;;  %4119 = vmatpush1.bf16.msra.mxu0 %v8151_v3  ;;  %v821_v3 = vld [vmem:[%s13202_s3 + $0x5d0] sm:$0xff]  ;;  %v8462_v9 = vcombine.high %v1076_v63, %v1080_v0  ;;  %v8461_v22 = vcombine.low %v1076_v63, %v1080_v0 }
 0x1c4   :  { %4150 = vmatprep.mubr.bf16.mxu0 %v10344_v44  ;;  %4038 = vmatprep.subr.bf16.mxu1 %v8414_v4  ;;  %v825_v4 = vld [vmem:[%s13202_s3 + $0x5f0] sm:$0xff] }
 0x1c5   :  { %4120 = vmatprep.subr.bf16.mxu0 %v8160_v6  ;;  %v8207_v23 = vcombine.low %v821_v3, %v825_v4  ;;  %v865_v63 = vld [vmem:[%s13202_s3 + $0x730] sm:$0xff] }
 0x1c6   :  { %4039 = vmatpush1.bf16.msra.mxu1 %v8413_v11  ;;  %v8208_v11 = vcombine.high %v821_v3, %v825_v4 }
 0x1c7   :  { %4121 = vmatpush1.bf16.msra.mxu0 %v8159_v12  ;;  %4040 = vmatprep.subr.bf16.mxu1 %v8422_v19  ;;  %v1084_v12 = vld [vmem:[%s13202_s3 + $0xe08] sm:$0xff] }
 0x1c8   :  { %4122 = vmatprep.subr.bf16.mxu0 %v8168_v45  ;;  %v1088_v19 = vld [vmem:[%s13202_s3 + $0xe28] sm:$0xff]  ;;  %v829_v45 = vld [vmem:[%s13202_s3 + $0x610] sm:$0xff] }
 0x1c9   :  { %v8470_v24 = vcombine.high %v1084_v12, %v1088_v19  ;;  %v8469_v30 = vcombine.low %v1084_v12, %v1088_v19  ;;  %v8215_v10 = vcombine.low %v829_v45, %v833_v21 }
 0x1ca   :  { %4041 = vmatpush1.bf16.msra.mxu1 %v8421_v25  ;;  %v8216_v25 = vcombine.high %v829_v45, %v833_v21  ;;  %v1132_v21 = vld [vmem:[%s13202_s3 + $0xf88] sm:$0xff] }
 0x1cb   :  { %4123 = vmatpush1.bf16.msra.mxu0 %v8167_v26  ;;  %4042 = vmatprep.subr.bf16.mxu1 %v8430_v27  ;;  %v1092_v26 = vld [vmem:[%s13202_s3 + $0xe48] sm:$0xff] }
 0x1cc   :  { %4124 = vmatprep.subr.bf16.mxu0 %v8176_v29  ;;  %v1096_v27 = vld [vmem:[%s13202_s3 + $0xe68] sm:$0xff]  ;;  %v837_v29 = vld [vmem:[%s13202_s3 + $0x650] sm:$0xff] }
 0x1cd   :  { %v8478_v31 = vcombine.high %v1092_v26, %v1096_v27  ;;  %v8477_v38 = vcombine.low %v1092_v26, %v1096_v27  ;;  %v8223_v40 = vcombine.low %v837_v29, %v841_v56 }
 0x1ce   :  { %4043 = vmatpush1.bf16.msra.mxu1 %v8429_v32  ;;  %v8224_v32 = vcombine.high %v837_v29, %v841_v56  ;;  %v1140_v56 = vld [vmem:[%s13202_s3 + $0xfc8] sm:$0xff] }
 0x1cf   :  { %4125 = vmatpush1.bf16.msra.mxu0 %v8175_v33  ;;  %4044 = vmatprep.subr.bf16.mxu1 %v8438_v35  ;;  %v1100_v33 = vld [vmem:[%s13202_s3 + $0xe88] sm:$0xff] }
 0x1d0   :  { %4126 = vmatprep.subr.bf16.mxu0 %v8184_v36  ;;  %v1104_v35 = vld [vmem:[%s13202_s3 + $0xea8] sm:$0xff]  ;;  %v845_v36 = vld [vmem:[%s13202_s3 + $0x690] sm:$0xff] }
 0x1d1   :  { %v8486_v46 = vcombine.high %v1100_v33, %v1104_v35  ;;  %v8485_v54 = vcombine.low %v1100_v33, %v1104_v35  ;;  %v8231_v55 = vcombine.low %v845_v36, %v849_v37 }
 0x1d2   :  { %4045 = vmatpush1.bf16.msra.mxu1 %v8437_v48  ;;  %v8232_v48 = vcombine.high %v845_v36, %v849_v37  ;;  %v638_v37 = vld [vmem:[%s13202_s3 + $0x18] sm:$0xff] }
 0x1d3   :  { %4127 = vmatpush1.bf16.msra.mxu0 %v8183_v49  ;;  %4046 = vmatprep.subr.bf16.mxu1 %v8446_v50  ;;  %v1108_v49 = vld [vmem:[%s13202_s3 + $0xec8] sm:$0xff] }
 0x1d4   :  { %v11036_v61 = vpop.f32.mrb[8].mxu1  ;;  %4128 = vmatprep.subr.bf16.mxu0 %v8192_v51  ;;  %v1112_v50 = vld [vmem:[%s13202_s3 + $0xee8] sm:$0xff]  ;;  %v853_v51 = vld [vmem:[%s13202_s3 + $0x6d0] sm:$0xff] }
 0x1d5   :  { %v11044_v1 = vpop.f32.mrb[9].mxu1  ;;  %v8494_v58 = vcombine.high %v1108_v49, %v1112_v50  ;;  %v8493_v0 = vcombine.low %v1108_v49, %v1112_v50  ;;  %v8239_v3 = vcombine.low %v853_v51, %v857_v53 }
 0x1d6   :  { %4047 = vmatpush1.bf16.msra.mxu1 %v8445_v59  ;;  %v3787_v52 = vpop.f32.mrb[10].mxu1  ;;  %v8240_v59 = vcombine.high %v853_v51, %v857_v53  ;;  %v901_v53 = vld [vmem:[%s13202_s3 + $0x850] sm:$0xff] }
 0x1d7   :  { %4129 = vmatpush1.bf16.msra.mxu0 %v8191_v14  ;;  %v3788_v6 = vpop.f32.mrb[11].mxu1  ;;  %4048 = vmatprep.subr.bf16.mxu1 %v8454_v60  ;;  %v1116_v14 = vld [vmem:[%s13202_s3 + $0xf08] sm:$0xff] }
 0x1d8   :  { %4130 = vmatprep.subr.bf16.mxu0 %v8200_v62  ;;  %v1120_v60 = vld [vmem:[%s13202_s3 + $0xf28] sm:$0xff]  ;;  %v861_v62 = vld [vmem:[%s13202_s3 + $0x710] sm:$0xff] }
 0x1d9   :  { %v8502_v4 = vcombine.high %v1116_v14, %v1120_v60  ;;  %v8248_v52 = vcombine.high %v861_v62, %v865_v63  ;;  %v1128_v6 = vld [vmem:[%s13202_s3 + $0xf68] sm:$0xff]  ;;  %v8247_v12 = vcombine.low %v861_v62, %v865_v63  ;;  %v654_v62 = vld [vmem:[%s13202_s3 + $0x98] sm:$0xff] }
 0x1da   :  { %4049 = vmatpush1.bf16.msra.mxu1 %v8453_v5  ;;  %v1124_v5 = vld [vmem:[%s13202_s3 + $0xf48] sm:$0xff]  ;;  %v658_v63 = vld [vmem:[%s13202_s3 + $0xb8] sm:$0xff] }
 0x1db   :  { %4131 = vmatpush1.bf16.msra.mxu0 %v8199_v7  ;;  %4050 = vmatprep.subr.bf16.mxu1 %v8462_v9  ;;  %v869_v7 = vld [vmem:[%s13202_s3 + $0x750] sm:$0xff]  ;;  %v8510_v19 = vcombine.high %v1124_v5, %v1128_v6 }
 0x1dc   :  { %4132 = vmatprep.subr.bf16.mxu0 %v8208_v11  ;;  %v873_v9 = vld [vmem:[%s13202_s3 + $0x770] sm:$0xff]  ;;  %v8501_v11 = vcombine.low %v1116_v14, %v1120_v60 }
 0x1dd   :  { %v8256_v45 = vcombine.high %v869_v7, %v873_v9  ;;  %v8255_v26 = vcombine.low %v869_v7, %v873_v9  ;;  %v662_v9 = vld [vmem:[%s13202_s3 + $0xd8] sm:$0xff] }
 0x1de   :  { %4051 = vmatpush1.bf16.msra.mxu1 %v8461_v22  ;;  %v1136_v22 = vld [vmem:[%s13202_s3 + $0xfa8] sm:$0xff] }
 0x1df   :  { %4133 = vmatpush1.bf16.msra.mxu0 %v8207_v23  ;;  %4052 = vmatprep.subr.bf16.mxu1 %v8470_v24  ;;  %v877_v23 = vld [vmem:[%s13202_s3 + $0x790] sm:$0xff]  ;;  %v8518_v27 = vcombine.high %v1132_v21, %v1136_v22 }
 0x1e0   :  { %4134 = vmatprep.subr.bf16.mxu0 %v8216_v25  ;;  %v881_v24 = vld [vmem:[%s13202_s3 + $0x7b0] sm:$0xff]  ;;  %v8509_v25 = vcombine.low %v1124_v5, %v1128_v6  ;;  %v8042_v6 = vcombine.high %v654_v62, %v658_v63 }
 0x1e1   :  { %v8264_v29 = vcombine.high %v877_v23, %v881_v24  ;;  %v8263_v33 = vcombine.low %v877_v23, %v881_v24  ;;  %v670_v23 = vld [vmem:[%s13202_s3 + $0x118] sm:$0xff] }
 0x1e2   :  { %4053 = vmatpush1.bf16.msra.mxu1 %v8469_v30  ;;  %v1144_v30 = vld [vmem:[%s13202_s3 + $0xfe8] sm:$0xff]  ;;  %v674_v24 = vld [vmem:[%s13202_s3 + $0x138] sm:$0xff] }
 0x1e3   :  { %4135 = vmatpush1.bf16.msra.mxu0 %v8215_v10  ;;  %4054 = vmatprep.subr.bf16.mxu1 %v8478_v31  ;;  %v885_v10 = vld [vmem:[%s13202_s3 + $0x7d0] sm:$0xff]  ;;  %v8526_v35 = vcombine.high %v1140_v56, %v1144_v30 }
 0x1e4   :  { %4136 = vmatprep.subr.bf16.mxu0 %v8224_v32  ;;  %v889_v31 = vld [vmem:[%s13202_s3 + $0x7f0] sm:$0xff]  ;;  %v8517_v32 = vcombine.low %v1132_v21, %v1136_v22 }
 0x1e5   :  { %v8272_v36 = vcombine.high %v885_v10, %v889_v31  ;;  %v8271_v49 = vcombine.low %v885_v10, %v889_v31  ;;  %v678_v10 = vld [vmem:[%s13202_s3 + $0x158] sm:$0xff] }
 0x1e6   :  { %4055 = vmatpush1.bf16.msra.mxu1 %v8477_v38  ;;  %v642_v38 = vld [vmem:[%s13202_s3 + $0x38] sm:$0xff] }
 0x1e7   :  { %4137 = vmatpush1.bf16.msra.mxu0 %v8223_v40  ;;  %4056 = vmatprep.subr.bf16.mxu1 %v8486_v46  ;;  %v893_v40 = vld [vmem:[%s13202_s3 + $0x810] sm:$0xff]  ;;  %v8026_v50 = vcombine.high %v638_v37, %v642_v38  ;;  %v682_v31 = vld [vmem:[%s13202_s3 + $0x178] sm:$0xff] }
 0x1e8   :  { %4138 = vmatprep.subr.bf16.mxu0 %v8232_v48  ;;  %v897_v46 = vld [vmem:[%s13202_s3 + $0x830] sm:$0xff]  ;;  %v8525_v48 = vcombine.low %v1140_v56, %v1144_v30  ;;  %v8058_v56 = vcombine.high %v670_v23, %v674_v24 }
 0x1e9   :  { %v8280_v51 = vcombine.high %v893_v40, %v897_v46  ;;  %v8279_v14 = vcombine.low %v893_v40, %v897_v46  ;;  %v686_v40 = vld [vmem:[%s13202_s3 + $0x198] sm:$0xff] }
 0x1ea   :  { %4057 = vmatpush1.bf16.msra.mxu1 %v8485_v54  ;;  %v905_v54 = vld [vmem:[%s13202_s3 + $0x870] sm:$0xff]  ;;  %v690_v46 = vld [vmem:[%s13202_s3 + $0x1b8] sm:$0xff] }
 0x1eb   :  { %4139 = vmatpush1.bf16.msra.mxu0 %v8231_v55  ;;  %4058 = vmatprep.subr.bf16.mxu1 %v8494_v58  ;;  %v8025_v55 = vcombine.low %v638_v37, %v642_v38  ;;  %v646_v58 = vld [vmem:[%s13202_s3 + $0x58] sm:$0xff]  ;;  %v8288_v60 = vcombine.high %v901_v53, %v905_v54  ;;  %v8287_v5 = vcombine.low %v901_v53, %v905_v54 }
 0x1ec   :  { %4140 = vmatprep.subr.bf16.mxu0 %v8240_v59  ;;  %v650_v59 = vld [vmem:[%s13202_s3 + $0x78] sm:$0xff]  ;;  %v8066_v37 = vcombine.high %v678_v10, %v682_v31  ;;  %v8074_v53 = vcombine.high %v686_v40, %v690_v46 }
 0x1ee   :  { %4059 = vmatpush1.bf16.msra.mxu1 %v8493_v0  ;;  %v8034_v0 = vcombine.high %v646_v58, %v650_v59 }
 0x1ef   :  { %4141 = vmatpush1.bf16.msra.mxu0 %v8239_v3  ;;  %4060 = vmatprep.subr.bf16.mxu1 %v8502_v4  ;;  %v909_v3 = vld [vmem:[%s13202_s3 + $0x890] sm:$0xff] }
 0x1f0   :  { %4142 = vmatprep.subr.bf16.mxu0 %v8248_v52  ;;  %v913_v4 = vld [vmem:[%s13202_s3 + $0x8b0] sm:$0xff]  ;;  %v8033_v52 = vcombine.low %v646_v58, %v650_v59  ;;  %v698_v58 = vld [vmem:[%s13202_s3 + $0x1f8] sm:$0xff] }
 0x1f1   :  { %v8296_v7 = vcombine.high %v909_v3, %v913_v4  ;;  %v949_v59 = vld [vmem:[%s13202_s3 + $0x9d0] sm:$0xff] }
 0x1f2   :  { %4061 = vmatpush1.bf16.msra.mxu1 %v8501_v11  ;;  %v666_v11 = vld [vmem:[%s13202_s3 + $0xf8] sm:$0xff] }
 0x1f3   :  { %4143 = vmatpush1.bf16.msra.mxu0 %v8247_v12  ;;  %4062 = vmatprep.subr.bf16.mxu1 %v8510_v19  ;;  %v917_v12 = vld [vmem:[%s13202_s3 + $0x8d0] sm:$0xff]  ;;  %v8050_v21 = vcombine.high %v662_v9, %v666_v11 }
 0x1f4   :  { %4144 = vmatprep.subr.bf16.mxu0 %v8256_v45  ;;  %v921_v19 = vld [vmem:[%s13202_s3 + $0x8f0] sm:$0xff]  ;;  %v8295_v45 = vcombine.low %v909_v3, %v913_v4  ;;  %v702_v3 = vld [vmem:[%s13202_s3 + $0x218] sm:$0xff] }
 0x1f5   :  { %v8304_v22 = vcombine.high %v917_v12, %v921_v19  ;;  %v706_v4 = vld [vmem:[%s13202_s3 + $0x238] sm:$0xff] }
 0x1f6   :  { %4063 = vmatpush1.bf16.msra.mxu1 %v8509_v25  ;;  %v925_v25 = vld [vmem:[%s13202_s3 + $0x910] sm:$0xff] }
 0x1f7   :  { %4145 = vmatpush1.bf16.msra.mxu0 %v8255_v26  ;;  %4064 = vmatprep.subr.bf16.mxu1 %v8518_v27  ;;  %v929_v26 = vld [vmem:[%s13202_s3 + $0x930] sm:$0xff]  ;;  %v8049_v27 = vcombine.low %v662_v9, %v666_v11  ;;  %v8090_v9 = vcombine.high %v702_v3, %v706_v4 }
 0x1f8   :  { %4146 = vmatprep.subr.bf16.mxu0 %v8264_v29  ;;  %v8303_v29 = vcombine.low %v917_v12, %v921_v19  ;;  %v8312_v30 = vcombine.high %v925_v25, %v929_v26  ;;  %v710_v12 = vld [vmem:[%s13202_s3 + $0x258] sm:$0xff] }
 0x1f9   :  { %v714_v19 = vld [vmem:[%s13202_s3 + $0x278] sm:$0xff] }
 0x1fa   :  { %4065 = vmatpush1.bf16.msra.mxu1 %v8517_v32  ;;  %v933_v32 = vld [vmem:[%s13202_s3 + $0x950] sm:$0xff] }
 0x1fb   :  { %4147 = vmatpush1.bf16.msra.mxu0 %v8263_v33  ;;  %4066 = vmatprep.subr.bf16.mxu1 %v8526_v35  ;;  %v937_v33 = vld [vmem:[%s13202_s3 + $0x970] sm:$0xff]  ;;  %v8057_v35 = vcombine.low %v670_v23, %v674_v24  ;;  %v8098_v23 = vcombine.high %v710_v12, %v714_v19 }
 0x1fc   :  { %4148 = vmatprep.subr.bf16.mxu0 %v8272_v36  ;;  %v8311_v36 = vcombine.low %v925_v25, %v929_v26  ;;  %v8320_v38 = vcombine.high %v933_v32, %v937_v33  ;;  %v718_v25 = vld [vmem:[%s13202_s3 + $0x298] sm:$0xff] }
 0x1fd   :  { %v722_v26 = vld [vmem:[%s13202_s3 + $0x2b8] sm:$0xff] }
 0x1fe   :  { %4067 = vmatpush1.bf16.msra.mxu1 %v8525_v48  ;;  %v941_v48 = vld [vmem:[%s13202_s3 + $0x990] sm:$0xff] }
 0x1ff   :  { %4149 = vmatpush1.bf16.msra.mxu0 %v8271_v49  ;;  %4241 = vmatprep.subr.bf16.mxu1 %v8026_v50  ;;  %v945_v49 = vld [vmem:[%s13202_s3 + $0x9b0] sm:$0xff]  ;;  %v8065_v50 = vcombine.low %v678_v10, %v682_v31  ;;  %v8106_v10 = vcombine.high %v718_v25, %v722_v26 }
 0x200   :  { %4159 = vmatprep.subr.bf16.mxu0 %v8280_v51  ;;  %v8319_v51 = vcombine.low %v933_v32, %v937_v33  ;;  %v8328_v54 = vcombine.high %v941_v48, %v945_v49  ;;  %v726_v32 = vld [vmem:[%s13202_s3 + $0x2d8] sm:$0xff] }
 0x201   :  { %4069 = vmatmul.mubr.bf16.vlgmr.msra.gmra.mrb[12].mxu1 %v10768_v20  ;;  %v730_v33 = vld [vmem:[%s13202_s3 + $0x2f8] sm:$0xff] }
 0x202   :  { %4151 = vmatmul.mubr.bf16.vlgmr.msra.gmra.mrb[12].mxu0 %v10338_v41  ;;  %4242 = vmatpush1.bf16.msra.mxu1 %v8025_v55  ;;  %v694_v55 = vld [vmem:[%s13202_s3 + $0x1d8] sm:$0xff] }
 0x203   :  { %4160 = vmatpush1.bf16.msra.mxu0 %v8279_v14  ;;  %4191 = vmatprep.mubr.bf16.mxu0 %v10458_v2  ;;  %v953_v14 = vld [vmem:[%s13202_s3 + $0x9f0] sm:$0xff] }
 0x204   :  { %4273 = vmatprep.mubr.bf16.mxu1 %v10340_v42  ;;  %4161 = vmatprep.subr.bf16.mxu0 %v8288_v60  ;;  %v8041_v42 = vcombine.low %v654_v62, %v658_v63  ;;  %v8073_v60 = vcombine.low %v686_v40, %v690_v46  ;;  %v8327_v62 = vcombine.low %v941_v48, %v945_v49  ;;  %v734_v48 = vld [vmem:[%s13202_s3 + $0x318] sm:$0xff] }
 0x205   :  { %4243 = vmatprep.subr.bf16.mxu1 %v8034_v0  ;;  %v8082_v63 = vcombine.high %v694_v55, %v698_v58  ;;  %v8336_v0 = vcombine.high %v949_v59, %v953_v14  ;;  %v8114_v40 = vcombine.high %v726_v32, %v730_v33  ;;  %v738_v49 = vld [vmem:[%s13202_s3 + $0x338] sm:$0xff] }
 0x206   :  { %4244 = vmatpush1.bf16.msra.mxu1 %v8033_v52  ;;  %v957_v52 = vld [vmem:[%s13202_s3 + $0xa10] sm:$0xff] }
 0x207   :  { %4162 = vmatpush1.bf16.msra.mxu0 %v8287_v5  ;;  %4245 = vmatprep.subr.bf16.mxu1 %v8042_v6  ;;  %v961_v5 = vld [vmem:[%s13202_s3 + $0xa30] sm:$0xff]  ;;  %v8081_v6 = vcombine.low %v694_v55, %v698_v58  ;;  %v8122_v55 = vcombine.high %v734_v48, %v738_v49 }
 0x208   :  { %4163 = vmatprep.subr.bf16.mxu0 %v8296_v7  ;;  %v8335_v7 = vcombine.low %v949_v59, %v953_v14  ;;  %v8344_v11 = vcombine.high %v957_v52, %v961_v5  ;;  %v742_v59 = vld [vmem:[%s13202_s3 + $0x358] sm:$0xff] }
 0x209   :  { %v746_v14 = vld [vmem:[%s13202_s3 + $0x378] sm:$0xff] }
 0x20a   :  { %4246 = vmatpush1.bf16.msra.mxu1 %v8041_v42  ;;  %v965_v42 = vld [vmem:[%s13202_s3 + $0xa50] sm:$0xff] }
 0x20b   :  { %4164 = vmatpush1.bf16.msra.mxu0 %v8295_v45  ;;  %4247 = vmatprep.subr.bf16.mxu1 %v8050_v21  ;;  %v969_v45 = vld [vmem:[%s13202_s3 + $0xa70] sm:$0xff]  ;;  %v8089_v21 = vcombine.low %v702_v3, %v706_v4  ;;  %v8130_v3 = vcombine.high %v742_v59, %v746_v14 }
 0x20c   :  { %4165 = vmatprep.subr.bf16.mxu0 %v8304_v22  ;;  %v8343_v22 = vcombine.low %v957_v52, %v961_v5  ;;  %v8352_v24 = vcombine.high %v965_v42, %v969_v45  ;;  %v750_v52 = vld [vmem:[%s13202_s3 + $0x398] sm:$0xff] }
 0x20d   :  { %v754_v5 = vld [vmem:[%s13202_s3 + $0x3b8] sm:$0xff] }
 0x20e   :  { %4248 = vmatpush1.bf16.msra.mxu1 %v8049_v27  ;;  %v973_v27 = vld [vmem:[%s13202_s3 + $0xa90] sm:$0xff] }
 0x20f   :  { %4166 = vmatpush1.bf16.msra.mxu0 %v8303_v29  ;;  %4249 = vmatprep.subr.bf16.mxu1 %v8058_v56  ;;  %v977_v29 = vld [vmem:[%s13202_s3 + $0xab0] sm:$0xff]  ;;  %v8097_v56 = vcombine.low %v710_v12, %v714_v19  ;;  %v8138_v12 = vcombine.high %v750_v52, %v754_v5 }
 0x210   :  { %4167 = vmatprep.subr.bf16.mxu0 %v8312_v30  ;;  %v8351_v30 = vcombine.low %v965_v42, %v969_v45  ;;  %v8360_v31 = vcombine.high %v973_v27, %v977_v29  ;;  %v758_v42 = vld [vmem:[%s13202_s3 + $0x3d8] sm:$0xff] }
 0x211   :  { %v762_v45 = vld [vmem:[%s13202_s3 + $0x3f8] sm:$0xff] }
 0x212   :  { %4250 = vmatpush1.bf16.msra.mxu1 %v8057_v35  ;;  %v981_v35 = vld [vmem:[%s13202_s3 + $0xad0] sm:$0xff] }
 0x213   :  { %4168 = vmatpush1.bf16.msra.mxu0 %v8311_v36  ;;  %4251 = vmatprep.subr.bf16.mxu1 %v8066_v37  ;;  %v985_v36 = vld [vmem:[%s13202_s3 + $0xaf0] sm:$0xff]  ;;  %v8105_v37 = vcombine.low %v718_v25, %v722_v26  ;;  %v8146_v25 = vcombine.high %v758_v42, %v762_v45 }
 0x214   :  { %4169 = vmatprep.subr.bf16.mxu0 %v8320_v38  ;;  %v8359_v38 = vcombine.low %v973_v27, %v977_v29  ;;  %v8368_v46 = vcombine.high %v981_v35, %v985_v36  ;;  %v766_v27 = vld [vmem:[%s13202_s3 + $0x418] sm:$0xff] }
 0x215   :  { %v770_v29 = vld [vmem:[%s13202_s3 + $0x438] sm:$0xff] }
 0x216   :  { %4252 = vmatpush1.bf16.msra.mxu1 %v8065_v50  ;;  %v989_v50 = vld [vmem:[%s13202_s3 + $0xb10] sm:$0xff] }
 0x217   :  { %4170 = vmatpush1.bf16.msra.mxu0 %v8319_v51  ;;  %4253 = vmatprep.subr.bf16.mxu1 %v8074_v53  ;;  %v993_v51 = vld [vmem:[%s13202_s3 + $0xb30] sm:$0xff]  ;;  %v8113_v53 = vcombine.low %v726_v32, %v730_v33  ;;  %v8154_v32 = vcombine.high %v766_v27, %v770_v29 }
 0x218   :  { %4171 = vmatprep.subr.bf16.mxu0 %v8328_v54  ;;  %v8367_v54 = vcombine.low %v981_v35, %v985_v36  ;;  %v8376_v58 = vcombine.high %v989_v50, %v993_v51  ;;  %v1029_v35 = vld [vmem:[%s13202_s3 + $0xc50] sm:$0xff] }
 0x219   :  { %v1033_v36 = vld [vmem:[%s13202_s3 + $0xc70] sm:$0xff] }
 0x21a   :  { %4254 = vmatpush1.bf16.msra.mxu1 %v8073_v60  ;;  %v997_v60 = vld [vmem:[%s13202_s3 + $0xb50] sm:$0xff] }
 0x21b   :  { %4172 = vmatpush1.bf16.msra.mxu0 %v8327_v62  ;;  %4255 = vmatprep.subr.bf16.mxu1 %v8082_v63  ;;  %v1001_v62 = vld [vmem:[%s13202_s3 + $0xb70] sm:$0xff]  ;;  %v8121_v63 = vcombine.low %v734_v48, %v738_v49  ;;  %v8416_v48 = vcombine.high %v1029_v35, %v1033_v36  ;;  %v782_v49 = vld [vmem:[%s13202_s3 + $0x498] sm:$0xff] }
 0x21c   :  { %4173 = vmatprep.subr.bf16.mxu0 %v8336_v0  ;;  %v8375_v0 = vcombine.low %v989_v50, %v993_v51  ;;  %v8384_v4 = vcombine.high %v997_v60, %v1001_v62  ;;  %v786_v50 = vld [vmem:[%s13202_s3 + $0x4b8] sm:$0xff] }
 0x21e   :  { %4256 = vmatpush1.bf16.msra.mxu1 %v8081_v6  ;;  %v1005_v6 = vld [vmem:[%s13202_s3 + $0xb90] sm:$0xff] }
 0x21f   :  { %4174 = vmatpush1.bf16.msra.mxu0 %v8335_v7  ;;  %4257 = vmatprep.subr.bf16.mxu1 %v8090_v9  ;;  %v1009_v7 = vld [vmem:[%s13202_s3 + $0xbb0] sm:$0xff]  ;;  %v8129_v9 = vcombine.low %v742_v59, %v746_v14  ;;  %v8170_v59 = vcombine.high %v782_v49, %v786_v50  ;;  %v790_v14 = vld [vmem:[%s13202_s3 + $0x4d8] sm:$0xff] }
 0x220   :  { %4175 = vmatprep.subr.bf16.mxu0 %v8344_v11  ;;  %v8383_v11 = vcombine.low %v997_v60, %v1001_v62  ;;  %v8392_v19 = vcombine.high %v1005_v6, %v1009_v7  ;;  %v794_v60 = vld [vmem:[%s13202_s3 + $0x4f8] sm:$0xff]  ;;  %v1045_v62 = vld [vmem:[%s13202_s3 + $0xcd0] sm:$0xff] }
 0x222   :  { %4258 = vmatpush1.bf16.msra.mxu1 %v8089_v21  ;;  %v1013_v21 = vld [vmem:[%s13202_s3 + $0xbd0] sm:$0xff] }
 0x223   :  { %4176 = vmatpush1.bf16.msra.mxu0 %v8343_v22  ;;  %4259 = vmatprep.subr.bf16.mxu1 %v8098_v23  ;;  %v1017_v22 = vld [vmem:[%s13202_s3 + $0xbf0] sm:$0xff]  ;;  %v8137_v23 = vcombine.low %v750_v52, %v754_v5  ;;  %v798_v52 = vld [vmem:[%s13202_s3 + $0x518] sm:$0xff] }
 0x224   :  { %4177 = vmatprep.subr.bf16.mxu0 %v8352_v24  ;;  %v8391_v24 = vcombine.low %v1005_v6, %v1009_v7  ;;  %v8400_v26 = vcombine.high %v1013_v21, %v1017_v22  ;;  %v802_v5 = vld [vmem:[%s13202_s3 + $0x538] sm:$0xff]  ;;  %v1053_v6 = vld [vmem:[%s13202_s3 + $0xd10] sm:$0xff] }
 0x225   :  { %v1057_v7 = vld [vmem:[%s13202_s3 + $0xd30] sm:$0xff] }
 0x226   :  { %4260 = vmatpush1.bf16.msra.mxu1 %v8097_v56  ;;  %v1021_v56 = vld [vmem:[%s13202_s3 + $0xc10] sm:$0xff] }
 0x227   :  { %4178 = vmatpush1.bf16.msra.mxu0 %v8351_v30  ;;  %4261 = vmatprep.subr.bf16.mxu1 %v8106_v10  ;;  %v1025_v30 = vld [vmem:[%s13202_s3 + $0xc30] sm:$0xff]  ;;  %v8145_v10 = vcombine.low %v758_v42, %v762_v45  ;;  %v806_v42 = vld [vmem:[%s13202_s3 + $0x558] sm:$0xff] }
 0x228   :  { %4179 = vmatprep.subr.bf16.mxu0 %v8360_v31  ;;  %v8399_v31 = vcombine.low %v1013_v21, %v1017_v22  ;;  %v8408_v33 = vcombine.high %v1021_v56, %v1025_v30  ;;  %v810_v45 = vld [vmem:[%s13202_s3 + $0x578] sm:$0xff]  ;;  %v11417_v21 = vld [vmem:[%s13203_s4] sm:$0xff]  ;;  %v1061_v22 = vld [vmem:[%s13202_s3 + $0xd50] sm:$0xff] }
 0x22a   :  { %4262 = vmatpush1.bf16.msra.mxu1 %v8105_v37  ;;  %v8153_v37 = vcombine.low %v766_v27, %v770_v29  ;;  %v1152_v27 = vrot.slane %v11417_v21, %v10307_v15 }
 0x22b   :  { %4180 = vmatpush1.bf16.msra.mxu0 %v8359_v38  ;;  %4263 = vmatprep.subr.bf16.mxu1 %v8114_v40  ;;  %v774_v38 = vld [vmem:[%s13202_s3 + $0x458] sm:$0xff] }
 0x22c   :  { %4181 = vmatprep.subr.bf16.mxu0 %v8368_v46  ;;  %v778_v40 = vld [vmem:[%s13202_s3 + $0x478] sm:$0xff]  ;;  %v8407_v46 = vcombine.low %v1021_v56, %v1025_v30 }
 0x22d   :  { %v8162_v51 = vcombine.high %v774_v38, %v778_v40  ;;  %v814_v56 = vld [vmem:[%s13202_s3 + $0x598] sm:$0xff] }
 0x22e   :  { %4264 = vmatpush1.bf16.msra.mxu1 %v8113_v53  ;;  %v1037_v53 = vld [vmem:[%s13202_s3 + $0xc90] sm:$0xff]  ;;  %v818_v30 = vld [vmem:[%s13202_s3 + $0x5b8] sm:$0xff] }
 0x22f   :  { %4182 = vmatpush1.bf16.msra.mxu0 %v8367_v54  ;;  %4265 = vmatprep.subr.bf16.mxu1 %v8122_v55  ;;  %v1041_v54 = vld [vmem:[%s13202_s3 + $0xcb0] sm:$0xff]  ;;  %v8161_v55 = vcombine.low %v774_v38, %v778_v40  ;;  %v822_v40 = vld [vmem:[%s13202_s3 + $0x5d8] sm:$0xff] }
 0x230   :  { %4183 = vmatprep.subr.bf16.mxu0 %v8376_v58  ;;  %v8415_v58 = vcombine.low %v1029_v35, %v1033_v36  ;;  %v8202_v36 = vcombine.high %v814_v56, %v818_v30 }
 0x232   :  { %4266 = vmatpush1.bf16.msra.mxu1 %v8121_v63  ;;  %v1049_v63 = vld [vmem:[%s13202_s3 + $0xcf0] sm:$0xff] }
 0x233   :  { %4184 = vmatpush1.bf16.msra.mxu0 %v8375_v0  ;;  %4267 = vmatprep.subr.bf16.mxu1 %v8130_v3  ;;  %v8423_v0 = vcombine.low %v1037_v53, %v1041_v54  ;;  %v8178_v3 = vcombine.high %v790_v14, %v794_v60 }
 0x234   :  { %4185 = vmatprep.subr.bf16.mxu0 %v8384_v4  ;;  %v8432_v4 = vcombine.high %v1045_v62, %v1049_v63 }
 0x236   :  { %4268 = vmatpush1.bf16.msra.mxu1 %v8129_v9  ;;  %v8177_v9 = vcombine.low %v790_v14, %v794_v60  ;;  %v830_v60 = vld [vmem:[%s13202_s3 + $0x618] sm:$0xff] }
 0x237   :  { %4186 = vmatpush1.bf16.msra.mxu0 %v8383_v11  ;;  %4269 = vmatprep.subr.bf16.mxu1 %v8138_v12  ;;  %v8431_v11 = vcombine.low %v1045_v62, %v1049_v63  ;;  %v8186_v12 = vcombine.high %v798_v52, %v802_v5  ;;  %v834_v62 = vld [vmem:[%s13202_s3 + $0x638] sm:$0xff]  ;;  %v1085_v63 = vld [vmem:[%s13202_s3 + $0xe10] sm:$0xff] }
 0x238   :  { %4187 = vmatprep.subr.bf16.mxu0 %v8392_v19  ;;  %v8440_v19 = vcombine.high %v1053_v6, %v1057_v7 }
 0x23a   :  { %4270 = vmatpush1.bf16.msra.mxu1 %v8137_v23  ;;  %v1065_v23 = vld [vmem:[%s13202_s3 + $0xd70] sm:$0xff] }
 0x23b   :  { %4188 = vmatpush1.bf16.msra.mxu0 %v8391_v24  ;;  %4271 = vmatprep.subr.bf16.mxu1 %v8146_v25  ;;  %v8185_v24 = vcombine.low %v798_v52, %v802_v5  ;;  %v8439_v25 = vcombine.low %v1053_v6, %v1057_v7  ;;  %v8448_v29 = vcombine.high %v1061_v22, %v1065_v23  ;;  %v838_v5 = vld [vmem:[%s13202_s3 + $0x658] sm:$0xff]  ;;  %v1093_v7 = vld [vmem:[%s13202_s3 + $0xe50] sm:$0xff] }
 0x23c   :  { %4189 = vmatprep.subr.bf16.mxu0 %v8400_v26  ;;  %v8194_v26 = vcombine.high %v806_v42, %v810_v45  ;;  %v8447_v35 = vcombine.low %v1061_v22, %v1065_v23  ;;  %v842_v6 = vld [vmem:[%s13202_s3 + $0x678] sm:$0xff]  ;;  %v1101_v23 = vld [vmem:[%s13202_s3 + $0xe90] sm:$0xff] }
 0x23d   :  { %v850_v22 = vld [vmem:[%s13202_s3 + $0x6b8] sm:$0xff] }
 0x23e   :  { %4272 = vmatpush1.bf16.msra.mxu1 %v8145_v10  ;;  %v1156_v10 = vrot.slane %v11417_v21, %v10313_v17 }
 0x23f   :  { %4190 = vmatpush1.bf16.msra.mxu0 %v8399_v31  ;;  %4282 = vmatprep.subr.bf16.mxu1 %v8154_v32  ;;  %v1069_v31 = vld [vmem:[%s13202_s3 + $0xd90] sm:$0xff] }
 0x240   :  { %4200 = vmatprep.subr.bf16.mxu0 %v8408_v33  ;;  %v1073_v32 = vld [vmem:[%s13202_s3 + $0xdb0] sm:$0xff]  ;;  %v8193_v33 = vcombine.low %v806_v42, %v810_v45  ;;  %v846_v45 = vld [vmem:[%s13202_s3 + $0x698] sm:$0xff] }
 0x241   :  { %4274 = vmatmul.mubr.bf16.vlgmr.msra.gmra.mrb[16].mxu1 %v10342_v43  ;;  %v8424_v43 = vcombine.high %v1037_v53, %v1041_v54  ;;  %v8456_v38 = vcombine.high %v1069_v31, %v1073_v32  ;;  %v8201_v54 = vcombine.low %v814_v56, %v818_v30  ;;  %v854_v56 = vld [vmem:[%s13202_s3 + $0x6d8] sm:$0xff] }
 0x242   :  { %4192 = vmatmul.mubr.bf16.vlgmr.msra.gmra.mrb[12].mxu0 %v10568_v8  ;;  %4283 = vmatpush1.bf16.msra.mxu1 %v8153_v37  ;;  %v3784_v37 = vadd.f32 %v11036_v61, %v1152_v27  ;;  %v1081_v61 = vld [vmem:[%s13202_s3 + $0xdf0] sm:$0xff]  ;;  %v8234_v27 = vcombine.high %v846_v45, %v850_v22  ;;  %v858_v30 = vld [vmem:[%s13202_s3 + $0x6f8] sm:$0xff] }
 0x243   :  { %4201 = vmatpush1.bf16.msra.mxu0 %v8407_v46  ;;  %4232 = vmatprep.mubr.bf16.mxu0 %v10583_v39  ;;  %v826_v46 = vld [vmem:[%s13202_s3 + $0x5f8] sm:$0xff] }
 0x244   :  { %4314 = vmatprep.mubr.bf16.mxu1 %v10344_v44  ;;  %4202 = vmatprep.subr.bf16.mxu0 %v8416_v48  ;;  %v8169_v44 = vcombine.low %v782_v49, %v786_v50  ;;  %v3786_v48 = vadd.f32 %v11044_v1, %v1156_v10  ;;  %v1077_v50 = vld [vmem:[%s13202_s3 + $0xdd0] sm:$0xff]  ;;  %v8210_v1 = vcombine.high %v822_v40, %v826_v46 }
 0x245   :  { %4284 = vmatprep.subr.bf16.mxu1 %v8162_v51  ;;  %v8464_v14 = vcombine.high %v1077_v50, %v1081_v61  ;;  %v1109_v10 = vld [vmem:[%s13202_s3 + $0xed0] sm:$0xff] }
 0x246   :  { %4285 = vmatpush1.bf16.msra.mxu1 %v8161_v55 }
 0x247   :  { %4203 = vmatpush1.bf16.msra.mxu0 %v8415_v58  ;;  %4286 = vmatprep.subr.bf16.mxu1 %v8170_v59  ;;  %v8455_v59 = vcombine.low %v1069_v31, %v1073_v32  ;;  %v1113_v31 = vld [vmem:[%s13202_s3 + $0xef0] sm:$0xff]  ;;  %v8233_v32 = vcombine.low %v846_v45, %v850_v22  ;;  %v894_v22 = vld [vmem:[%s13202_s3 + $0x818] sm:$0xff] }
 0x248   :  { %4204 = vmatprep.subr.bf16.mxu0 %v8424_v43 }
 0x24a   :  { %4287 = vmatpush1.bf16.msra.mxu1 %v8169_v44  ;;  %v1089_v44 = vld [vmem:[%s13202_s3 + $0xe30] sm:$0xff] }
 0x24b   :  { %4205 = vmatpush1.bf16.msra.mxu0 %v8423_v0  ;;  %4288 = vmatprep.subr.bf16.mxu1 %v8178_v3  ;;  %v8209_v0 = vcombine.low %v822_v40, %v826_v46  ;;  %v8463_v3 = vcombine.low %v1077_v50, %v1081_v61  ;;  %v8472_v52 = vcombine.high %v1085_v63, %v1089_v44  ;;  %v1117_v40 = vld [vmem:[%s13202_s3 + $0xf10] sm:$0xff] }
 0x24c   :  { %4206 = vmatprep.subr.bf16.mxu0 %v8432_v4  ;;  %v8218_v4 = vcombine.high %v830_v60, %v834_v62  ;;  %v1121_v46 = vld [vmem:[%s13202_s3 + $0xf30] sm:$0xff] }
 0x24d   :  { %v8504_v61 = vcombine.high %v1117_v40, %v1121_v46 }
 0x24e   :  { %4289 = vmatpush1.bf16.msra.mxu1 %v8177_v9  ;;  %v1097_v9 = vld [vmem:[%s13202_s3 + $0xe70] sm:$0xff] }
 0x24f   :  { %4207 = vmatpush1.bf16.msra.mxu0 %v8431_v11  ;;  %4290 = vmatprep.subr.bf16.mxu1 %v8186_v12  ;;  %v8217_v11 = vcombine.low %v830_v60, %v834_v62  ;;  %v8471_v12 = vcombine.low %v1085_v63, %v1089_v44  ;;  %v8480_v42 = vcombine.high %v1093_v7, %v1097_v9  ;;  %v878_v62 = vld [vmem:[%s13202_s3 + $0x798] sm:$0xff]  ;;  %v1133_v44 = vld [vmem:[%s13202_s3 + $0xf90] sm:$0xff] }
 0x250   :  { %4208 = vmatprep.subr.bf16.mxu0 %v8440_v19  ;;  %v8226_v19 = vcombine.high %v838_v5, %v842_v6  ;;  %v882_v63 = vld [vmem:[%s13202_s3 + $0x7b8] sm:$0xff] }
 0x252   :  { %4291 = vmatpush1.bf16.msra.mxu1 %v8185_v24  ;;  %v1105_v24 = vld [vmem:[%s13202_s3 + $0xeb0] sm:$0xff] }
 0x253   :  { %4209 = vmatpush1.bf16.msra.mxu0 %v8439_v25  ;;  %4292 = vmatprep.subr.bf16.mxu1 %v8194_v26  ;;  %v8225_v25 = vcombine.low %v838_v5, %v842_v6  ;;  %v8479_v26 = vcombine.low %v1093_v7, %v1097_v9  ;;  %v886_v6 = vld [vmem:[%s13202_s3 + $0x7d8] sm:$0xff]  ;;  %v1141_v9 = vld [vmem:[%s13202_s3 + $0xfd0] sm:$0xff] }
 0x254   :  { %4210 = vmatprep.subr.bf16.mxu0 %v8448_v29  ;;  %v3906_v49 = vpop.f32.mrb[8].mxu0  ;;  %v8488_v29 = vcombine.high %v1101_v23, %v1105_v24  ;;  %v890_v7 = vld [vmem:[%s13202_s3 + $0x7f8] sm:$0xff] }
 0x255   :  { %v11455_v51 = vadd.f32 %v3906_v49, %v3784_v37  ;;  %v3908_v53 = vpop.f32.mrb[9].mxu0  ;;  %v862_v37 = vld [vmem:[%s13202_s3 + $0x718] sm:$0xff]  ;;  %v8495_v49 = vcombine.low %v1109_v10, %v1113_v31 }
 0x256   :  { %4293 = vmatpush1.bf16.msra.mxu1 %v8193_v33  ;;  %v11457_v55 = vadd.f32 %v3908_v53, %v3786_v48  ;;  %v3910_v58 = vpop.f32.mrb[10].mxu0  ;;  %v8487_v33 = vcombine.low %v1101_v23, %v1105_v24  ;;  %v8241_v48 = vcombine.low %v854_v56, %v858_v30  ;;  %v870_v53 = vld [vmem:[%s13202_s3 + $0x758] sm:$0xff]  ;;  %v8273_v24 = vcombine.low %v886_v6, %v890_v7 }
 0x257   :  { %4211 = vmatpush1.bf16.msra.mxu0 %v8447_v35  ;;  %4294 = vmatprep.subr.bf16.mxu1 %v8202_v36  ;;  %v3911_v43 = vpop.f32.mrb[11].mxu0  ;;  %v8242_v35 = vcombine.high %v854_v56, %v858_v30  ;;  %v8496_v36 = vcombine.high %v1109_v10, %v1113_v31  ;;  %v1125_v58 = vld [vmem:[%s13202_s3 + $0xf50] sm:$0xff]  ;;  %v898_v23 = vld [vmem:[%s13202_s3 + $0x838] sm:$0xff] }
 0x258   :  { %4212 = vmatprep.subr.bf16.mxu0 %v8456_v38  ;;  %v866_v38 = vld [vmem:[%s13202_s3 + $0x738] sm:$0xff]  ;;  %v8503_v43 = vcombine.low %v1117_v40, %v1121_v46  ;;  %v4406_v30 = vmax.f32 %v11457_v55, 0.0  ;;  %v8281_v10 = vcombine.low %v894_v22, %v898_v23 }
 0x259   :  { %v8250_v50 = vcombine.high %v862_v37, %v866_v38  ;;  %v906_v56 = vld [vmem:[%s13202_s3 + $0x878] sm:$0xff] }
 0x25a   :  { %4295 = vmatpush1.bf16.msra.mxu1 %v8201_v54  ;;  %v874_v54 = vld [vmem:[%s13202_s3 + $0x778] sm:$0xff] }
 0x25b   :  { %4213 = vmatpush1.bf16.msra.mxu0 %v8455_v59  ;;  %4296 = vmatprep.subr.bf16.mxu1 %v8210_v1  ;;  %v1129_v59 = vld [vmem:[%s13202_s3 + $0xf70] sm:$0xff]  ;;  %v8249_v1 = vcombine.low %v862_v37, %v866_v38  ;;  %v9165_v31 = vld [vmem:[%s13204_s5] ss:$28 sps:$4 sm:$0xff]  }
 0x25c   :  { %4214 = vmatprep.subr.bf16.mxu0 %v8464_v14  ;;  %v8258_v14 = vcombine.high %v870_v53, %v874_v54  ;;  %v8512_v60 = vcombine.high %v1125_v58, %v1129_v59  ;;  %v9170_v55 = vld [vmem:[%s13204_s5 + $0x3c] ss:$28 sps:$4 sm:$0xff]  }
 0x25d   :  { %v9168_v38 = vld [vmem:[%s13204_s5 + $0x38] ss:$28 sps:$4 sm:$0xff]  }
 0x25e   :  { %4297 = vmatpush1.bf16.msra.mxu1 %v8209_v0  ;;  %v1137_v0 = vld [vmem:[%s13202_s3 + $0xfb0] sm:$0xff]  ;;  %v918_v46 = vld [vmem:[%s13202_s3 + $0x8d8] sm:$0xff] }
 0x25f   :  { %4215 = vmatpush1.bf16.msra.mxu0 %v8463_v3  ;;  %4298 = vmatprep.subr.bf16.mxu1 %v8218_v4  ;;  %v8257_v3 = vcombine.low %v870_v53, %v874_v54  ;;  %v8511_v4 = vcombine.low %v1125_v58, %v1129_v59  ;;  %v8520_v5 = vcombine.high %v1133_v44, %v1137_v0  ;;  %v926_v53 = vld [vmem:[%s13202_s3 + $0x918] sm:$0xff]  ;;  %v9174_v59 = vld [vmem:[%s13204_s5 + $0xa8] ss:$28 sps:$4 sm:$0xff]  }
 0x260   :  { %4216 = vmatprep.subr.bf16.mxu0 %v8472_v52  ;;  %v8266_v52 = vcombine.high %v878_v62, %v882_v63  ;;  %v930_v54 = vld [vmem:[%s13202_s3 + $0x938] sm:$0xff] }
 0x262   :  { %4299 = vmatpush1.bf16.msra.mxu1 %v8217_v11  ;;  %v1145_v11 = vld [vmem:[%s13202_s3 + $0xff0] sm:$0xff] }
 0x263   :  { %4217 = vmatpush1.bf16.msra.mxu0 %v8471_v12  ;;  %4300 = vmatprep.subr.bf16.mxu1 %v8226_v19  ;;  %v8265_v12 = vcombine.low %v878_v62, %v882_v63  ;;  %v8519_v19 = vcombine.low %v1133_v44, %v1137_v0  ;;  %v8528_v45 = vcombine.high %v1141_v9, %v1145_v11  ;;  %v9177_v63 = vld [vmem:[%s13204_s5 + $0xe0] ss:$28 sps:$4 sm:$0xff]  }
 0x264   :  { %4218 = vmatprep.subr.bf16.mxu0 %v8480_v42  ;;  %v8274_v42 = vcombine.high %v886_v6, %v890_v7  ;;  %v8313_v62 = vcombine.low %v926_v53, %v930_v54  ;;  %v9182_v0 = vld [vmem:[%s13204_s5 + $0x11c] ss:$28 sps:$4 sm:$0xff]   ;;  %v9185_v7 = vld [vmem:[%s13204_s5 + $0x154] ss:$28 sps:$4 sm:$0xff]  }
 0x266   :  { %4301 = vmatpush1.bf16.msra.mxu1 %v8225_v25  ;;  %v8527_v25 = vcombine.low %v1141_v9, %v1145_v11  ;;  %v950_v9 = vld [vmem:[%s13202_s3 + $0x9d8] sm:$0xff] }
 0x267   :  { %4219 = vmatpush1.bf16.msra.mxu0 %v8479_v26  ;;  %4302 = vmatprep.subr.bf16.mxu1 %v8234_v27  ;;  %v8282_v26 = vcombine.high %v894_v22, %v898_v23  ;;  %v9167_v27 = vld [vmem:[%s13204_s5 + $0x4] ss:$28 sps:$4 sm:$0xff]   ;;  %v954_v11 = vld [vmem:[%s13202_s3 + $0x9f8] sm:$0xff] }
 0x268   :  { %4220 = vmatprep.subr.bf16.mxu0 %v8488_v29  ;;  %v902_v29 = vld [vmem:[%s13202_s3 + $0x858] sm:$0xff] }
 0x269   :  { %v8289_v37 = vcombine.low %v902_v29, %v906_v56  ;;  %v958_v22 = vld [vmem:[%s13202_s3 + $0xa18] sm:$0xff] }
 0x26a   :  { %4303 = vmatpush1.bf16.msra.mxu1 %v8233_v32  ;;  %v8290_v32 = vcombine.high %v902_v29, %v906_v56  ;;  %v962_v23 = vld [vmem:[%s13202_s3 + $0xa38] sm:$0xff] }
 0x26b   :  { %4221 = vmatpush1.bf16.msra.mxu0 %v8487_v33  ;;  %4304 = vmatprep.subr.bf16.mxu1 %v8242_v35  ;;  %v910_v33 = vld [vmem:[%s13202_s3 + $0x898] sm:$0xff] }
 0x26c   :  { %4222 = vmatprep.subr.bf16.mxu0 %v8496_v36  ;;  %v914_v35 = vld [vmem:[%s13202_s3 + $0x8b8] sm:$0xff]  ;;  %v11584_v36 = vpack.c.bf16 %v4406_v30, %v4406_v30  ;;  %v8345_v30 = vcombine.low %v958_v22, %v962_v23 }
 0x26d   :  { %v8298_v40 = vcombine.high %v910_v33, %v914_v35  ;;  %v966_v29 = vld [vmem:[%s13202_s3 + $0xa58] sm:$0xff] }
 0x26e   :  { %4305 = vmatpush1.bf16.msra.mxu1 %v8241_v48  ;;  %v8297_v48 = vcombine.low %v910_v33, %v914_v35  ;;  %v970_v56 = vld [vmem:[%s13202_s3 + $0xa78] sm:$0xff] }
 0x26f   :  { %4223 = vmatpush1.bf16.msra.mxu0 %v8495_v49  ;;  %4306 = vmatprep.subr.bf16.mxu1 %v8250_v50  ;;  %v9171_v49 = vld [vmem:[%s13204_s5 + $0x70] ss:$28 sps:$4 sm:$0xff]   ;;  %v974_v33 = vld [vmem:[%s13202_s3 + $0xa98] sm:$0xff] }
 0x270   :  { %4224 = vmatprep.subr.bf16.mxu0 %v8504_v61  ;;  %v9176_v61 = vld [vmem:[%s13204_s5 + $0xac] ss:$28 sps:$4 sm:$0xff]   ;;  %v978_v35 = vld [vmem:[%s13202_s3 + $0xab8] sm:$0xff] }
 0x272   :  { %4307 = vmatpush1.bf16.msra.mxu1 %v8249_v1  ;;  %v8314_v1 = vcombine.high %v926_v53, %v930_v54  ;;  %v994_v53 = vld [vmem:[%s13202_s3 + $0xb38] sm:$0xff] }
 0x273   :  { %4225 = vmatpush1.bf16.msra.mxu0 %v8503_v43  ;;  %4308 = vmatprep.subr.bf16.mxu1 %v8258_v14  ;;  %v9179_v43 = vld [vmem:[%s13204_s5 + $0xe4] ss:$28 sps:$4 sm:$0xff]   ;;  %v934_v14 = vld [vmem:[%s13202_s3 + $0x958] sm:$0xff] }
 0x274   :  { %4226 = vmatprep.subr.bf16.mxu0 %v8512_v60  ;;  %v938_v60 = vld [vmem:[%s13202_s3 + $0x978] sm:$0xff] }
 0x275   :  { %v8322_v44 = vcombine.high %v934_v14, %v938_v60 }
 0x276   :  { %4309 = vmatpush1.bf16.msra.mxu1 %v8257_v3  ;;  %v942_v3 = vld [vmem:[%s13202_s3 + $0x998] sm:$0xff] }
 0x277   :  { %4227 = vmatpush1.bf16.msra.mxu0 %v8511_v4  ;;  %4310 = vmatprep.subr.bf16.mxu1 %v8266_v52  ;;  %v946_v4 = vld [vmem:[%s13202_s3 + $0x9b8] sm:$0xff]  ;;  %v8321_v52 = vcombine.low %v934_v14, %v938_v60 }
 0x278   :  { %4228 = vmatprep.subr.bf16.mxu0 %v8520_v5  ;;  %v9180_v5 = vld [vmem:[%s13204_s5 + $0x118] ss:$28 sps:$4 sm:$0xff]   ;;  %v8330_v6 = vcombine.high %v942_v3, %v946_v4 }
 0x279   :  { %v1002_v14 = vld [vmem:[%s13202_s3 + $0xb78] sm:$0xff] }
 0x27a   :  { %4311 = vmatpush1.bf16.msra.mxu1 %v8265_v12  ;;  %v8329_v12 = vcombine.low %v942_v3, %v946_v4  ;;  %v1010_v3 = vld [vmem:[%s13202_s3 + $0xbb8] sm:$0xff] }
 0x27b   :  { %4229 = vmatpush1.bf16.msra.mxu0 %v8519_v19  ;;  %4312 = vmatprep.subr.bf16.mxu1 %v8274_v42  ;;  %v9183_v19 = vld [vmem:[%s13204_s5 + $0x150] ss:$28 sps:$4 sm:$0xff]   ;;  %v8338_v42 = vcombine.high %v950_v9, %v954_v11 }
 0x27c   :  { %4230 = vmatprep.subr.bf16.mxu0 %v8528_v45  ;;  %v9188_v45 = vld [vmem:[%s13204_s5 + $0x18c] ss:$28 sps:$4 sm:$0xff]  }
 0x27e   :  { %4313 = vmatpush1.bf16.msra.mxu1 %v8273_v24  ;;  %v8337_v24 = vcombine.low %v950_v9, %v954_v11  ;;  %v1018_v9 = vld [vmem:[%s13202_s3 + $0xbf8] sm:$0xff] }
 0x27f   :  { %4231 = vmatpush1.bf16.msra.mxu0 %v8527_v25  ;;  %4323 = vmatprep.subr.bf16.mxu1 %v8282_v26  ;;  %v9186_v25 = vld [vmem:[%s13204_s5 + $0x188] ss:$28 sps:$4 sm:$0xff]   ;;  %v8346_v26 = vcombine.high %v958_v22, %v962_v23  ;;  %v1026_v22 = vld [vmem:[%s13202_s3 + $0xc38] sm:$0xff] }
 0x280   :  { %7274 = vmatprep.subr.bf16.mxu0 %v9167_v27  ;;  %v9191_v27 = vld [vmem:[%s13204_s5 + $0x1c4] ss:$28 sps:$4 sm:$0xff]  }
 0x281   :  { %4315 = vmatmul.mubr.bf16.vlgmr.msra.gmra.mrb[16].mxu1 %v10338_v41  ;;  %v9173_v41 = vld [vmem:[%s13204_s5 + $0x74] ss:$28 sps:$4 sm:$0xff]  }
 0x282   :  { %4233 = vmatmul.mubr.bf16.vlgmr.msra.gmra.mrb[12].mxu0 %v10768_v20  ;;  %4324 = vmatpush1.bf16.msra.mxu1 %v8281_v10  ;;  %v9189_v10 = vld [vmem:[%s13204_s5 + $0x1c0] ss:$28 sps:$4 sm:$0xff]  }
 0x283   :  { %4355 = vmatprep.mubr.bf16.mxu1 %v10458_v2  ;;  %7275 = vmatpush1.bf16.msra.mxu0 %v9165_v31  ;;  %v922_v2 = vld [vmem:[%s13202_s3 + $0x8f8] sm:$0xff]  ;;  %v8354_v31 = vcombine.high %v966_v29, %v970_v56 }
 0x284   :  { %7306 = vmatprep.mubr.bf16.mxu0 %v11584_v36  ;;  %4325 = vmatprep.subr.bf16.mxu1 %v8290_v32  ;;  %v8306_v50 = vcombine.high %v918_v46, %v922_v2  ;;  %v8305_v58 = vcombine.low %v918_v46, %v922_v2  ;;  %v9194_v32 = vld [vmem:[%s13204_s5 + $0x1fc] ss:$28 sps:$4 sm:$0xff]   ;;  %v8361_v2 = vcombine.low %v974_v33, %v978_v35 }
 0x285   :  { %7276 = vmatprep.subr.bf16.mxu0 %v9170_v55  ;;  %v8353_v55 = vcombine.low %v966_v29, %v970_v56  ;;  %v986_v46 = vld [vmem:[%s13202_s3 + $0xaf8] sm:$0xff] }
 0x286   :  { %4326 = vmatpush1.bf16.msra.mxu1 %v8289_v37  ;;  %v9192_v37 = vld [vmem:[%s13204_s5 + $0x1f8] ss:$28 sps:$4 sm:$0xff]  }
 0x287   :  { %7277 = vmatpush1.bf16.msra.mxu0 %v9168_v38  ;;  %4327 = vmatprep.subr.bf16.mxu1 %v8298_v40  ;;  %v8362_v38 = vcombine.high %v974_v33, %v978_v35  ;;  %v9197_v40 = vld [vmem:[%s13204_s5 + $0x234] ss:$28 sps:$4 sm:$0xff]   ;;  %v1030_v29 = vld [vmem:[%s13202_s3 + $0xc58] sm:$0xff] }
 0x288   :  { %7278 = vmatprep.subr.bf16.mxu0 %v9173_v41  ;;  %v982_v41 = vld [vmem:[%s13202_s3 + $0xad8] sm:$0xff] }
 0x289   :  { %v8369_v54 = vcombine.low %v982_v41, %v986_v46  ;;  %v1034_v56 = vld [vmem:[%s13202_s3 + $0xc78] sm:$0xff] }
 0x28a   :  { %4328 = vmatpush1.bf16.msra.mxu1 %v8297_v48  ;;  %v9195_v48 = vld [vmem:[%s13204_s5 + $0x230] ss:$28 sps:$4 sm:$0xff]   ;;  %v1038_v33 = vld [vmem:[%s13202_s3 + $0xc98] sm:$0xff] }
 0x28b   :  { %7279 = vmatpush1.bf16.msra.mxu0 %v9171_v49  ;;  %4329 = vmatprep.subr.bf16.mxu1 %v8306_v50  ;;  %v8370_v49 = vcombine.high %v982_v41, %v986_v46  ;;  %v9200_v50 = vld [vmem:[%s13204_s5 + $0x26c] ss:$28 sps:$4 sm:$0xff]   ;;  %v1042_v35 = vld [vmem:[%s13202_s3 + $0xcb8] sm:$0xff] }
 0x28c   :  { %7280 = vmatprep.subr.bf16.mxu0 %v9176_v61  ;;  %v990_v61 = vld [vmem:[%s13202_s3 + $0xb18] sm:$0xff]  ;;  %v8425_v41 = vcombine.low %v1038_v33, %v1042_v35  ;;  %v9219_v46 = vld [vmem:[%s13204_s5 + $0x3f0] ss:$28 sps:$4 sm:$0xff]  }
 0x28d   :  { %v8377_v60 = vcombine.low %v990_v61, %v994_v53 }
 0x28e   :  { %4330 = vmatpush1.bf16.msra.mxu1 %v8305_v58  ;;  %v9198_v58 = vld [vmem:[%s13204_s5 + $0x268] ss:$28 sps:$4 sm:$0xff]  }
 0x28f   :  { %7281 = vmatpush1.bf16.msra.mxu0 %v9174_v59  ;;  %4331 = vmatprep.subr.bf16.mxu1 %v8314_v1  ;;  %v8378_v59 = vcombine.high %v990_v61, %v994_v53  ;;  %v9203_v1 = vld [vmem:[%s13204_s5 + $0x2a4] ss:$28 sps:$4 sm:$0xff]  }
 0x290   :  { %7282 = vmatprep.subr.bf16.mxu0 %v9179_v43  ;;  %v998_v43 = vld [vmem:[%s13202_s3 + $0xb58] sm:$0xff]  ;;  %v9222_v53 = vld [vmem:[%s13204_s5 + $0x428] ss:$28 sps:$4 sm:$0xff]  }
 0x291   :  { %v8385_v4 = vcombine.low %v998_v43, %v1002_v14 }
 0x292   :  { %4332 = vmatpush1.bf16.msra.mxu1 %v8313_v62  ;;  %v9201_v62 = vld [vmem:[%s13204_s5 + $0x2a0] ss:$28 sps:$4 sm:$0xff]  }
 0x293   :  { %7283 = vmatpush1.bf16.msra.mxu0 %v9177_v63  ;;  %4333 = vmatprep.subr.bf16.mxu1 %v8322_v44  ;;  %v8386_v63 = vcombine.high %v998_v43, %v1002_v14  ;;  %v9206_v44 = vld [vmem:[%s13204_s5 + $0x2dc] ss:$28 sps:$4 sm:$0xff]  }
 0x294   :  { %7284 = vmatprep.subr.bf16.mxu0 %v9182_v0  ;;  %v1006_v0 = vld [vmem:[%s13202_s3 + $0xb98] sm:$0xff] }
 0x295   :  { %v8393_v11 = vcombine.low %v1006_v0, %v1010_v3  ;;  %v9225_v14 = vld [vmem:[%s13204_s5 + $0x460] ss:$28 sps:$4 sm:$0xff]  }
 0x296   :  { %4334 = vmatpush1.bf16.msra.mxu1 %v8321_v52  ;;  %v9204_v52 = vld [vmem:[%s13204_s5 + $0x2d8] ss:$28 sps:$4 sm:$0xff]  }
 0x297   :  { %7285 = vmatpush1.bf16.msra.mxu0 %v9180_v5  ;;  %4335 = vmatprep.subr.bf16.mxu1 %v8330_v6  ;;  %v8394_v5 = vcombine.high %v1006_v0, %v1010_v3  ;;  %v9209_v6 = vld [vmem:[%s13204_s5 + $0x314] ss:$28 sps:$4 sm:$0xff]   ;;  %v1164_v0 = vrot.slane %v11417_v21, %v10316_v18 }
 0x298   :  { %7286 = vmatprep.subr.bf16.mxu0 %v9185_v7  ;;  %v1014_v7 = vld [vmem:[%s13202_s3 + $0xbd8] sm:$0xff] }
 0x299   :  { %v8401_v23 = vcombine.low %v1014_v7, %v1018_v9 }
 0x29a   :  { %4336 = vmatpush1.bf16.msra.mxu1 %v8329_v12  ;;  %v9207_v12 = vld [vmem:[%s13204_s5 + $0x310] ss:$28 sps:$4 sm:$0xff]  }
 0x29b   :  { %7287 = vmatpush1.bf16.msra.mxu0 %v9183_v19  ;;  %4337 = vmatprep.subr.bf16.mxu1 %v8338_v42  ;;  %v8402_v19 = vcombine.high %v1014_v7, %v1018_v9  ;;  %v9212_v42 = vld [vmem:[%s13204_s5 + $0x34c] ss:$28 sps:$4 sm:$0xff]   ;;  %v1078_v7 = vld [vmem:[%s13202_s3 + $0xdd8] sm:$0xff] }
 0x29c   :  { %7288 = vmatprep.subr.bf16.mxu0 %v9188_v45  ;;  %v1022_v45 = vld [vmem:[%s13202_s3 + $0xc18] sm:$0xff] }
 0x29d   :  { %v1082_v9 = vld [vmem:[%s13202_s3 + $0xdf8] sm:$0xff] }
 0x29e   :  { %4338 = vmatpush1.bf16.msra.mxu1 %v8337_v24  ;;  %v9210_v24 = vld [vmem:[%s13204_s5 + $0x348] ss:$28 sps:$4 sm:$0xff]  }
 0x29f   :  { %7289 = vmatpush1.bf16.msra.mxu0 %v9186_v25  ;;  %4339 = vmatprep.subr.bf16.mxu1 %v8346_v26  ;;  %v8410_v25 = vcombine.high %v1022_v45, %v1026_v22  ;;  %v4405_v26 = vmax.f32 %v11455_v51, 0.0  ;;  %v9213_v51 = vld [vmem:[%s13204_s5 + $0x380] ss:$28 sps:$4 sm:$0xff]  }
 0x2a0   :  { %7290 = vmatprep.subr.bf16.mxu0 %v9191_v27  ;;  %v9215_v27 = vld [vmem:[%s13204_s5 + $0x384] ss:$28 sps:$4 sm:$0xff]  }
 0x2a2   :  { %4340 = vmatpush1.bf16.msra.mxu1 %v8345_v30  ;;  %v8409_v30 = vcombine.low %v1022_v45, %v1026_v22  ;;  %v9231_v22 = vld [vmem:[%s13204_s5 + $0x4d0] ss:$28 sps:$4 sm:$0xff]  }
 0x2a3   :  { %7291 = vmatpush1.bf16.msra.mxu0 %v9189_v10  ;;  %4341 = vmatprep.subr.bf16.mxu1 %v8354_v31  ;;  %v11773_v10 = vpack.c.bf16 %v4405_v26, %v4405_v26  ;;  %v8418_v31 = vcombine.high %v1030_v29, %v1034_v56  ;;  %v1086_v26 = vld [vmem:[%s13202_s3 + $0xe18] sm:$0xff] }
 0x2a4   :  { %7292 = vmatprep.subr.bf16.mxu0 %v9194_v32  ;;  %v9218_v32 = vld [vmem:[%s13204_s5 + $0x3bc] ss:$28 sps:$4 sm:$0xff]  }
 0x2a6   :  { %4342 = vmatpush1.bf16.msra.mxu1 %v8353_v55  ;;  %v8417_v55 = vcombine.low %v1030_v29, %v1034_v56  ;;  %v8465_v56 = vcombine.low %v1078_v7, %v1082_v9 }
 0x2a7   :  { %7293 = vmatpush1.bf16.msra.mxu0 %v9192_v37  ;;  %4343 = vmatprep.subr.bf16.mxu1 %v8362_v38  ;;  %v9216_v37 = vld [vmem:[%s13204_s5 + $0x3b8] ss:$28 sps:$4 sm:$0xff]   ;;  %v8426_v38 = vcombine.high %v1038_v33, %v1042_v35 }
 0x2a8   :  { %7294 = vmatprep.subr.bf16.mxu0 %v9197_v40  ;;  %v9221_v40 = vld [vmem:[%s13204_s5 + $0x3f4] ss:$28 sps:$4 sm:$0xff]   ;;  %v1098_v33 = vld [vmem:[%s13202_s3 + $0xe78] sm:$0xff] }
 0x2aa   :  { %4344 = vmatpush1.bf16.msra.mxu1 %v8361_v2 }
 0x2ab   :  { %7295 = vmatpush1.bf16.msra.mxu0 %v9195_v48  ;;  %4345 = vmatprep.subr.bf16.mxu1 %v8370_v49  ;;  %v9224_v48 = vld [vmem:[%s13204_s5 + $0x42c] ss:$28 sps:$4 sm:$0xff]   ;;  %v1054_v49 = vld [vmem:[%s13202_s3 + $0xd18] sm:$0xff] }
 0x2ac   :  { %7296 = vmatprep.subr.bf16.mxu0 %v9200_v50  ;;  %v1058_v50 = vld [vmem:[%s13202_s3 + $0xd38] sm:$0xff] }
 0x2ad   :  { %v8441_v43 = vcombine.low %v1054_v49, %v1058_v50 }
 0x2ae   :  { %4346 = vmatpush1.bf16.msra.mxu1 %v8369_v54  ;;  %v8442_v54 = vcombine.high %v1054_v49, %v1058_v50  ;;  %v1114_v49 = vld [vmem:[%s13202_s3 + $0xef8] sm:$0xff] }
 0x2af   :  { %7297 = vmatpush1.bf16.msra.mxu0 %v9198_v58  ;;  %4347 = vmatprep.subr.bf16.mxu1 %v8378_v59  ;;  %v9227_v58 = vld [vmem:[%s13204_s5 + $0x464] ss:$28 sps:$4 sm:$0xff]   ;;  %v1062_v59 = vld [vmem:[%s13202_s3 + $0xd58] sm:$0xff] }
 0x2b0   :  { %7298 = vmatprep.subr.bf16.mxu0 %v9203_v1  ;;  %v1066_v1 = vld [vmem:[%s13202_s3 + $0xd78] sm:$0xff] }
 0x2b1   :  { %v8449_v3 = vcombine.low %v1062_v59, %v1066_v1 }
 0x2b2   :  { %4348 = vmatpush1.bf16.msra.mxu1 %v8377_v60  ;;  %v8450_v60 = vcombine.high %v1062_v59, %v1066_v1  ;;  %v1122_v59 = vld [vmem:[%s13202_s3 + $0xf38] sm:$0xff] }
 0x2b3   :  { %7299 = vmatpush1.bf16.msra.mxu0 %v9201_v62  ;;  %4349 = vmatprep.subr.bf16.mxu1 %v8386_v63  ;;  %v9230_v62 = vld [vmem:[%s13204_s5 + $0x49c] ss:$28 sps:$4 sm:$0xff]  }
 0x2b4   :  { %7300 = vmatprep.subr.bf16.mxu0 %v9206_v44  ;;  %v1070_v63 = vld [vmem:[%s13202_s3 + $0xd98] sm:$0xff] }
 0x2b5   :  { %v1074_v44 = vld [vmem:[%s13202_s3 + $0xdb8] sm:$0xff] }
 0x2b6   :  { %4350 = vmatpush1.bf16.msra.mxu1 %v8385_v4  ;;  %v9228_v4 = vld [vmem:[%s13204_s5 + $0x498] ss:$28 sps:$4 sm:$0xff]  }
 0x2b7   :  { %7301 = vmatpush1.bf16.msra.mxu0 %v9204_v52  ;;  %4351 = vmatprep.subr.bf16.mxu1 %v8394_v5  ;;  %v8458_v52 = vcombine.high %v1070_v63, %v1074_v44 }
 0x2b8   :  { %7302 = vmatprep.subr.bf16.mxu0 %v9209_v6  ;;  %v9233_v6 = vld [vmem:[%s13204_s5 + $0x4d4] ss:$28 sps:$4 sm:$0xff]  }
 0x2ba   :  { %4352 = vmatpush1.bf16.msra.mxu1 %v8393_v11 }
 0x2bb   :  { %7303 = vmatpush1.bf16.msra.mxu0 %v9207_v12  ;;  %4353 = vmatprep.subr.bf16.mxu1 %v8402_v19 }
 0x2bc   :  { %7304 = vmatprep.subr.bf16.mxu0 %v9212_v42  ;;  %v8457_v42 = vcombine.low %v1070_v63, %v1074_v44  ;;  %v1130_v63 = vld [vmem:[%s13202_s3 + $0xf78] sm:$0xff] }
 0x2be   :  { %4354 = vmatpush1.bf16.msra.mxu1 %v8401_v23  ;;  %v8466_v23 = vcombine.high %v1078_v7, %v1082_v9  ;;  %v9252_v9 = vld [vmem:[%s13204_s5 + $0x658] ss:$28 sps:$4 sm:$0xff]  }
 0x2bf   :  { %7305 = vmatpush1.bf16.msra.mxu0 %v9210_v24  ;;  %4364 = vmatprep.subr.bf16.mxu1 %v8410_v25  ;;  %v9236_v25 = vld [vmem:[%s13204_s5 + $0x50c] ss:$28 sps:$4 sm:$0xff]  }
 0x2c0   :  { %7315 = vmatprep.subr.bf16.mxu0 %v9215_v27  ;;  %v1090_v27 = vld [vmem:[%s13202_s3 + $0xe38] sm:$0xff] }
 0x2c1   :  { %4356 = vmatmul.mubr.bf16.vlgmr.msra.gmra.mrb[16].mxu1 %v10568_v8  ;;  %v1046_v8 = vld [vmem:[%s13202_s3 + $0xcd8] sm:$0xff]  ;;  %v8473_v35 = vcombine.low %v1086_v26, %v1090_v27 }
 0x2c2   :  { %7307 = vmatmul.mubr.bf16.vlgmr.msra.gmra.mrb[16].mxu0 %v11773_v10  ;;  %4365 = vmatpush1.bf16.msra.mxu1 %v8409_v30  ;;  %v9234_v30 = vld [vmem:[%s13204_s5 + $0x508] ss:$28 sps:$4 sm:$0xff]  }
 0x2c3   :  { %4396 = vmatprep.mubr.bf16.mxu1 %v10583_v39  ;;  %7316 = vmatpush1.bf16.msra.mxu0 %v9213_v51  ;;  %v1050_v39 = vld [vmem:[%s13202_s3 + $0xcf8] sm:$0xff]  ;;  %v8474_v51 = vcombine.high %v1086_v26, %v1090_v27  ;;  %v9258_v27 = vld [vmem:[%s13204_s5 + $0x6c8] ss:$28 sps:$4 sm:$0xff]  }
 0x2c4   :  { %4366 = vmatprep.subr.bf16.mxu1 %v8418_v31  ;;  %7317 = vmatprep.subr.bf16.mxu0 %v9218_v32  ;;  %v8434_v2 = vcombine.high %v1046_v8, %v1050_v39  ;;  %v8433_v61 = vcombine.low %v1046_v8, %v1050_v39  ;;  %v9239_v31 = vld [vmem:[%s13204_s5 + $0x544] ss:$28 sps:$4 sm:$0xff]   ;;  %v1094_v32 = vld [vmem:[%s13202_s3 + $0xe58] sm:$0xff] }
 0x2c5   :  { %v1106_v8 = vld [vmem:[%s13202_s3 + $0xeb8] sm:$0xff]  ;;  %v8481_v39 = vcombine.low %v1094_v32, %v1098_v33 }
 0x2c6   :  { %4367 = vmatpush1.bf16.msra.mxu1 %v8417_v55  ;;  %v9237_v55 = vld [vmem:[%s13204_s5 + $0x540] ss:$28 sps:$4 sm:$0xff]  }
 0x2c7   :  { %7318 = vmatpush1.bf16.msra.mxu0 %v9216_v37  ;;  %4368 = vmatprep.subr.bf16.mxu1 %v8426_v38  ;;  %v8482_v37 = vcombine.high %v1094_v32, %v1098_v33  ;;  %v9242_v38 = vld [vmem:[%s13204_s5 + $0x57c] ss:$28 sps:$4 sm:$0xff]  }
 0x2c8   :  { %7319 = vmatprep.subr.bf16.mxu0 %v9221_v40  ;;  %v1102_v40 = vld [vmem:[%s13202_s3 + $0xe98] sm:$0xff] }
 0x2c9   :  { %v8489_v50 = vcombine.low %v1102_v40, %v1106_v8  ;;  %v9282_v33 = vld [vmem:[%s13204_s5 + $0x700] ss:$28 sps:$4 sm:$0xff]  }
 0x2ca   :  { %4369 = vmatpush1.bf16.msra.mxu1 %v8425_v41  ;;  %v9240_v41 = vld [vmem:[%s13204_s5 + $0x578] ss:$28 sps:$4 sm:$0xff]  }
 0x2cb   :  { %7320 = vmatpush1.bf16.msra.mxu0 %v9219_v46  ;;  %4370 = vmatprep.subr.bf16.mxu1 %v8434_v2  ;;  %v8490_v46 = vcombine.high %v1102_v40, %v1106_v8  ;;  %v9245_v2 = vld [vmem:[%s13204_s5 + $0x5b4] ss:$28 sps:$4 sm:$0xff]  }
 0x2cc   :  { %7321 = vmatprep.subr.bf16.mxu0 %v9224_v48  ;;  %v1110_v48 = vld [vmem:[%s13202_s3 + $0xed8] sm:$0xff]  ;;  %v9272_v8 = vld [vmem:[%s13204_s5 + $0xb4] ss:$28 sps:$4 sm:$0xff]  }
 0x2cd   :  { %v8497_v1 = vcombine.low %v1110_v48, %v1114_v49  ;;  %v9267_v40 = vld [vmem:[%s13204_s5 + $0x78] ss:$28 sps:$4 sm:$0xff]  }
 0x2ce   :  { %4371 = vmatpush1.bf16.msra.mxu1 %v8433_v61  ;;  %v9243_v61 = vld [vmem:[%s13204_s5 + $0x5b0] ss:$28 sps:$4 sm:$0xff]  }
 0x2cf   :  { %7322 = vmatpush1.bf16.msra.mxu0 %v9222_v53  ;;  %4372 = vmatprep.subr.bf16.mxu1 %v8442_v54  ;;  %v8498_v53 = vcombine.high %v1110_v48, %v1114_v49  ;;  %v9248_v54 = vld [vmem:[%s13204_s5 + $0x5ec] ss:$28 sps:$4 sm:$0xff]   ;;  %v9308_v49 = vld [vmem:[%s13204_s5 + $0x7e4] ss:$28 sps:$4 sm:$0xff]  }
 0x2d0   :  { %7323 = vmatprep.subr.bf16.mxu0 %v9227_v58  ;;  %v1118_v58 = vld [vmem:[%s13202_s3 + $0xf18] sm:$0xff]  ;;  %v9300_v48 = vld [vmem:[%s13204_s5 + $0x7a8] ss:$28 sps:$4 sm:$0xff]  }
 0x2d1   :  { %v8505_v44 = vcombine.low %v1118_v58, %v1122_v59 }
 0x2d2   :  { %4373 = vmatpush1.bf16.msra.mxu1 %v8441_v43  ;;  %v9246_v43 = vld [vmem:[%s13204_s5 + $0x5e8] ss:$28 sps:$4 sm:$0xff]  }
 0x2d3   :  { %7324 = vmatpush1.bf16.msra.mxu0 %v9225_v14  ;;  %4374 = vmatprep.subr.bf16.mxu1 %v8450_v60  ;;  %v8506_v14 = vcombine.high %v1118_v58, %v1122_v59  ;;  %v9251_v60 = vld [vmem:[%s13204_s5 + $0x624] ss:$28 sps:$4 sm:$0xff]   ;;  %v9281_v59 = vld [vmem:[%s13204_s5 + $0x15c] ss:$28 sps:$4 sm:$0xff]  }
 0x2d4   :  { %v11840_v5 = vpop.f32.mrb[12].mxu1  ;;  %7325 = vmatprep.subr.bf16.mxu0 %v9230_v62  ;;  %v1126_v62 = vld [vmem:[%s13202_s3 + $0xf58] sm:$0xff] }
 0x2d5   :  { %v4072_v11 = vpop.f32.mrb[13].mxu1  ;;  %v8513_v7 = vcombine.low %v1126_v62, %v1130_v63  ;;  %v9276_v58 = vld [vmem:[%s13204_s5 + $0x120] ss:$28 sps:$4 sm:$0xff]  }
 0x2d6   :  { %v9072_v12 = vadd.f32 %v4072_v11, %v1164_v0  ;;  %v4074_v19 = vpop.f32.mrb[14].mxu1  ;;  %4375 = vmatpush1.bf16.msra.mxu1 %v8449_v3  ;;  %v9249_v0 = vld [vmem:[%s13204_s5 + $0x620] ss:$28 sps:$4 sm:$0xff]   ;;  %v8514_v3 = vcombine.high %v1126_v62, %v1130_v63  ;;  %v9318_v62 = vld [vmem:[%s13204_s5 + $0x850] ss:$28 sps:$4 sm:$0xff]  }
 0x2d7   :  { %7326 = vmatpush1.bf16.msra.mxu0 %v9228_v4  ;;  %v4075_v45 = vpop.f32.mrb[15].mxu1  ;;  %4376 = vmatprep.subr.bf16.mxu1 %v8458_v52  ;;  %v9254_v4 = vld [vmem:[%s13204_s5 + $0x65c] ss:$28 sps:$4 sm:$0xff]   ;;  %v9257_v19 = vld [vmem:[%s13204_s5 + $0x694] ss:$28 sps:$4 sm:$0xff]  }
 0x2d8   :  { %v4408_v24 = vmax.f32 %v9072_v12, 0.0  ;;  %7327 = vmatprep.subr.bf16.mxu0 %v9233_v6  ;;  %v1134_v52 = vld [vmem:[%s13202_s3 + $0xf98] sm:$0xff]  ;;  %v1160_v12 = vrot.slane %v11417_v21, %v10310_v16  ;;  %v9255_v21 = vld [vmem:[%s13204_s5 + $0x690] ss:$28 sps:$4 sm:$0xff]  }
 0x2d9   :  { %v1138_v6 = vld [vmem:[%s13202_s3 + $0xfb8] sm:$0xff]  ;;  %v9326_v63 = vld [vmem:[%s13204_s5 + $0x88c] ss:$28 sps:$4 sm:$0xff]  }
 0x2da   :  { %v11863_v29 = vpack.c.bf16 %v4408_v24, %v4408_v24  ;;  %4377 = vmatpush1.bf16.msra.mxu1 %v8457_v42  ;;  %v8522_v11 = vcombine.high %v1134_v52, %v1138_v6  ;;  %v1142_v42 = vld [vmem:[%s13202_s3 + $0xfd8] sm:$0xff]  ;;  %v9071_v24 = vadd.f32 %v11840_v5, %v1160_v12  ;;  %v9284_v5 = vld [vmem:[%s13204_s5 + $0x704] ss:$28 sps:$4 sm:$0xff]  }
 0x2db   :  { %7328 = vmatpush1.bf16.msra.mxu0 %v9231_v22  ;;  %4378 = vmatprep.subr.bf16.mxu1 %v8466_v23  ;;  %v1146_v45 = vld [vmem:[%s13202_s3 + $0xff8] sm:$0xff]  ;;  %v8521_v22 = vcombine.low %v1134_v52, %v1138_v6  ;;  %v9291_v52 = vld [vmem:[%s13204_s5 + $0x1c8] ss:$28 sps:$4 sm:$0xff]  }
 0x2dc   :  { %7347 = vmatprep.mubr.bf16.mxu0 %v11863_v29  ;;  %7329 = vmatprep.subr.bf16.mxu0 %v9236_v25  ;;  %v8530_v23 = vcombine.high %v1142_v42, %v1146_v45  ;;  %v9260_v25 = vld [vmem:[%s13204_s5 + $0x6cc] ss:$28 sps:$4 sm:$0xff]   ;;  %v8529_v26 = vcombine.low %v1142_v42, %v1146_v45  ;;  %v9299_v6 = vld [vmem:[%s13204_s5 + $0x204] ss:$28 sps:$4 sm:$0xff]   ;;  %v9305_v12 = vld [vmem:[%s13204_s5 + $0x23c] ss:$28 sps:$4 sm:$0xff]  }
 0x2dd   :  { %v9344_v42 = vld [vmem:[%s13204_s5 + $0x934] ss:$28 sps:$4 sm:$0xff]  }
 0x2de   :  { %4379 = vmatpush1.bf16.msra.mxu1 %v8465_v56  ;;  %v9263_v56 = vld [vmem:[%s13204_s5 + $0xc] ss:$28 sps:$4 sm:$0xff]   ;;  %v9303_v45 = vld [vmem:[%s13204_s5 + $0x238] ss:$28 sps:$4 sm:$0xff]  }
 0x2df   :  { %7330 = vmatpush1.bf16.msra.mxu0 %v9234_v30  ;;  %4380 = vmatprep.subr.bf16.mxu1 %v8474_v51  ;;  %v4407_v30 = vmax.f32 %v9071_v24, 0.0  ;;  %v9261_v51 = vld [vmem:[%s13204_s5 + $0x8] ss:$28 sps:$4 sm:$0xff]   ;;  %v9309_v24 = vld [vmem:[%s13204_s5 + $0x270] ss:$28 sps:$4 sm:$0xff]  }
 0x2e0   :  { %7331 = vmatprep.subr.bf16.mxu0 %v9239_v31  ;;  %v9266_v31 = vld [vmem:[%s13204_s5 + $0x44] ss:$28 sps:$4 sm:$0xff]  }
 0x2e1   :  { %v11974_v32 = vpack.c.bf16 %v4407_v30, %v4407_v30  ;;  %v9323_v30 = vld [vmem:[%s13204_s5 + $0x2e4] ss:$28 sps:$4 sm:$0xff]  }
 0x2e2   :  { %4381 = vmatpush1.bf16.msra.mxu1 %v8473_v35  ;;  %v9290_v35 = vld [vmem:[%s13204_s5 + $0x73c] ss:$28 sps:$4 sm:$0xff]  }
 0x2e3   :  { %7332 = vmatpush1.bf16.msra.mxu0 %v9237_v55  ;;  %4382 = vmatprep.subr.bf16.mxu1 %v8482_v37  ;;  %v9264_v55 = vld [vmem:[%s13204_s5 + $0x40] ss:$28 sps:$4 sm:$0xff]  }
 0x2e4   :  { %7333 = vmatprep.subr.bf16.mxu0 %v9242_v38  ;;  %v9269_v37 = vld [vmem:[%s13204_s5 + $0x7c] ss:$28 sps:$4 sm:$0xff]   ;;  %v9296_v38 = vld [vmem:[%s13204_s5 + $0x774] ss:$28 sps:$4 sm:$0xff]  }
 0x2e6   :  { %4383 = vmatpush1.bf16.msra.mxu1 %v8481_v39  ;;  %v9294_v39 = vld [vmem:[%s13204_s5 + $0x770] ss:$28 sps:$4 sm:$0xff]  }
 0x2e7   :  { %7334 = vmatpush1.bf16.msra.mxu0 %v9240_v41  ;;  %4384 = vmatprep.subr.bf16.mxu1 %v8490_v46  ;;  %v9302_v41 = vld [vmem:[%s13204_s5 + $0x7ac] ss:$28 sps:$4 sm:$0xff]  }
 0x2e8   :  { %7335 = vmatprep.subr.bf16.mxu0 %v9245_v2  ;;  %v9270_v46 = vld [vmem:[%s13204_s5 + $0xb0] ss:$28 sps:$4 sm:$0xff]  }
 0x2e9   :  { %v9275_v2 = vld [vmem:[%s13204_s5 + $0xec] ss:$28 sps:$4 sm:$0xff]  }
 0x2ea   :  { %4385 = vmatpush1.bf16.msra.mxu1 %v8489_v50  ;;  %v9273_v50 = vld [vmem:[%s13204_s5 + $0xe8] ss:$28 sps:$4 sm:$0xff]  }
 0x2eb   :  { %7336 = vmatpush1.bf16.msra.mxu0 %v9243_v61  ;;  %4386 = vmatprep.subr.bf16.mxu1 %v8498_v53  ;;  %v9278_v61 = vld [vmem:[%s13204_s5 + $0x124] ss:$28 sps:$4 sm:$0xff]  }
 0x2ec   :  { %7337 = vmatprep.subr.bf16.mxu0 %v9248_v54  ;;  %v9306_v53 = vld [vmem:[%s13204_s5 + $0x7e0] ss:$28 sps:$4 sm:$0xff]  }
 0x2ed   :  { %v9314_v54 = vld [vmem:[%s13204_s5 + $0x81c] ss:$28 sps:$4 sm:$0xff]  }
 0x2ee   :  { %4387 = vmatpush1.bf16.msra.mxu1 %v8497_v1  ;;  %v9312_v1 = vld [vmem:[%s13204_s5 + $0x818] ss:$28 sps:$4 sm:$0xff]  }
 0x2ef   :  { %7338 = vmatpush1.bf16.msra.mxu0 %v9246_v43  ;;  %4388 = vmatprep.subr.bf16.mxu1 %v8506_v14  ;;  %v9320_v43 = vld [vmem:[%s13204_s5 + $0x854] ss:$28 sps:$4 sm:$0xff]  }
 0x2f0   :  { %7339 = vmatprep.subr.bf16.mxu0 %v9251_v60  ;;  %v9279_v14 = vld [vmem:[%s13204_s5 + $0x158] ss:$28 sps:$4 sm:$0xff]  }
 0x2f1   :  { %v9287_v60 = vld [vmem:[%s13204_s5 + $0x194] ss:$28 sps:$4 sm:$0xff]  }
 0x2f2   :  { %4389 = vmatpush1.bf16.msra.mxu1 %v8505_v44  ;;  %v9285_v44 = vld [vmem:[%s13204_s5 + $0x190] ss:$28 sps:$4 sm:$0xff]  }
 0x2f3   :  { %7340 = vmatpush1.bf16.msra.mxu0 %v9249_v0  ;;  %4390 = vmatprep.subr.bf16.mxu1 %v8514_v3  ;;  %v9293_v0 = vld [vmem:[%s13204_s5 + $0x1cc] ss:$28 sps:$4 sm:$0xff]  }
 0x2f4   :  { %7341 = vmatprep.subr.bf16.mxu0 %v9254_v4  ;;  %v9324_v3 = vld [vmem:[%s13204_s5 + $0x888] ss:$28 sps:$4 sm:$0xff]  }
 0x2f5   :  { %v9332_v4 = vld [vmem:[%s13204_s5 + $0x8c4] ss:$28 sps:$4 sm:$0xff]  }
 0x2f6   :  { %4391 = vmatpush1.bf16.msra.mxu1 %v8513_v7  ;;  %v9330_v7 = vld [vmem:[%s13204_s5 + $0x8c0] ss:$28 sps:$4 sm:$0xff]  }
 0x2f7   :  { %7342 = vmatpush1.bf16.msra.mxu0 %v9252_v9  ;;  %4392 = vmatprep.subr.bf16.mxu1 %v8522_v11  ;;  %v9338_v9 = vld [vmem:[%s13204_s5 + $0x8fc] ss:$28 sps:$4 sm:$0xff]  }
 0x2f8   :  { %7343 = vmatprep.subr.bf16.mxu0 %v9257_v19  ;;  %v9297_v11 = vld [vmem:[%s13204_s5 + $0x200] ss:$28 sps:$4 sm:$0xff]   ;;  %v9336_v19 = vld [vmem:[%s13204_s5 + $0x8f8] ss:$28 sps:$4 sm:$0xff]  }
 0x2fa   :  { %4393 = vmatpush1.bf16.msra.mxu1 %v8521_v22  ;;  %v9311_v22 = vld [vmem:[%s13204_s5 + $0x274] ss:$28 sps:$4 sm:$0xff]  }
 0x2fb   :  { %7344 = vmatpush1.bf16.msra.mxu0 %v9255_v21  ;;  %4394 = vmatprep.subr.bf16.mxu1 %v8530_v23  ;;  %v9342_v21 = vld [vmem:[%s13204_s5 + $0x930] ss:$28 sps:$4 sm:$0xff]  }
 0x2fc   :  { %7345 = vmatprep.subr.bf16.mxu0 %v9260_v25  ;;  %v9350_v23 = vld [vmem:[%s13204_s5 + $0x96c] ss:$28 sps:$4 sm:$0xff]  }
 0x2fd   :  { %v9317_v25 = vld [vmem:[%s13204_s5 + $0x2ac] ss:$28 sps:$4 sm:$0xff]  }
 0x2fe   :  { %4395 = vmatpush1.bf16.msra.mxu1 %v8529_v26  ;;  %v9348_v26 = vld [vmem:[%s13204_s5 + $0x968] ss:$28 sps:$4 sm:$0xff]  }
 0x2ff   :  { %7346 = vmatpush1.bf16.msra.mxu0 %v9258_v27  ;;  %7438 = vmatprep.subr.bf16.mxu1 %v9263_v56  ;;  %v9356_v27 = vld [vmem:[%s13204_s5 + $0x9a4] ss:$28 sps:$4 sm:$0xff]  }
 0x300   :  { %7356 = vmatprep.subr.bf16.mxu0 %v9284_v5  ;;  %v9315_v56 = vld [vmem:[%s13204_s5 + $0x2a8] ss:$28 sps:$4 sm:$0xff]   ;;  %v9354_v5 = vld [vmem:[%s13204_s5 + $0x9a0] ss:$28 sps:$4 sm:$0xff]  }
 0x301   :  { %4397 = vmatmul.mubr.bf16.vlgmr.msra.gmra.mrb[16].mxu1 %v10768_v20  ;;  %v9288_v20 = vld [vmem:[%s13204_s5 + $0x738] ss:$28 sps:$4 sm:$0xff]  }
 0x302   :  { %7348 = vmatmul.mubr.bf16.vlgmr.msra.gmra.mrb[16].mxu0 %v11974_v32  ;;  %7439 = vmatpush1.bf16.msra.mxu1 %v9261_v51  ;;  %v9362_v51 = vld [vmem:[%s13204_s5 + $0x9dc] ss:$28 sps:$4 sm:$0xff]  }
 0x303   :  { %7470 = vmatprep.mubr.bf16.mxu1 %v11584_v36  ;;  %7440 = vmatprep.subr.bf16.mxu1 %v9266_v31  ;;  %v9321_v31 = vld [vmem:[%s13204_s5 + $0x2e0] ss:$28 sps:$4 sm:$0xff]  }
 0x304   :  { %7357 = vmatpush1.bf16.msra.mxu0 %v9282_v33  ;;  %v9329_v33 = vld [vmem:[%s13204_s5 + $0x31c] ss:$28 sps:$4 sm:$0xff]  }
 0x305   :  { %7358 = vmatprep.subr.bf16.mxu0 %v9290_v35  ;;  %v9360_v35 = vld [vmem:[%s13204_s5 + $0x9d8] ss:$28 sps:$4 sm:$0xff]  }
 0x306   :  { %7441 = vmatpush1.bf16.msra.mxu1 %v9264_v55  ;;  %v9368_v55 = vld [vmem:[%s13204_s5 + $0xa14] ss:$28 sps:$4 sm:$0xff]  }
 0x307   :  { %7442 = vmatprep.subr.bf16.mxu1 %v9269_v37  ;;  %v9327_v37 = vld [vmem:[%s13204_s5 + $0x318] ss:$28 sps:$4 sm:$0xff]  }
 0x308   :  { %7359 = vmatpush1.bf16.msra.mxu0 %v9288_v20  ;;  %v9335_v20 = vld [vmem:[%s13204_s5 + $0x354] ss:$28 sps:$4 sm:$0xff]  }
 0x309   :  { %7360 = vmatprep.subr.bf16.mxu0 %v9296_v38  ;;  %v9366_v38 = vld [vmem:[%s13204_s5 + $0xa10] ss:$28 sps:$4 sm:$0xff]  }
 0x30a   :  { %7443 = vmatpush1.bf16.msra.mxu1 %v9267_v40  ;;  %v9374_v40 = vld [vmem:[%s13204_s5 + $0xa4c] ss:$28 sps:$4 sm:$0xff]  }
 0x30b   :  { %7444 = vmatprep.subr.bf16.mxu1 %v9272_v8  ;;  %v9333_v8 = vld [vmem:[%s13204_s5 + $0x350] ss:$28 sps:$4 sm:$0xff]  }
 0x30c   :  { %7361 = vmatpush1.bf16.msra.mxu0 %v9294_v39  ;;  %v9341_v39 = vld [vmem:[%s13204_s5 + $0x38c] ss:$28 sps:$4 sm:$0xff]  }
 0x30d   :  { %7362 = vmatprep.subr.bf16.mxu0 %v9302_v41  ;;  %v9372_v41 = vld [vmem:[%s13204_s5 + $0xa48] ss:$28 sps:$4 sm:$0xff]  }
 0x30e   :  { %7445 = vmatpush1.bf16.msra.mxu1 %v9270_v46  ;;  %v9428_v46 = vld [vmem:[%s13204_s5 + $0xa84] ss:$28 sps:$4 sm:$0xff]  }
 0x30f   :  { %7446 = vmatprep.subr.bf16.mxu1 %v9275_v2  ;;  %v9339_v2 = vld [vmem:[%s13204_s5 + $0x388] ss:$28 sps:$4 sm:$0xff]  }
 0x310   :  { %7363 = vmatpush1.bf16.msra.mxu0 %v9300_v48  ;;  %v9347_v48 = vld [vmem:[%s13204_s5 + $0x3c4] ss:$28 sps:$4 sm:$0xff]  }
 0x311   :  { %7364 = vmatprep.subr.bf16.mxu0 %v9308_v49  ;;  %v9345_v49 = vld [vmem:[%s13204_s5 + $0x3c0] ss:$28 sps:$4 sm:$0xff]  }
 0x312   :  { %7447 = vmatpush1.bf16.msra.mxu1 %v9273_v50  ;;  %v9353_v50 = vld [vmem:[%s13204_s5 + $0x3fc] ss:$28 sps:$4 sm:$0xff]  }
 0x313   :  { %7448 = vmatprep.subr.bf16.mxu1 %v9278_v61  ;;  %v9351_v61 = vld [vmem:[%s13204_s5 + $0x3f8] ss:$28 sps:$4 sm:$0xff]  }
 0x314   :  { %7365 = vmatpush1.bf16.msra.mxu0 %v9306_v53  ;;  %v9359_v53 = vld [vmem:[%s13204_s5 + $0x434] ss:$28 sps:$4 sm:$0xff]  }
 0x315   :  { %7366 = vmatprep.subr.bf16.mxu0 %v9314_v54  ;;  %v9357_v54 = vld [vmem:[%s13204_s5 + $0x430] ss:$28 sps:$4 sm:$0xff]  }
 0x316   :  { %7449 = vmatpush1.bf16.msra.mxu1 %v9276_v58  ;;  %v9365_v58 = vld [vmem:[%s13204_s5 + $0x46c] ss:$28 sps:$4 sm:$0xff]  }
 0x317   :  { %7450 = vmatprep.subr.bf16.mxu1 %v9281_v59  ;;  %v9363_v59 = vld [vmem:[%s13204_s5 + $0x468] ss:$28 sps:$4 sm:$0xff]  }
 0x318   :  { %7367 = vmatpush1.bf16.msra.mxu0 %v9312_v1  ;;  %v9371_v1 = vld [vmem:[%s13204_s5 + $0x4a4] ss:$28 sps:$4 sm:$0xff]  }
 0x319   :  { %7368 = vmatprep.subr.bf16.mxu0 %v9320_v43  ;;  %v12200_v43 = vld [vmem:[%s13203_s4] sm:$0xff] }
 0x31a   :  { %7451 = vmatpush1.bf16.msra.mxu1 %v9279_v14  ;;  %v1168_v14 = vrot.slane %v12200_v43, %v10510_v47 }
 0x31b   :  { %7452 = vmatprep.subr.bf16.mxu1 %v9287_v60  ;;  %v9369_v60 = vld [vmem:[%s13204_s5 + $0x4a0] ss:$28 sps:$4 sm:$0xff]  }
 0x31c   :  { %7369 = vmatpush1.bf16.msra.mxu0 %v9318_v62  ;;  %v1172_v62 = vrot.slane %v12200_v43, %v10412_v28 }
 0x31d   :  { %7370 = vmatprep.subr.bf16.mxu0 %v9326_v63  ;;  %v9377_v63 = vld [vmem:[%s13204_s5 + $0x4dc] ss:$28 sps:$4 sm:$0xff]  }
 0x31e   :  { %7453 = vmatpush1.bf16.msra.mxu1 %v9285_v44 }
 0x31f   :  { %7454 = vmatprep.subr.bf16.mxu1 %v9293_v0 }
 0x320   :  { %7371 = vmatpush1.bf16.msra.mxu0 %v9324_v3 }
 0x321   :  { %7372 = vmatprep.subr.bf16.mxu0 %v9332_v4  ;;  %v9375_v4 = vld [vmem:[%s13204_s5 + $0x4d8] ss:$28 sps:$4 sm:$0xff]  }
 0x322   :  { %7455 = vmatpush1.bf16.msra.mxu1 %v9291_v52 }
 0x323   :  { %7456 = vmatprep.subr.bf16.mxu1 %v9299_v6 }
 0x324   :  { %7373 = vmatpush1.bf16.msra.mxu0 %v9330_v7  ;;  %v9380_v7 = vld [vmem:[%s13204_s5 + $0x514] ss:$28 sps:$4 sm:$0xff]  }
 0x325   :  { %7374 = vmatprep.subr.bf16.mxu0 %v9338_v9 }
 0x326   :  { %7457 = vmatpush1.bf16.msra.mxu1 %v9297_v11 }
 0x327   :  { %7458 = vmatprep.subr.bf16.mxu1 %v9305_v12 }
 0x328   :  { %7375 = vmatpush1.bf16.msra.mxu0 %v9336_v19  ;;  %v9378_v19 = vld [vmem:[%s13204_s5 + $0x510] ss:$28 sps:$4 sm:$0xff]  }
 0x329   :  { %7376 = vmatprep.subr.bf16.mxu0 %v9344_v42 }
 0x32a   :  { %7459 = vmatpush1.bf16.msra.mxu1 %v9303_v45  ;;  %v9383_v45 = vld [vmem:[%s13204_s5 + $0x54c] ss:$28 sps:$4 sm:$0xff]  }
 0x32b   :  { %7460 = vmatprep.subr.bf16.mxu1 %v9311_v22  ;;  %v9426_v22 = vld [vmem:[%s13204_s5 + $0xa80] ss:$28 sps:$4 sm:$0xff]  }
 0x32c   :  { %7377 = vmatpush1.bf16.msra.mxu0 %v9342_v21 }
 0x32d   :  { %7378 = vmatprep.subr.bf16.mxu0 %v9350_v23  ;;  %v9434_v23 = vld [vmem:[%s13204_s5 + $0xabc] ss:$28 sps:$4 sm:$0xff]  }
 0x32e   :  { %7461 = vmatpush1.bf16.msra.mxu1 %v9309_v24  ;;  %v9381_v24 = vld [vmem:[%s13204_s5 + $0x548] ss:$28 sps:$4 sm:$0xff]  }
 0x32f   :  { %7462 = vmatprep.subr.bf16.mxu1 %v9317_v25  ;;  %v9386_v25 = vld [vmem:[%s13204_s5 + $0x584] ss:$28 sps:$4 sm:$0xff]  }
 0x330   :  { %7379 = vmatpush1.bf16.msra.mxu0 %v9348_v26  ;;  %v9432_v26 = vld [vmem:[%s13204_s5 + $0xab8] ss:$28 sps:$4 sm:$0xff]  }
 0x331   :  { %7380 = vmatprep.subr.bf16.mxu0 %v9356_v27  ;;  %v9440_v27 = vld [vmem:[%s13204_s5 + $0xaf4] ss:$28 sps:$4 sm:$0xff]  }
 0x332   :  { %7463 = vmatpush1.bf16.msra.mxu1 %v9315_v56  ;;  %v9384_v56 = vld [vmem:[%s13204_s5 + $0x580] ss:$28 sps:$4 sm:$0xff]  }
 0x333   :  { %7464 = vmatprep.subr.bf16.mxu1 %v9323_v30  ;;  %v9389_v30 = vld [vmem:[%s13204_s5 + $0x5bc] ss:$28 sps:$4 sm:$0xff]  }
 0x334   :  { %7381 = vmatpush1.bf16.msra.mxu0 %v9354_v5  ;;  %v9438_v5 = vld [vmem:[%s13204_s5 + $0xaf0] ss:$28 sps:$4 sm:$0xff]  }
 0x335   :  { %7382 = vmatprep.subr.bf16.mxu0 %v9362_v51  ;;  %v9446_v51 = vld [vmem:[%s13204_s5 + $0xb2c] ss:$28 sps:$4 sm:$0xff]  }
 0x336   :  { %7465 = vmatpush1.bf16.msra.mxu1 %v9321_v31  ;;  %v9387_v31 = vld [vmem:[%s13204_s5 + $0x5b8] ss:$28 sps:$4 sm:$0xff]  }
 0x337   :  { %7466 = vmatprep.subr.bf16.mxu1 %v9329_v33  ;;  %v9392_v33 = vld [vmem:[%s13204_s5 + $0x5f4] ss:$28 sps:$4 sm:$0xff]  }
 0x338   :  { %7383 = vmatpush1.bf16.msra.mxu0 %v9360_v35  ;;  %v9444_v35 = vld [vmem:[%s13204_s5 + $0xb28] ss:$28 sps:$4 sm:$0xff]  }
 0x339   :  { %7384 = vmatprep.subr.bf16.mxu0 %v9368_v55  ;;  %v9452_v55 = vld [vmem:[%s13204_s5 + $0xb64] ss:$28 sps:$4 sm:$0xff]  }
 0x33a   :  { %7467 = vmatpush1.bf16.msra.mxu1 %v9327_v37  ;;  %v9390_v37 = vld [vmem:[%s13204_s5 + $0x5f0] ss:$28 sps:$4 sm:$0xff]  }
 0x33b   :  { %7468 = vmatprep.subr.bf16.mxu1 %v9335_v20  ;;  %v9395_v20 = vld [vmem:[%s13204_s5 + $0x62c] ss:$28 sps:$4 sm:$0xff]  }
 0x33c   :  { %7385 = vmatpush1.bf16.msra.mxu0 %v9366_v38  ;;  %v9450_v38 = vld [vmem:[%s13204_s5 + $0xb60] ss:$28 sps:$4 sm:$0xff]  }
 0x33d   :  { %7386 = vmatprep.subr.bf16.mxu0 %v9374_v40  ;;  %v9458_v40 = vld [vmem:[%s13204_s5 + $0xb9c] ss:$28 sps:$4 sm:$0xff]  }
 0x33e   :  { %7469 = vmatpush1.bf16.msra.mxu1 %v9333_v8  ;;  %v9393_v8 = vld [vmem:[%s13204_s5 + $0x628] ss:$28 sps:$4 sm:$0xff]  }
 0x33f   :  { %7479 = vmatprep.subr.bf16.mxu1 %v9341_v39  ;;  %v9398_v39 = vld [vmem:[%s13204_s5 + $0x664] ss:$28 sps:$4 sm:$0xff]  }
 0x340   :  { %7387 = vmatpush1.bf16.msra.mxu0 %v9372_v41  ;;  %v9456_v41 = vld [vmem:[%s13204_s5 + $0xb98] ss:$28 sps:$4 sm:$0xff]  }
 0x341   :  { %7471 = vmatmul.mubr.bf16.vlgmr.msra.gmra.mrb[20].mxu1 %v11773_v10  ;;  %7397 = vmatprep.subr.bf16.mxu0 %v9428_v46  ;;  %v9464_v46 = vld [vmem:[%s13204_s5 + $0xbd4] ss:$28 sps:$4 sm:$0xff]  }
 0x342   :  { %7480 = vmatpush1.bf16.msra.mxu1 %v9339_v2  ;;  %7511 = vmatprep.mubr.bf16.mxu1 %v11863_v29  ;;  %v9396_v2 = vld [vmem:[%s13204_s5 + $0x660] ss:$28 sps:$4 sm:$0xff]  }
 0x343   :  { %7481 = vmatprep.subr.bf16.mxu1 %v9347_v48  ;;  %v9401_v48 = vld [vmem:[%s13204_s5 + $0x69c] ss:$28 sps:$4 sm:$0xff]  }
 0x346   :  { %7482 = vmatpush1.bf16.msra.mxu1 %v9345_v49  ;;  %v9462_v49 = vld [vmem:[%s13204_s5 + $0xbd0] ss:$28 sps:$4 sm:$0xff]  }
 0x347   :  { %7483 = vmatprep.subr.bf16.mxu1 %v9353_v50  ;;  %v9470_v50 = vld [vmem:[%s13204_s5 + $0xc0c] ss:$28 sps:$4 sm:$0xff]  }
 0x34a   :  { %7484 = vmatpush1.bf16.msra.mxu1 %v9351_v61  ;;  %v9399_v61 = vld [vmem:[%s13204_s5 + $0x698] ss:$28 sps:$4 sm:$0xff]  }
 0x34b   :  { %7485 = vmatprep.subr.bf16.mxu1 %v9359_v53  ;;  %v9404_v53 = vld [vmem:[%s13204_s5 + $0x6d4] ss:$28 sps:$4 sm:$0xff]  }
 0x34e   :  { %7486 = vmatpush1.bf16.msra.mxu1 %v9357_v54  ;;  %v9468_v54 = vld [vmem:[%s13204_s5 + $0xc08] ss:$28 sps:$4 sm:$0xff]  }
 0x34f   :  { %7487 = vmatprep.subr.bf16.mxu1 %v9365_v58  ;;  %v9476_v58 = vld [vmem:[%s13204_s5 + $0xc44] ss:$28 sps:$4 sm:$0xff]  }
 0x352   :  { %7488 = vmatpush1.bf16.msra.mxu1 %v9363_v59  ;;  %v9402_v59 = vld [vmem:[%s13204_s5 + $0x6d0] ss:$28 sps:$4 sm:$0xff]  }
 0x353   :  { %7489 = vmatprep.subr.bf16.mxu1 %v9371_v1  ;;  %v9407_v1 = vld [vmem:[%s13204_s5 + $0x70c] ss:$28 sps:$4 sm:$0xff]  }
 0x355   :  { %v4234_v44 = vpop.f32.mrb[12].mxu0 }
 0x356   :  { %v9073_v0 = vadd.f32 %v4234_v44, %v1168_v14  ;;  %v4236_v3 = vpop.f32.mrb[13].mxu0  ;;  %7490 = vmatpush1.bf16.msra.mxu1 %v9369_v60  ;;  %v9474_v14 = vld [vmem:[%s13204_s5 + $0xc40] ss:$28 sps:$4 sm:$0xff]   ;;  %v9480_v44 = vld [vmem:[%s13204_s5 + $0xc78] ss:$28 sps:$4 sm:$0xff]  }
 0x357   :  { %v9074_v52 = vadd.f32 %v4236_v3, %v1172_v62  ;;  %v4238_v6 = vpop.f32.mrb[14].mxu0  ;;  %7491 = vmatprep.subr.bf16.mxu1 %v9377_v63  ;;  %v9482_v60 = vld [vmem:[%s13204_s5 + $0xc7c] ss:$28 sps:$4 sm:$0xff]   ;;  %v9405_v62 = vld [vmem:[%s13204_s5 + $0x708] ss:$28 sps:$4 sm:$0xff]  }
 0x358   :  { %v4409_v9 = vmax.f32 %v9073_v0, 0.0  ;;  %v4239_v11 = vpop.f32.mrb[15].mxu0  ;;  %v9410_v63 = vld [vmem:[%s13204_s5 + $0x744] ss:$28 sps:$4 sm:$0xff]   ;;  %v9488_v0 = vld [vmem:[%s13204_s5 + $0xcb4] ss:$28 sps:$4 sm:$0xff]  }
 0x359   :  { %v4410_v12 = vmax.f32 %v9074_v52, 0.0  ;;  %v9408_v3 = vld [vmem:[%s13204_s5 + $0x740] ss:$28 sps:$4 sm:$0xff]   ;;  %v9486_v52 = vld [vmem:[%s13204_s5 + $0xcb0] ss:$28 sps:$4 sm:$0xff]  }
 0x35a   :  { %7492 = vmatpush1.bf16.msra.mxu1 %v9375_v4  ;;  %v12229_v21 = vpack.c.bf16 %v4409_v9, %v4409_v9  ;;  %v9413_v4 = vld [vmem:[%s13204_s5 + $0x77c] ss:$28 sps:$4 sm:$0xff]   ;;  %v9494_v6 = vld [vmem:[%s13204_s5 + $0xcec] ss:$28 sps:$4 sm:$0xff]   ;;  %v9416_v9 = vld [vmem:[%s13204_s5 + $0x7b4] ss:$28 sps:$4 sm:$0xff]  }
 0x35b   :  { %v12221_v42 = vpack.c.bf16 %v4410_v12, %v4410_v12  ;;  %7493 = vmatprep.subr.bf16.mxu1 %v9380_v7  ;;  %v9411_v7 = vld [vmem:[%s13204_s5 + $0x778] ss:$28 sps:$4 sm:$0xff]   ;;  %v9492_v11 = vld [vmem:[%s13204_s5 + $0xce8] ss:$28 sps:$4 sm:$0xff]  }
 0x35c   :  { %v9500_v12 = vld [vmem:[%s13204_s5 + $0xd24] ss:$28 sps:$4 sm:$0xff]  }
 0x35d   :  { %7388 = vmatprep.mubr.bf16.mxu0 %v12221_v42 }
 0x35e   :  { %7389 = vmatmul.mubr.bf16.vlgmr.msra.gmra.mrb[16].mxu0 %v12229_v21  ;;  %7494 = vmatpush1.bf16.msra.mxu1 %v9378_v19  ;;  %v9414_v19 = vld [vmem:[%s13204_s5 + $0x7b0] ss:$28 sps:$4 sm:$0xff]  }
 0x35f   :  { %7495 = vmatprep.subr.bf16.mxu1 %v9383_v45  ;;  %7398 = vmatpush1.bf16.msra.mxu0 %v9426_v22  ;;  %v9419_v45 = vld [vmem:[%s13204_s5 + $0x7ec] ss:$28 sps:$4 sm:$0xff]   ;;  %v9498_v22 = vld [vmem:[%s13204_s5 + $0xd20] ss:$28 sps:$4 sm:$0xff]  }
 0x360   :  { %7399 = vmatprep.subr.bf16.mxu0 %v9434_v23  ;;  %v9506_v23 = vld [vmem:[%s13204_s5 + $0xd5c] ss:$28 sps:$4 sm:$0xff]  }
 0x362   :  { %7496 = vmatpush1.bf16.msra.mxu1 %v9381_v24  ;;  %v9417_v24 = vld [vmem:[%s13204_s5 + $0x7e8] ss:$28 sps:$4 sm:$0xff]  }
 0x363   :  { %7497 = vmatprep.subr.bf16.mxu1 %v9386_v25  ;;  %7400 = vmatpush1.bf16.msra.mxu0 %v9432_v26  ;;  %v9422_v25 = vld [vmem:[%s13204_s5 + $0x824] ss:$28 sps:$4 sm:$0xff]   ;;  %v9504_v26 = vld [vmem:[%s13204_s5 + $0xd58] ss:$28 sps:$4 sm:$0xff]  }
 0x364   :  { %7401 = vmatprep.subr.bf16.mxu0 %v9440_v27  ;;  %v9512_v27 = vld [vmem:[%s13204_s5 + $0xd94] ss:$28 sps:$4 sm:$0xff]  }
 0x366   :  { %7498 = vmatpush1.bf16.msra.mxu1 %v9384_v56  ;;  %v9420_v56 = vld [vmem:[%s13204_s5 + $0x820] ss:$28 sps:$4 sm:$0xff]  }
 0x367   :  { %7499 = vmatprep.subr.bf16.mxu1 %v9389_v30  ;;  %7402 = vmatpush1.bf16.msra.mxu0 %v9438_v5  ;;  %v9425_v30 = vld [vmem:[%s13204_s5 + $0x85c] ss:$28 sps:$4 sm:$0xff]   ;;  %v9510_v5 = vld [vmem:[%s13204_s5 + $0xd90] ss:$28 sps:$4 sm:$0xff]  }
 0x368   :  { %7403 = vmatprep.subr.bf16.mxu0 %v9446_v51  ;;  %v9518_v51 = vld [vmem:[%s13204_s5 + $0xdcc] ss:$28 sps:$4 sm:$0xff]  }
 0x36a   :  { %7500 = vmatpush1.bf16.msra.mxu1 %v9387_v31  ;;  %v9423_v31 = vld [vmem:[%s13204_s5 + $0x858] ss:$28 sps:$4 sm:$0xff]  }
 0x36b   :  { %7501 = vmatprep.subr.bf16.mxu1 %v9392_v33  ;;  %7404 = vmatpush1.bf16.msra.mxu0 %v9444_v35  ;;  %v9431_v33 = vld [vmem:[%s13204_s5 + $0x894] ss:$28 sps:$4 sm:$0xff]   ;;  %v9516_v35 = vld [vmem:[%s13204_s5 + $0xdc8] ss:$28 sps:$4 sm:$0xff]  }
 0x36c   :  { %7405 = vmatprep.subr.bf16.mxu0 %v9452_v55  ;;  %v9524_v55 = vld [vmem:[%s13204_s5 + $0x14] ss:$28 sps:$4 sm:$0xff]  }
 0x36e   :  { %7502 = vmatpush1.bf16.msra.mxu1 %v9390_v37  ;;  %v9429_v37 = vld [vmem:[%s13204_s5 + $0x890] ss:$28 sps:$4 sm:$0xff]  }
 0x36f   :  { %7503 = vmatprep.subr.bf16.mxu1 %v9395_v20  ;;  %7406 = vmatpush1.bf16.msra.mxu0 %v9450_v38  ;;  %v9437_v20 = vld [vmem:[%s13204_s5 + $0x8cc] ss:$28 sps:$4 sm:$0xff]  }
 0x370   :  { %7407 = vmatprep.subr.bf16.mxu0 %v9458_v40  ;;  %v9435_v38 = vld [vmem:[%s13204_s5 + $0x8c8] ss:$28 sps:$4 sm:$0xff]  }
 0x371   :  { %v9443_v40 = vld [vmem:[%s13204_s5 + $0x904] ss:$28 sps:$4 sm:$0xff]  }
 0x372   :  { %7504 = vmatpush1.bf16.msra.mxu1 %v9393_v8  ;;  %v9441_v8 = vld [vmem:[%s13204_s5 + $0x900] ss:$28 sps:$4 sm:$0xff]  }
 0x373   :  { %7505 = vmatprep.subr.bf16.mxu1 %v9398_v39  ;;  %7408 = vmatpush1.bf16.msra.mxu0 %v9456_v41  ;;  %v9449_v39 = vld [vmem:[%s13204_s5 + $0x93c] ss:$28 sps:$4 sm:$0xff]  }
 0x374   :  { %7409 = vmatprep.subr.bf16.mxu0 %v9464_v46  ;;  %v9447_v41 = vld [vmem:[%s13204_s5 + $0x938] ss:$28 sps:$4 sm:$0xff]  }
 0x375   :  { %v9455_v46 = vld [vmem:[%s13204_s5 + $0x974] ss:$28 sps:$4 sm:$0xff]  }
 0x376   :  { %7506 = vmatpush1.bf16.msra.mxu1 %v9396_v2  ;;  %v9453_v2 = vld [vmem:[%s13204_s5 + $0x970] ss:$28 sps:$4 sm:$0xff]  }
 0x377   :  { %7507 = vmatprep.subr.bf16.mxu1 %v9401_v48  ;;  %7410 = vmatpush1.bf16.msra.mxu0 %v9462_v49  ;;  %v9461_v48 = vld [vmem:[%s13204_s5 + $0x9ac] ss:$28 sps:$4 sm:$0xff]  }
 0x378   :  { %7411 = vmatprep.subr.bf16.mxu0 %v9470_v50  ;;  %v9459_v49 = vld [vmem:[%s13204_s5 + $0x9a8] ss:$28 sps:$4 sm:$0xff]  }
 0x379   :  { %v9467_v50 = vld [vmem:[%s13204_s5 + $0x9e4] ss:$28 sps:$4 sm:$0xff]  }
 0x37a   :  { %7508 = vmatpush1.bf16.msra.mxu1 %v9399_v61  ;;  %v9465_v61 = vld [vmem:[%s13204_s5 + $0x9e0] ss:$28 sps:$4 sm:$0xff]  }
 0x37b   :  { %7509 = vmatprep.subr.bf16.mxu1 %v9404_v53  ;;  %7412 = vmatpush1.bf16.msra.mxu0 %v9468_v54  ;;  %v9473_v53 = vld [vmem:[%s13204_s5 + $0xa1c] ss:$28 sps:$4 sm:$0xff]  }
 0x37c   :  { %7413 = vmatprep.subr.bf16.mxu0 %v9476_v58  ;;  %v9471_v54 = vld [vmem:[%s13204_s5 + $0xa18] ss:$28 sps:$4 sm:$0xff]  }
 0x37d   :  { %v9479_v58 = vld [vmem:[%s13204_s5 + $0xa54] ss:$28 sps:$4 sm:$0xff]  }
 0x37e   :  { %7510 = vmatpush1.bf16.msra.mxu1 %v9402_v59  ;;  %v9477_v59 = vld [vmem:[%s13204_s5 + $0xa50] ss:$28 sps:$4 sm:$0xff]  }
 0x37f   :  { %7520 = vmatprep.subr.bf16.mxu1 %v9407_v1  ;;  %7414 = vmatpush1.bf16.msra.mxu0 %v9474_v14  ;;  %v9485_v1 = vld [vmem:[%s13204_s5 + $0xa8c] ss:$28 sps:$4 sm:$0xff]  }
 0x380   :  { %7415 = vmatprep.subr.bf16.mxu0 %v9482_v60  ;;  %v9483_v14 = vld [vmem:[%s13204_s5 + $0xa88] ss:$28 sps:$4 sm:$0xff]  }
 0x381   :  { %7512 = vmatmul.mubr.bf16.vlgmr.msra.gmra.mrb[20].mxu1 %v11974_v32  ;;  %v9491_v60 = vld [vmem:[%s13204_s5 + $0xac4] ss:$28 sps:$4 sm:$0xff]  }
 0x382   :  { %7521 = vmatpush1.bf16.msra.mxu1 %v9405_v62  ;;  %7552 = vmatprep.mubr.bf16.mxu1 %v12221_v42  ;;  %v9489_v62 = vld [vmem:[%s13204_s5 + $0xac0] ss:$28 sps:$4 sm:$0xff]  }
 0x383   :  { %7522 = vmatprep.subr.bf16.mxu1 %v9410_v63  ;;  %7416 = vmatpush1.bf16.msra.mxu0 %v9480_v44  ;;  %v9497_v63 = vld [vmem:[%s13204_s5 + $0xafc] ss:$28 sps:$4 sm:$0xff]  }
 0x384   :  { %7417 = vmatprep.subr.bf16.mxu0 %v9488_v0  ;;  %v9495_v44 = vld [vmem:[%s13204_s5 + $0xaf8] ss:$28 sps:$4 sm:$0xff]  }
 0x385   :  { %v9503_v0 = vld [vmem:[%s13204_s5 + $0xb34] ss:$28 sps:$4 sm:$0xff]  }
 0x386   :  { %7523 = vmatpush1.bf16.msra.mxu1 %v9408_v3  ;;  %v9501_v3 = vld [vmem:[%s13204_s5 + $0xb30] ss:$28 sps:$4 sm:$0xff]  }
 0x387   :  { %7524 = vmatprep.subr.bf16.mxu1 %v9413_v4  ;;  %7418 = vmatpush1.bf16.msra.mxu0 %v9486_v52  ;;  %v9509_v4 = vld [vmem:[%s13204_s5 + $0xb6c] ss:$28 sps:$4 sm:$0xff]  }
 0x388   :  { %7419 = vmatprep.subr.bf16.mxu0 %v9494_v6  ;;  %v9507_v52 = vld [vmem:[%s13204_s5 + $0xb68] ss:$28 sps:$4 sm:$0xff]  }
 0x389   :  { %v9515_v6 = vld [vmem:[%s13204_s5 + $0xba4] ss:$28 sps:$4 sm:$0xff]  }
 0x38a   :  { %7525 = vmatpush1.bf16.msra.mxu1 %v9411_v7  ;;  %v1176_v7 = vrot.slane %v12200_v43, %v10721_v34 }
 0x38b   :  { %7526 = vmatprep.subr.bf16.mxu1 %v9416_v9  ;;  %7420 = vmatpush1.bf16.msra.mxu0 %v9492_v11  ;;  %v1180_v9 = vrot.slane %v12200_v43, %v125_v57  ;;  %v9513_v11 = vld [vmem:[%s13204_s5 + $0xba0] ss:$28 sps:$4 sm:$0xff]  }
 0x38c   :  { %7421 = vmatprep.subr.bf16.mxu0 %v9500_v12  ;;  %v9521_v12 = vld [vmem:[%s13204_s5 + $0xbdc] ss:$28 sps:$4 sm:$0xff]  }
 0x38e   :  { %7527 = vmatpush1.bf16.msra.mxu1 %v9414_v19 }
 0x38f   :  { %7528 = vmatprep.subr.bf16.mxu1 %v9419_v45  ;;  %7422 = vmatpush1.bf16.msra.mxu0 %v9498_v22 }
 0x390   :  { %7423 = vmatprep.subr.bf16.mxu0 %v9506_v23 }
 0x392   :  { %7529 = vmatpush1.bf16.msra.mxu1 %v9417_v24 }
 0x393   :  { %7530 = vmatprep.subr.bf16.mxu1 %v9422_v25  ;;  %7424 = vmatpush1.bf16.msra.mxu0 %v9504_v26  ;;  %v9527_v25 = vld [vmem:[%s13204_s5 + $0xc14] ss:$28 sps:$4 sm:$0xff]  }
 0x394   :  { %7425 = vmatprep.subr.bf16.mxu0 %v9512_v27 }
 0x396   :  { %7531 = vmatpush1.bf16.msra.mxu1 %v9420_v56  ;;  %v9522_v56 = vld [vmem:[%s13204_s5 + $0x10] ss:$28 sps:$4 sm:$0xff]  }
 0x397   :  { %7532 = vmatprep.subr.bf16.mxu1 %v9425_v30  ;;  %7426 = vmatpush1.bf16.msra.mxu0 %v9510_v5  ;;  %v9525_v30 = vld [vmem:[%s13204_s5 + $0xc10] ss:$28 sps:$4 sm:$0xff]  }
 0x398   :  { %7427 = vmatprep.subr.bf16.mxu0 %v9518_v51  ;;  %v9530_v51 = vld [vmem:[%s13204_s5 + $0x4c] ss:$28 sps:$4 sm:$0xff]  }
 0x39a   :  { %7533 = vmatpush1.bf16.msra.mxu1 %v9423_v31  ;;  %v9533_v31 = vld [vmem:[%s13204_s5 + $0xc4c] ss:$28 sps:$4 sm:$0xff]  }
 0x39b   :  { %7534 = vmatprep.subr.bf16.mxu1 %v9431_v33  ;;  %7428 = vmatpush1.bf16.msra.mxu0 %v9516_v35  ;;  %v9528_v33 = vld [vmem:[%s13204_s5 + $0x48] ss:$28 sps:$4 sm:$0xff]  }
 0x39c   :  { %7602 = vmatprep.subr.bf16.mxu0 %v9524_v55  ;;  %v9531_v35 = vld [vmem:[%s13204_s5 + $0xc48] ss:$28 sps:$4 sm:$0xff]  }
 0x39d   :  { %v9536_v55 = vld [vmem:[%s13204_s5 + $0x84] ss:$28 sps:$4 sm:$0xff]  }
 0x39e   :  { %7535 = vmatpush1.bf16.msra.mxu1 %v9429_v37  ;;  %v9539_v37 = vld [vmem:[%s13204_s5 + $0xc84] ss:$28 sps:$4 sm:$0xff]  }
 0x39f   :  { %7536 = vmatprep.subr.bf16.mxu1 %v9437_v20  ;;  %v9534_v20 = vld [vmem:[%s13204_s5 + $0x80] ss:$28 sps:$4 sm:$0xff]  }
 0x3a2   :  { %7537 = vmatpush1.bf16.msra.mxu1 %v9435_v38  ;;  %v9537_v38 = vld [vmem:[%s13204_s5 + $0xc80] ss:$28 sps:$4 sm:$0xff]  }
 0x3a3   :  { %7538 = vmatprep.subr.bf16.mxu1 %v9443_v40  ;;  %v9542_v40 = vld [vmem:[%s13204_s5 + $0xbc] ss:$28 sps:$4 sm:$0xff]  }
 0x3a6   :  { %7539 = vmatpush1.bf16.msra.mxu1 %v9441_v8  ;;  %v9545_v8 = vld [vmem:[%s13204_s5 + $0xcbc] ss:$28 sps:$4 sm:$0xff]  }
 0x3a7   :  { %7540 = vmatprep.subr.bf16.mxu1 %v9449_v39  ;;  %v9540_v39 = vld [vmem:[%s13204_s5 + $0xb8] ss:$28 sps:$4 sm:$0xff]  }
 0x3aa   :  { %7541 = vmatpush1.bf16.msra.mxu1 %v9447_v41  ;;  %v9543_v41 = vld [vmem:[%s13204_s5 + $0xcb8] ss:$28 sps:$4 sm:$0xff]  }
 0x3ab   :  { %7542 = vmatprep.subr.bf16.mxu1 %v9455_v46  ;;  %v9548_v46 = vld [vmem:[%s13204_s5 + $0xf4] ss:$28 sps:$4 sm:$0xff]  }
 0x3ae   :  { %7543 = vmatpush1.bf16.msra.mxu1 %v9453_v2  ;;  %v9551_v2 = vld [vmem:[%s13204_s5 + $0xcf4] ss:$28 sps:$4 sm:$0xff]  }
 0x3af   :  { %7544 = vmatprep.subr.bf16.mxu1 %v9461_v48  ;;  %v9546_v48 = vld [vmem:[%s13204_s5 + $0xf0] ss:$28 sps:$4 sm:$0xff]  }
 0x3b2   :  { %7545 = vmatpush1.bf16.msra.mxu1 %v9459_v49  ;;  %v9549_v49 = vld [vmem:[%s13204_s5 + $0xcf0] ss:$28 sps:$4 sm:$0xff]  }
 0x3b3   :  { %7546 = vmatprep.subr.bf16.mxu1 %v9467_v50  ;;  %v9554_v50 = vld [vmem:[%s13204_s5 + $0x12c] ss:$28 sps:$4 sm:$0xff]  }
 0x3b6   :  { %7547 = vmatpush1.bf16.msra.mxu1 %v9465_v61  ;;  %v9557_v61 = vld [vmem:[%s13204_s5 + $0xd2c] ss:$28 sps:$4 sm:$0xff]  }
 0x3b7   :  { %7548 = vmatprep.subr.bf16.mxu1 %v9473_v53  ;;  %v9552_v53 = vld [vmem:[%s13204_s5 + $0x128] ss:$28 sps:$4 sm:$0xff]  }
 0x3ba   :  { %7549 = vmatpush1.bf16.msra.mxu1 %v9471_v54  ;;  %v9555_v54 = vld [vmem:[%s13204_s5 + $0xd28] ss:$28 sps:$4 sm:$0xff]  }
 0x3bb   :  { %7550 = vmatprep.subr.bf16.mxu1 %v9479_v58  ;;  %v9560_v58 = vld [vmem:[%s13204_s5 + $0x164] ss:$28 sps:$4 sm:$0xff]  }
 0x3be   :  { %7551 = vmatpush1.bf16.msra.mxu1 %v9477_v59  ;;  %v9563_v59 = vld [vmem:[%s13204_s5 + $0xd64] ss:$28 sps:$4 sm:$0xff]  }
 0x3bf   :  { %7561 = vmatprep.subr.bf16.mxu1 %v9485_v1  ;;  %v9558_v1 = vld [vmem:[%s13204_s5 + $0x160] ss:$28 sps:$4 sm:$0xff]  }
 0x3c1   :  { %7553 = vmatmul.mubr.bf16.vlgmr.msra.gmra.mrb[20].mxu1 %v12229_v21 }
 0x3c2   :  { %7562 = vmatpush1.bf16.msra.mxu1 %v9483_v14  ;;  %v9561_v14 = vld [vmem:[%s13204_s5 + $0xd60] ss:$28 sps:$4 sm:$0xff]  }
 0x3c3   :  { %7563 = vmatprep.subr.bf16.mxu1 %v9491_v60  ;;  %v9566_v60 = vld [vmem:[%s13204_s5 + $0x19c] ss:$28 sps:$4 sm:$0xff]  }
 0x3c6   :  { %7564 = vmatpush1.bf16.msra.mxu1 %v9489_v62  ;;  %v9569_v62 = vld [vmem:[%s13204_s5 + $0xd9c] ss:$28 sps:$4 sm:$0xff]  }
 0x3c7   :  { %7565 = vmatprep.subr.bf16.mxu1 %v9497_v63  ;;  %v9564_v63 = vld [vmem:[%s13204_s5 + $0x198] ss:$28 sps:$4 sm:$0xff]  }
 0x3ca   :  { %7566 = vmatpush1.bf16.msra.mxu1 %v9495_v44  ;;  %v9567_v44 = vld [vmem:[%s13204_s5 + $0xd98] ss:$28 sps:$4 sm:$0xff]  }
 0x3cb   :  { %7567 = vmatprep.subr.bf16.mxu1 %v9503_v0  ;;  %v9572_v0 = vld [vmem:[%s13204_s5 + $0x1d4] ss:$28 sps:$4 sm:$0xff]  }
 0x3ce   :  { %7568 = vmatpush1.bf16.msra.mxu1 %v9501_v3  ;;  %v9575_v3 = vld [vmem:[%s13204_s5 + $0xdd4] ss:$28 sps:$4 sm:$0xff]  }
 0x3cf   :  { %7569 = vmatprep.subr.bf16.mxu1 %v9509_v4  ;;  %v9570_v4 = vld [vmem:[%s13204_s5 + $0x1d0] ss:$28 sps:$4 sm:$0xff]  }
 0x3d2   :  { %7570 = vmatpush1.bf16.msra.mxu1 %v9507_v52  ;;  %v9573_v52 = vld [vmem:[%s13204_s5 + $0xdd0] ss:$28 sps:$4 sm:$0xff]  }
 0x3d3   :  { %7571 = vmatprep.subr.bf16.mxu1 %v9515_v6  ;;  %v9578_v6 = vld [vmem:[%s13204_s5 + $0x20c] ss:$28 sps:$4 sm:$0xff]  }
 0x3d4   :  { %v4398_v19 = vpop.f32.mrb[16].mxu1 }
 0x3d5   :  { %v9075_v45 = vadd.f32 %v4398_v19, %v1176_v7  ;;  %v4400_v22 = vpop.f32.mrb[17].mxu1  ;;  %v9579_v7 = vld [vmem:[%s13204_s5 + $0x1d8] ss:$28 sps:$4 sm:$0xff]   ;;  %v9584_v19 = vld [vmem:[%s13204_s5 + $0x210] ss:$28 sps:$4 sm:$0xff]  }
 0x3d6   :  { %v9076_v23 = vadd.f32 %v4400_v22, %v1180_v9  ;;  %v4402_v24 = vpop.f32.mrb[18].mxu1  ;;  %7572 = vmatpush1.bf16.msra.mxu1 %v9513_v11  ;;  %v9576_v9 = vld [vmem:[%s13204_s5 + $0x208] ss:$28 sps:$4 sm:$0xff]   ;;  %v9580_v11 = vld [vmem:[%s13204_s5 + $0x18] ss:$28 sps:$4 sm:$0xff]  }
 0x3d7   :  { %v4411_v57 = vmax.f32 %v9075_v45, 0.0  ;;  %v4403_v43 = vpop.f32.mrb[19].mxu1  ;;  %7573 = vmatprep.subr.bf16.mxu1 %v9521_v12  ;;  %v9583_v12 = vld [vmem:[%s13204_s5 + $0x244] ss:$28 sps:$4 sm:$0xff]   ;;  %v9585_v22 = vld [vmem:[%s13204_s5 + $0x50] ss:$28 sps:$4 sm:$0xff]  }
 0x3d8   :  { %v4412_v26 = vmax.f32 %v9076_v23, 0.0  ;;  %v9581_v45 = vld [vmem:[%s13204_s5 + $0x240] ss:$28 sps:$4 sm:$0xff]   ;;  %v9589_v24 = vld [vmem:[%s13204_s5 + $0x248] ss:$28 sps:$4 sm:$0xff]  }
 0x3d9   :  { %v12528_v5 = vpack.c.bf16 %v4411_v57, %v4411_v57  ;;  %v9588_v23 = vld [vmem:[%s13204_s5 + $0x27c] ss:$28 sps:$4 sm:$0xff]   ;;  %v9593_v57 = vld [vmem:[%s13204_s5 + $0x2b4] ss:$28 sps:$4 sm:$0xff]  }
 0x3da   :  { %v12520_v27 = vpack.c.bf16 %v4412_v26, %v4412_v26  ;;  %7574 = vmatpush1.bf16.msra.mxu1 %v9519_v13  ;;  %v9586_v13 = vld [vmem:[%s13204_s5 + $0x278] ss:$28 sps:$4 sm:$0xff]   ;;  %v9594_v43 = vld [vmem:[%s13204_s5 + $0x280] ss:$28 sps:$4 sm:$0xff]  }
 0x3db   :  { %7575 = vmatprep.subr.bf16.mxu1 %v9527_v25  ;;  %v9591_v25 = vld [vmem:[%s13204_s5 + $0x2b0] ss:$28 sps:$4 sm:$0xff]   ;;  %v9595_v26 = vld [vmem:[%s13204_s5 + $0xc0] ss:$28 sps:$4 sm:$0xff]  }
 0x3dc   :  { %7429 = vmatprep.mubr.bf16.mxu0 %v12520_v27  ;;  %7593 = vmatprep.mubr.bf16.mxu1 %v12520_v27 }
 0x3dd   :  { %7430 = vmatmul.mubr.bf16.vlgmr.msra.gmra.mrb[16].mxu0 %v12528_v5 }
 0x3de   :  { %7603 = vmatpush1.bf16.msra.mxu0 %v9522_v56  ;;  %7576 = vmatpush1.bf16.msra.mxu1 %v9525_v30  ;;  %v9598_v56 = vld [vmem:[%s13204_s5 + $0x2ec] ss:$28 sps:$4 sm:$0xff]   ;;  %v9599_v30 = vld [vmem:[%s13204_s5 + $0x2b8] ss:$28 sps:$4 sm:$0xff]  }
 0x3df   :  { %7634 = vmatprep.mubr.bf16.mxu0 %v11584_v36  ;;  %7604 = vmatprep.subr.bf16.mxu0 %v9530_v51  ;;  %v9596_v51 = vld [vmem:[%s13204_s5 + $0x2e8] ss:$28 sps:$4 sm:$0xff]  }
 0x3e0   :  { %7577 = vmatprep.subr.bf16.mxu1 %v9533_v31  ;;  %v9600_v31 = vld [vmem:[%s13204_s5 + $0xf8] ss:$28 sps:$4 sm:$0xff]  }
 0x3e2   :  { %7605 = vmatpush1.bf16.msra.mxu0 %v9528_v33  ;;  %7578 = vmatpush1.bf16.msra.mxu1 %v9531_v35  ;;  %v9603_v33 = vld [vmem:[%s13204_s5 + $0x324] ss:$28 sps:$4 sm:$0xff]   ;;  %v9604_v35 = vld [vmem:[%s13204_s5 + $0x2f0] ss:$28 sps:$4 sm:$0xff]  }
 0x3e3   :  { %7606 = vmatprep.subr.bf16.mxu0 %v9536_v55  ;;  %7579 = vmatprep.subr.bf16.mxu1 %v9539_v37  ;;  %v9601_v55 = vld [vmem:[%s13204_s5 + $0x320] ss:$28 sps:$4 sm:$0xff]   ;;  %v9605_v37 = vld [vmem:[%s13204_s5 + $0x130] ss:$28 sps:$4 sm:$0xff]  }
 0x3e6   :  { %7607 = vmatpush1.bf16.msra.mxu0 %v9534_v20  ;;  %7580 = vmatpush1.bf16.msra.mxu1 %v9537_v38  ;;  %v9608_v20 = vld [vmem:[%s13204_s5 + $0x35c] ss:$28 sps:$4 sm:$0xff]   ;;  %v9609_v38 = vld [vmem:[%s13204_s5 + $0x328] ss:$28 sps:$4 sm:$0xff]  }
 0x3e7   :  { %7608 = vmatprep.subr.bf16.mxu0 %v9542_v40  ;;  %7581 = vmatprep.subr.bf16.mxu1 %v9545_v8  ;;  %v9606_v40 = vld [vmem:[%s13204_s5 + $0x358] ss:$28 sps:$4 sm:$0xff]   ;;  %v9610_v8 = vld [vmem:[%s13204_s5 + $0x168] ss:$28 sps:$4 sm:$0xff]  }
 0x3ea   :  { %7609 = vmatpush1.bf16.msra.mxu0 %v9540_v39  ;;  %7582 = vmatpush1.bf16.msra.mxu1 %v9543_v41  ;;  %v9613_v39 = vld [vmem:[%s13204_s5 + $0x394] ss:$28 sps:$4 sm:$0xff]   ;;  %v9614_v41 = vld [vmem:[%s13204_s5 + $0x360] ss:$28 sps:$4 sm:$0xff]  }
 0x3eb   :  { %7610 = vmatprep.subr.bf16.mxu0 %v9548_v46  ;;  %7583 = vmatprep.subr.bf16.mxu1 %v9551_v2  ;;  %v9611_v46 = vld [vmem:[%s13204_s5 + $0x390] ss:$28 sps:$4 sm:$0xff]   ;;  %v9615_v2 = vld [vmem:[%s13204_s5 + $0x1a0] ss:$28 sps:$4 sm:$0xff]  }
 0x3ee   :  { %7611 = vmatpush1.bf16.msra.mxu0 %v9546_v48  ;;  %7584 = vmatpush1.bf16.msra.mxu1 %v9549_v49  ;;  %v9618_v48 = vld [vmem:[%s13204_s5 + $0x3cc] ss:$28 sps:$4 sm:$0xff]   ;;  %v9619_v49 = vld [vmem:[%s13204_s5 + $0x558] ss:$28 sps:$4 sm:$0xff]  }
 0x3ef   :  { %7612 = vmatprep.subr.bf16.mxu0 %v9554_v50  ;;  %7585 = vmatprep.subr.bf16.mxu1 %v9557_v61  ;;  %v9616_v50 = vld [vmem:[%s13204_s5 + $0x3c8] ss:$28 sps:$4 sm:$0xff]   ;;  %v9620_v61 = vld [vmem:[%s13204_s5 + $0x398] ss:$28 sps:$4 sm:$0xff]  }
 0x3f2   :  { %7613 = vmatpush1.bf16.msra.mxu0 %v9552_v53  ;;  %7586 = vmatpush1.bf16.msra.mxu1 %v9555_v54  ;;  %v9623_v53 = vld [vmem:[%s13204_s5 + $0x404] ss:$28 sps:$4 sm:$0xff]   ;;  %v9624_v54 = vld [vmem:[%s13204_s5 + $0x590] ss:$28 sps:$4 sm:$0xff]  }
 0x3f3   :  { %7614 = vmatprep.subr.bf16.mxu0 %v9560_v58  ;;  %7587 = vmatprep.subr.bf16.mxu1 %v9563_v59  ;;  %v9621_v58 = vld [vmem:[%s13204_s5 + $0x400] ss:$28 sps:$4 sm:$0xff]   ;;  %v9625_v59 = vld [vmem:[%s13204_s5 + $0x3d0] ss:$28 sps:$4 sm:$0xff]  }
 0x3f6   :  { %7615 = vmatpush1.bf16.msra.mxu0 %v9558_v1  ;;  %7588 = vmatpush1.bf16.msra.mxu1 %v9561_v14  ;;  %v9628_v1 = vld [vmem:[%s13204_s5 + $0x43c] ss:$28 sps:$4 sm:$0xff]  }
 0x3f7   :  { %7616 = vmatprep.subr.bf16.mxu0 %v9566_v60  ;;  %7589 = vmatprep.subr.bf16.mxu1 %v9569_v62  ;;  %v9626_v14 = vld [vmem:[%s13204_s5 + $0x438] ss:$28 sps:$4 sm:$0xff]   ;;  %v9634_v62 = vld [vmem:[%s13204_s5 + $0x600] ss:$28 sps:$4 sm:$0xff]  }
 0x3f8   :  { %v9633_v60 = vld [vmem:[%s13204_s5 + $0x474] ss:$28 sps:$4 sm:$0xff]  }
 0x3fa   :  { %7617 = vmatpush1.bf16.msra.mxu0 %v9564_v63  ;;  %7590 = vmatpush1.bf16.msra.mxu1 %v9567_v44  ;;  %v9631_v63 = vld [vmem:[%s13204_s5 + $0x470] ss:$28 sps:$4 sm:$0xff]   ;;  %v9635_v44 = vld [vmem:[%s13204_s5 + $0x440] ss:$28 sps:$4 sm:$0xff]  }
 0x3fb   :  { %7618 = vmatprep.subr.bf16.mxu0 %v9572_v0  ;;  %7591 = vmatprep.subr.bf16.mxu1 %v9575_v3  ;;  %v9638_v0 = vld [vmem:[%s13204_s5 + $0x4ac] ss:$28 sps:$4 sm:$0xff]   ;;  %v9639_v3 = vld [vmem:[%s13204_s5 + $0x638] ss:$28 sps:$4 sm:$0xff]  }
 0x3fe   :  { %7619 = vmatpush1.bf16.msra.mxu0 %v9570_v4  ;;  %7592 = vmatpush1.bf16.msra.mxu1 %v9573_v52  ;;  %v9636_v4 = vld [vmem:[%s13204_s5 + $0x4a8] ss:$28 sps:$4 sm:$0xff]   ;;  %v9640_v52 = vld [vmem:[%s13204_s5 + $0x478] ss:$28 sps:$4 sm:$0xff]  }
 0x3ff   :  { %7620 = vmatprep.subr.bf16.mxu0 %v9578_v6  ;;  %8979 = vmatprep.subr.bf16.mxu1 %v9579_v7  ;;  %v9643_v6 = vld [vmem:[%s13204_s5 + $0x4e4] ss:$28 sps:$4 sm:$0xff]   ;;  %v9644_v7 = vld [vmem:[%s13204_s5 + $0x670] ss:$28 sps:$4 sm:$0xff]  }
 0x401   :  { %7594 = vmatmul.mubr.bf16.vlgmr.msra.gmra.mrb[20].mxu1 %v12528_v5 }
 0x402   :  { %7621 = vmatpush1.bf16.msra.mxu0 %v9576_v9  ;;  %8980 = vmatpush3.bf16.msra.mxu1 %v9580_v11  ;;  %v9641_v9 = vld [vmem:[%s13204_s5 + $0x4e0] ss:$28 sps:$4 sm:$0xff]   ;;  %v9645_v11 = vld [vmem:[%s13204_s5 + $0x4b0] ss:$28 sps:$4 sm:$0xff]  }
 0x403   :  { %7798 = vmatprep.mubr.bf16.mxu1 %v11584_v36  ;;  %7622 = vmatprep.subr.bf16.mxu0 %v9583_v12  ;;  %v9590_v36 = vld [vmem:[%s13204_s5 + $0x88] ss:$28 sps:$4 sm:$0xff]   ;;  %v9648_v12 = vld [vmem:[%s13204_s5 + $0x51c] ss:$28 sps:$4 sm:$0xff]  }
 0x404   :  { %8981 = vmatprep.subr.bf16.mxu1 %v9584_v19  ;;  %v9649_v19 = vld [vmem:[%s13204_s5 + $0x6a8] ss:$28 sps:$4 sm:$0xff]  }
 0x406   :  { %7623 = vmatpush1.bf16.msra.mxu0 %v9581_v45  ;;  %8982 = vmatpush3.bf16.msra.mxu1 %v9585_v22  ;;  %v9646_v45 = vld [vmem:[%s13204_s5 + $0x518] ss:$28 sps:$4 sm:$0xff]   ;;  %v9650_v22 = vld [vmem:[%s13204_s5 + $0x4e8] ss:$28 sps:$4 sm:$0xff]  }
 0x407   :  { %7624 = vmatprep.subr.bf16.mxu0 %v9588_v23  ;;  %8983 = vmatprep.subr.bf16.mxu1 %v9589_v24  ;;  %v9653_v23 = vld [vmem:[%s13204_s5 + $0x554] ss:$28 sps:$4 sm:$0xff]   ;;  %v9654_v24 = vld [vmem:[%s13204_s5 + $0x6e0] ss:$28 sps:$4 sm:$0xff]  }
 0x40a   :  { %7625 = vmatpush1.bf16.msra.mxu0 %v9586_v13  ;;  %8984 = vmatpush3.bf16.msra.mxu1 %v9590_v36  ;;  %v9651_v13 = vld [vmem:[%s13204_s5 + $0x550] ss:$28 sps:$4 sm:$0xff]   ;;  %v9655_v36 = vld [vmem:[%s13204_s5 + $0x520] ss:$28 sps:$4 sm:$0xff]  }
 0x40b   :  { %7626 = vmatprep.subr.bf16.mxu0 %v9593_v57  ;;  %8985 = vmatprep.subr.bf16.mxu1 %v9594_v43  ;;  %v9658_v57 = vld [vmem:[%s13204_s5 + $0x58c] ss:$28 sps:$4 sm:$0xff]   ;;  %v9659_v43 = vld [vmem:[%s13204_s5 + $0x8d8] ss:$28 sps:$4 sm:$0xff]  }
 0x40e   :  { %7627 = vmatpush1.bf16.msra.mxu0 %v9591_v25  ;;  %8986 = vmatpush3.bf16.msra.mxu1 %v9595_v26  ;;  %v9656_v25 = vld [vmem:[%s13204_s5 + $0x588] ss:$28 sps:$4 sm:$0xff]   ;;  %v9660_v26 = vld [vmem:[%s13204_s5 + $0x718] ss:$28 sps:$4 sm:$0xff]  }
 0x40f   :  { %7628 = vmatprep.subr.bf16.mxu0 %v9598_v56  ;;  %8987 = vmatprep.subr.bf16.mxu1 %v9599_v30  ;;  %v9663_v56 = vld [vmem:[%s13204_s5 + $0x5c4] ss:$28 sps:$4 sm:$0xff]   ;;  %v9664_v30 = vld [vmem:[%s13204_s5 + $0x910] ss:$28 sps:$4 sm:$0xff]  }
 0x412   :  { %7629 = vmatpush1.bf16.msra.mxu0 %v9596_v51  ;;  %8988 = vmatpush3.bf16.msra.mxu1 %v9600_v31  ;;  %v9661_v51 = vld [vmem:[%s13204_s5 + $0x5c0] ss:$28 sps:$4 sm:$0xff]   ;;  %v9665_v31 = vld [vmem:[%s13204_s5 + $0x750] ss:$28 sps:$4 sm:$0xff]  }
 0x413   :  { %7630 = vmatprep.subr.bf16.mxu0 %v9603_v33  ;;  %8989 = vmatprep.subr.bf16.mxu1 %v9604_v35  ;;  %v9668_v33 = vld [vmem:[%s13204_s5 + $0x5fc] ss:$28 sps:$4 sm:$0xff]   ;;  %v9669_v35 = vld [vmem:[%s13204_s5 + $0x948] ss:$28 sps:$4 sm:$0xff]  }
 0x416   :  { %7631 = vmatpush1.bf16.msra.mxu0 %v9601_v55  ;;  %8990 = vmatpush3.bf16.msra.mxu1 %v9605_v37  ;;  %v9666_v55 = vld [vmem:[%s13204_s5 + $0x5f8] ss:$28 sps:$4 sm:$0xff]   ;;  %v9670_v37 = vld [vmem:[%s13204_s5 + $0x788] ss:$28 sps:$4 sm:$0xff]  }
 0x417   :  { %7632 = vmatprep.subr.bf16.mxu0 %v9608_v20  ;;  %8991 = vmatprep.subr.bf16.mxu1 %v9609_v38  ;;  %v9673_v20 = vld [vmem:[%s13204_s5 + $0x634] ss:$28 sps:$4 sm:$0xff]   ;;  %v9674_v38 = vld [vmem:[%s13204_s5 + $0x980] ss:$28 sps:$4 sm:$0xff]  }
 0x41a   :  { %7633 = vmatpush1.bf16.msra.mxu0 %v9606_v40  ;;  %8992 = vmatpush3.bf16.msra.mxu1 %v9610_v8  ;;  %v9671_v40 = vld [vmem:[%s13204_s5 + $0x630] ss:$28 sps:$4 sm:$0xff]   ;;  %v9675_v8 = vld [vmem:[%s13204_s5 + $0x7c0] ss:$28 sps:$4 sm:$0xff]  }
 0x41b   :  { %7643 = vmatprep.subr.bf16.mxu0 %v9613_v39  ;;  %8993 = vmatprep.subr.bf16.mxu1 %v9614_v41  ;;  %v9678_v39 = vld [vmem:[%s13204_s5 + $0x66c] ss:$28 sps:$4 sm:$0xff]   ;;  %v9679_v41 = vld [vmem:[%s13204_s5 + $0x9b8] ss:$28 sps:$4 sm:$0xff]  }
 0x41d   :  { %7635 = vmatmul.mubr.bf16.vlgmr.msra.gmra.mrb[20].mxu0 %v11773_v10 }
 0x41e   :  { %7644 = vmatpush1.bf16.msra.mxu0 %v9611_v46  ;;  %7675 = vmatprep.mubr.bf16.mxu0 %v11863_v29  ;;  %v9676_v46 = vld [vmem:[%s13204_s5 + $0x668] ss:$28 sps:$4 sm:$0xff]  }
 0x41f   :  { %8994 = vmatpush3.bf16.msra.mxu1 %v9615_v2  ;;  %7645 = vmatprep.subr.bf16.mxu0 %v9618_v48  ;;  %v9680_v2 = vld [vmem:[%s13204_s5 + $0x7f8] ss:$28 sps:$4 sm:$0xff]   ;;  %v9683_v48 = vld [vmem:[%s13204_s5 + $0x6a4] ss:$28 sps:$4 sm:$0xff]  }
 0x420   :  { %9001 = vmatprep.subr.bf16.mxu1 %v9619_v49  ;;  %v9684_v49 = vld [vmem:[%s13204_s5 + $0x9f0] ss:$28 sps:$4 sm:$0xff]  }
 0x422   :  { %7646 = vmatpush1.bf16.msra.mxu0 %v9616_v50  ;;  %7799 = vmatmul.mubr.bf16.vlgmr.msra.gmra.mrb[24].mxu1 %v11773_v10  ;;  %v9629_v10 = vld [vmem:[%s13204_s5 + $0x5c8] ss:$28 sps:$4 sm:$0xff]   ;;  %v9681_v50 = vld [vmem:[%s13204_s5 + $0x6a0] ss:$28 sps:$4 sm:$0xff]  }
 0x423   :  { %9002 = vmatpush3.bf16.msra.mxu1 %v9620_v61  ;;  %7838 = vmatprep.mubr.bf16.mxu1 %v11863_v29  ;;  %v9630_v29 = vld [vmem:[%s13204_s5 + $0x408] ss:$28 sps:$4 sm:$0xff]   ;;  %v9685_v61 = vld [vmem:[%s13204_s5 + $0x830] ss:$28 sps:$4 sm:$0xff]  }
 0x424   :  { %7647 = vmatprep.subr.bf16.mxu0 %v9623_v53  ;;  %9003 = vmatprep.subr.bf16.mxu1 %v9624_v54  ;;  %v9688_v53 = vld [vmem:[%s13204_s5 + $0x6dc] ss:$28 sps:$4 sm:$0xff]   ;;  %v9689_v54 = vld [vmem:[%s13204_s5 + $0xa28] ss:$28 sps:$4 sm:$0xff]  }
 0x426   :  { %7648 = vmatpush1.bf16.msra.mxu0 %v9621_v58  ;;  %v9686_v58 = vld [vmem:[%s13204_s5 + $0x6d8] ss:$28 sps:$4 sm:$0xff]  }
 0x427   :  { %9004 = vmatpush3.bf16.msra.mxu1 %v9625_v59  ;;  %7649 = vmatprep.subr.bf16.mxu0 %v9628_v1  ;;  %v9690_v59 = vld [vmem:[%s13204_s5 + $0x868] ss:$28 sps:$4 sm:$0xff]   ;;  %v9693_v1 = vld [vmem:[%s13204_s5 + $0x714] ss:$28 sps:$4 sm:$0xff]  }
 0x428   :  { %9005 = vmatprep.subr.bf16.mxu1 %v9629_v10  ;;  %v9694_v10 = vld [vmem:[%s13204_s5 + $0xa60] ss:$28 sps:$4 sm:$0xff]  }
 0x42a   :  { %7650 = vmatpush1.bf16.msra.mxu0 %v9626_v14  ;;  %v9691_v14 = vld [vmem:[%s13204_s5 + $0x710] ss:$28 sps:$4 sm:$0xff]  }
 0x42b   :  { %9006 = vmatpush3.bf16.msra.mxu1 %v9630_v29  ;;  %7651 = vmatprep.subr.bf16.mxu0 %v9633_v60  ;;  %v9695_v29 = vld [vmem:[%s13204_s5 + $0x8a0] ss:$28 sps:$4 sm:$0xff]   ;;  %v9698_v60 = vld [vmem:[%s13204_s5 + $0x74c] ss:$28 sps:$4 sm:$0xff]  }
 0x42c   :  { %9007 = vmatprep.subr.bf16.mxu1 %v9634_v62  ;;  %v9699_v62 = vld [vmem:[%s13204_s5 + $0xc58] ss:$28 sps:$4 sm:$0xff]  }
 0x42e   :  { %7652 = vmatpush1.bf16.msra.mxu0 %v9631_v63  ;;  %v9696_v63 = vld [vmem:[%s13204_s5 + $0x748] ss:$28 sps:$4 sm:$0xff]  }
 0x42f   :  { %9008 = vmatpush3.bf16.msra.mxu1 %v9635_v44  ;;  %7653 = vmatprep.subr.bf16.mxu0 %v9638_v0  ;;  %v9700_v44 = vld [vmem:[%s13204_s5 + $0xa98] ss:$28 sps:$4 sm:$0xff]   ;;  %v9703_v0 = vld [vmem:[%s13204_s5 + $0x784] ss:$28 sps:$4 sm:$0xff]  }
 0x430   :  { %9009 = vmatprep.subr.bf16.mxu1 %v9639_v3  ;;  %v9705_v3 = vld [vmem:[%s13204_s5 + $0xad0] ss:$28 sps:$4 sm:$0xff]  }
 0x432   :  { %7654 = vmatpush1.bf16.msra.mxu0 %v9636_v4  ;;  %v9708_v4 = vld [vmem:[%s13204_s5 + $0x7bc] ss:$28 sps:$4 sm:$0xff]  }
 0x433   :  { %9010 = vmatpush3.bf16.msra.mxu1 %v9640_v52  ;;  %7655 = vmatprep.subr.bf16.mxu0 %v9643_v6  ;;  %v9709_v52 = vld [vmem:[%s13204_s5 + $0xcc8] ss:$28 sps:$4 sm:$0xff]   ;;  %v9706_v6 = vld [vmem:[%s13204_s5 + $0x7b8] ss:$28 sps:$4 sm:$0xff]  }
 0x434   :  { %9011 = vmatprep.subr.bf16.mxu1 %v9644_v7  ;;  %v9710_v7 = vld [vmem:[%s13204_s5 + $0xb08] ss:$28 sps:$4 sm:$0xff]  }
 0x436   :  { %7656 = vmatpush1.bf16.msra.mxu0 %v9641_v9  ;;  %v9713_v9 = vld [vmem:[%s13204_s5 + $0x7f4] ss:$28 sps:$4 sm:$0xff]  }
 0x437   :  { %9012 = vmatpush3.bf16.msra.mxu1 %v9645_v11  ;;  %7657 = vmatprep.subr.bf16.mxu0 %v9648_v12  ;;  %v9714_v11 = vld [vmem:[%s13204_s5 + $0xd00] ss:$28 sps:$4 sm:$0xff]   ;;  %v9711_v12 = vld [vmem:[%s13204_s5 + $0x7f0] ss:$28 sps:$4 sm:$0xff]  }
 0x438   :  { %9013 = vmatprep.subr.bf16.mxu1 %v9649_v19  ;;  %v9715_v19 = vld [vmem:[%s13204_s5 + $0xb40] ss:$28 sps:$4 sm:$0xff]  }
 0x43a   :  { %7658 = vmatpush1.bf16.msra.mxu0 %v9646_v45  ;;  %v9718_v45 = vld [vmem:[%s13204_s5 + $0x82c] ss:$28 sps:$4 sm:$0xff]  }
 0x43b   :  { %9014 = vmatpush3.bf16.msra.mxu1 %v9650_v22  ;;  %7659 = vmatprep.subr.bf16.mxu0 %v9653_v23  ;;  %v9719_v22 = vld [vmem:[%s13204_s5 + $0xd38] ss:$28 sps:$4 sm:$0xff]   ;;  %v9716_v23 = vld [vmem:[%s13204_s5 + $0x828] ss:$28 sps:$4 sm:$0xff]  }
 0x43c   :  { %9015 = vmatprep.subr.bf16.mxu1 %v9654_v24  ;;  %v9720_v24 = vld [vmem:[%s13204_s5 + $0xb78] ss:$28 sps:$4 sm:$0xff]  }
 0x43e   :  { %7660 = vmatpush1.bf16.msra.mxu0 %v9651_v13  ;;  %v9723_v13 = vld [vmem:[%s13204_s5 + $0x864] ss:$28 sps:$4 sm:$0xff]  }
 0x43f   :  { %9016 = vmatpush3.bf16.msra.mxu1 %v9655_v36  ;;  %7661 = vmatprep.subr.bf16.mxu0 %v9658_v57  ;;  %v9724_v36 = vld [vmem:[%s13204_s5 + $0xd70] ss:$28 sps:$4 sm:$0xff]   ;;  %v9721_v57 = vld [vmem:[%s13204_s5 + $0x860] ss:$28 sps:$4 sm:$0xff]  }
 0x440   :  { %9023 = vmatprep.subr.bf16.mxu1 %v9659_v43  ;;  %v9725_v43 = vld [vmem:[%s13204_s5 + $0xbb0] ss:$28 sps:$4 sm:$0xff]  }
 0x442   :  { %7662 = vmatpush1.bf16.msra.mxu0 %v9656_v25  ;;  %7839 = vmatmul.mubr.bf16.vlgmr.msra.gmra.mrb[28].mxu1 %v11974_v32  ;;  %v9728_v25 = vld [vmem:[%s13204_s5 + $0x89c] ss:$28 sps:$4 sm:$0xff]  }
 0x443   :  { %9024 = vmatpush3.bf16.msra.mxu1 %v9660_v26  ;;  %7878 = vmatprep.mubr.bf16.mxu1 %v12221_v42  ;;  %v9729_v26 = vld [vmem:[%s13204_s5 + $0xda8] ss:$28 sps:$4 sm:$0xff]  }
 0x444   :  { %7663 = vmatprep.subr.bf16.mxu0 %v9663_v56  ;;  %9025 = vmatprep.subr.bf16.mxu1 %v9664_v30  ;;  %v9726_v56 = vld [vmem:[%s13204_s5 + $0x898] ss:$28 sps:$4 sm:$0xff]   ;;  %v9730_v30 = vld [vmem:[%s13204_s5 + $0xbe8] ss:$28 sps:$4 sm:$0xff]  }
 0x446   :  { %7664 = vmatpush1.bf16.msra.mxu0 %v9661_v51  ;;  %v9733_v51 = vld [vmem:[%s13204_s5 + $0x8d4] ss:$28 sps:$4 sm:$0xff]  }
 0x447   :  { %9026 = vmatpush3.bf16.msra.mxu1 %v9665_v31  ;;  %7665 = vmatprep.subr.bf16.mxu0 %v9668_v33  ;;  %v9734_v31 = vld [vmem:[%s13204_s5 + $0xde0] ss:$28 sps:$4 sm:$0xff]   ;;  %v9731_v33 = vld [vmem:[%s13204_s5 + $0x8d0] ss:$28 sps:$4 sm:$0xff]  }
 0x448   :  { %9027 = vmatprep.subr.bf16.mxu1 %v9669_v35  ;;  %v9735_v35 = vld [vmem:[%s13204_s5 + $0xc20] ss:$28 sps:$4 sm:$0xff]  }
 0x44a   :  { %7666 = vmatpush1.bf16.msra.mxu0 %v9666_v55  ;;  %v9738_v55 = vld [vmem:[%s13204_s5 + $0x90c] ss:$28 sps:$4 sm:$0xff]  }
 0x44b   :  { %9028 = vmatpush3.bf16.msra.mxu1 %v9670_v37  ;;  %7667 = vmatprep.subr.bf16.mxu0 %v9673_v20  ;;  %v9736_v37 = vld [vmem:[%s13204_s5 + $0x908] ss:$28 sps:$4 sm:$0xff]  }
 0x44c   :  { %9029 = vmatprep.subr.bf16.mxu1 %v9674_v38  ;;  %v9741_v20 = vld [vmem:[%s13204_s5 + $0x944] ss:$28 sps:$4 sm:$0xff]  }
 0x44d   :  { %v9739_v38 = vld [vmem:[%s13204_s5 + $0x940] ss:$28 sps:$4 sm:$0xff]  }
 0x44e   :  { %7668 = vmatpush1.bf16.msra.mxu0 %v9671_v40  ;;  %v9744_v40 = vld [vmem:[%s13204_s5 + $0x97c] ss:$28 sps:$4 sm:$0xff]  }
 0x44f   :  { %9030 = vmatpush3.bf16.msra.mxu1 %v9675_v8  ;;  %7669 = vmatprep.subr.bf16.mxu0 %v9678_v39  ;;  %v9742_v8 = vld [vmem:[%s13204_s5 + $0x978] ss:$28 sps:$4 sm:$0xff]  }
 0x450   :  { %9031 = vmatprep.subr.bf16.mxu1 %v9679_v41  ;;  %v9747_v39 = vld [vmem:[%s13204_s5 + $0x9b4] ss:$28 sps:$4 sm:$0xff]  }
 0x451   :  { %v9745_v41 = vld [vmem:[%s13204_s5 + $0x9b0] ss:$28 sps:$4 sm:$0xff]  }
 0x452   :  { %7670 = vmatpush1.bf16.msra.mxu0 %v9676_v46  ;;  %v9750_v46 = vld [vmem:[%s13204_s5 + $0x9ec] ss:$28 sps:$4 sm:$0xff]  }
 0x453   :  { %9032 = vmatpush3.bf16.msra.mxu1 %v9680_v2  ;;  %7671 = vmatprep.subr.bf16.mxu0 %v9683_v48  ;;  %v9748_v2 = vld [vmem:[%s13204_s5 + $0x9e8] ss:$28 sps:$4 sm:$0xff]  }
 0x454   :  { %9033 = vmatprep.subr.bf16.mxu1 %v9684_v49  ;;  %v9753_v48 = vld [vmem:[%s13204_s5 + $0xa24] ss:$28 sps:$4 sm:$0xff]  }
 0x455   :  { %v9751_v49 = vld [vmem:[%s13204_s5 + $0xa20] ss:$28 sps:$4 sm:$0xff]  }
 0x456   :  { %7672 = vmatpush1.bf16.msra.mxu0 %v9681_v50  ;;  %v9756_v50 = vld [vmem:[%s13204_s5 + $0xa5c] ss:$28 sps:$4 sm:$0xff]  }
 0x457   :  { %9034 = vmatpush3.bf16.msra.mxu1 %v9685_v61  ;;  %7673 = vmatprep.subr.bf16.mxu0 %v9688_v53  ;;  %v9754_v61 = vld [vmem:[%s13204_s5 + $0xa58] ss:$28 sps:$4 sm:$0xff]  }
 0x458   :  { %9035 = vmatprep.subr.bf16.mxu1 %v9689_v54  ;;  %v9759_v53 = vld [vmem:[%s13204_s5 + $0xa94] ss:$28 sps:$4 sm:$0xff]  }
 0x459   :  { %v9757_v54 = vld [vmem:[%s13204_s5 + $0xa90] ss:$28 sps:$4 sm:$0xff]  }
 0x45a   :  { %7674 = vmatpush1.bf16.msra.mxu0 %v9686_v58  ;;  %v9762_v58 = vld [vmem:[%s13204_s5 + $0xacc] ss:$28 sps:$4 sm:$0xff]  }
 0x45b   :  { %9036 = vmatpush3.bf16.msra.mxu1 %v9690_v59  ;;  %7684 = vmatprep.subr.bf16.mxu0 %v9693_v1  ;;  %v9760_v59 = vld [vmem:[%s13204_s5 + $0xac8] ss:$28 sps:$4 sm:$0xff]  }
 0x45c   :  { %9037 = vmatprep.subr.bf16.mxu1 %v9694_v10  ;;  %v9765_v1 = vld [vmem:[%s13204_s5 + $0xb04] ss:$28 sps:$4 sm:$0xff]  }
 0x45d   :  { %7676 = vmatmul.mubr.bf16.vlgmr.msra.gmra.mrb[20].mxu0 %v11974_v32  ;;  %v9704_v32 = vld [vmem:[%s13204_s5 + $0xc90] ss:$28 sps:$4 sm:$0xff]   ;;  %v9763_v10 = vld [vmem:[%s13204_s5 + $0xb00] ss:$28 sps:$4 sm:$0xff]  }
 0x45e   :  { %7685 = vmatpush1.bf16.msra.mxu0 %v9691_v14  ;;  %7716 = vmatprep.mubr.bf16.mxu0 %v12221_v42  ;;  %v9701_v42 = vld [vmem:[%s13204_s5 + $0x780] ss:$28 sps:$4 sm:$0xff]   ;;  %v9771_v14 = vld [vmem:[%s13204_s5 + $0xb74] ss:$28 sps:$4 sm:$0xff]  }
 0x45f   :  { %9038 = vmatpush3.bf16.msra.mxu1 %v9695_v29  ;;  %7686 = vmatprep.subr.bf16.mxu0 %v9698_v60  ;;  %v9769_v29 = vld [vmem:[%s13204_s5 + $0xb70] ss:$28 sps:$4 sm:$0xff]   ;;  %v13104_v60 = vld [vmem:[%s13205_s6] sm:$0x7f] }
 0x460   :  { %9045 = vmatprep.subr.bf16.mxu1 %v9699_v62  ;;  %v9774_v62 = vld [vmem:[%s13204_s5 + $0xbac] ss:$28 sps:$4 sm:$0xff]  }
 0x462   :  { %7687 = vmatpush1.bf16.msra.mxu0 %v9696_v63  ;;  %7879 = vmatmul.mubr.bf16.vlgmr.msra.gmra.mrb[32].mxu1 %v12229_v21  ;;  %v4938_v63 = vrot.slane %v13104_v60, %v10307_v15  ;;  %v9775_v15 = vld [vmem:[%s13204_s5 + $0xbe0] ss:$28 sps:$4 sm:$0xff]  }
 0x463   :  { %9046 = vmatpush3.bf16.msra.mxu1 %v9700_v44  ;;  %7918 = vmatprep.mubr.bf16.mxu1 %v12520_v27  ;;  %v9772_v44 = vld [vmem:[%s13204_s5 + $0xba8] ss:$28 sps:$4 sm:$0xff]  }
 0x464   :  { %7688 = vmatprep.subr.bf16.mxu0 %v9703_v0  ;;  %9047 = vmatprep.subr.bf16.mxu1 %v9704_v32  ;;  %v4942_v0 = vrot.slane %v13104_v60, %v10313_v17  ;;  %v9777_v32 = vld [vmem:[%s13204_s5 + $0xbe4] ss:$28 sps:$4 sm:$0xff]   ;;  %v9780_v17 = vld [vmem:[%s13204_s5 + $0xc1c] ss:$28 sps:$4 sm:$0xff]  }
 0x466   :  { %7689 = vmatpush1.bf16.msra.mxu0 %v9701_v42 }
 0x467   :  { %9048 = vmatpush3.bf16.msra.mxu1 %v9705_v3  ;;  %7690 = vmatprep.subr.bf16.mxu0 %v9708_v4 }
 0x468   :  { %9049 = vmatprep.subr.bf16.mxu1 %v9709_v52 }
 0x46a   :  { %7691 = vmatpush1.bf16.msra.mxu0 %v9706_v6 }
 0x46b   :  { %9050 = vmatpush3.bf16.msra.mxu1 %v9710_v7  ;;  %7692 = vmatprep.subr.bf16.mxu0 %v9713_v9  ;;  %v9778_v9 = vld [vmem:[%s13204_s5 + $0xc18] ss:$28 sps:$4 sm:$0xff]  }
 0x46c   :  { %9051 = vmatprep.subr.bf16.mxu1 %v9714_v11  ;;  %v9783_v11 = vld [vmem:[%s13204_s5 + $0xc54] ss:$28 sps:$4 sm:$0xff]  }
 0x46e   :  { %7693 = vmatpush1.bf16.msra.mxu0 %v9711_v12  ;;  %v9781_v12 = vld [vmem:[%s13204_s5 + $0xc50] ss:$28 sps:$4 sm:$0xff]  }
 0x46f   :  { %9052 = vmatpush3.bf16.msra.mxu1 %v9715_v19  ;;  %7694 = vmatprep.subr.bf16.mxu0 %v9718_v45  ;;  %v9786_v19 = vld [vmem:[%s13204_s5 + $0xc8c] ss:$28 sps:$4 sm:$0xff]  }
 0x470   :  { %9053 = vmatprep.subr.bf16.mxu1 %v9719_v22 }
 0x472   :  { %7695 = vmatpush1.bf16.msra.mxu0 %v9716_v23  ;;  %v9784_v23 = vld [vmem:[%s13204_s5 + $0xc88] ss:$28 sps:$4 sm:$0xff]  }
 0x473   :  { %9054 = vmatpush3.bf16.msra.mxu1 %v9720_v24  ;;  %7696 = vmatprep.subr.bf16.mxu0 %v9723_v13  ;;  %v9789_v24 = vld [vmem:[%s13204_s5 + $0xcc4] ss:$28 sps:$4 sm:$0xff]  }
 0x474   :  { %9055 = vmatprep.subr.bf16.mxu1 %v9724_v36  ;;  %v9787_v13 = vld [vmem:[%s13204_s5 + $0xcc0] ss:$28 sps:$4 sm:$0xff]  }
 0x475   :  { %v9792_v36 = vld [vmem:[%s13204_s5 + $0xcfc] ss:$28 sps:$4 sm:$0xff]  }
 0x476   :  { %7697 = vmatpush1.bf16.msra.mxu0 %v9721_v57  ;;  %v9790_v57 = vld [vmem:[%s13204_s5 + $0xcf8] ss:$28 sps:$4 sm:$0xff]  }
 0x477   :  { %9056 = vmatpush3.bf16.msra.mxu1 %v9725_v43  ;;  %7698 = vmatprep.subr.bf16.mxu0 %v9728_v25  ;;  %v9795_v43 = vld [vmem:[%s13204_s5 + $0xd34] ss:$28 sps:$4 sm:$0xff]  }
 0x478   :  { %9057 = vmatprep.subr.bf16.mxu1 %v9729_v26  ;;  %v9793_v25 = vld [vmem:[%s13204_s5 + $0xd30] ss:$28 sps:$4 sm:$0xff]  }
 0x479   :  { %v9798_v26 = vld [vmem:[%s13204_s5 + $0xd6c] ss:$28 sps:$4 sm:$0xff]  }
 0x47a   :  { %7699 = vmatpush1.bf16.msra.mxu0 %v9726_v56  ;;  %v9796_v56 = vld [vmem:[%s13204_s5 + $0xd68] ss:$28 sps:$4 sm:$0xff]  }
 0x47b   :  { %9058 = vmatpush3.bf16.msra.mxu1 %v9730_v30  ;;  %7700 = vmatprep.subr.bf16.mxu0 %v9733_v51  ;;  %v9801_v30 = vld [vmem:[%s13204_s5 + $0xda4] ss:$28 sps:$4 sm:$0xff]   ;;  %v4946_v51 = vrot.slane %v13104_v60, %v10310_v16  ;;  %v9802_v16 = vld [vmem:[%s13204_s5 + $0xdd8] ss:$28 sps:$4 sm:$0xff]  }
 0x47c   :  { %9059 = vmatprep.subr.bf16.mxu1 %v9734_v31  ;;  %v9799_v31 = vld [vmem:[%s13204_s5 + $0xda0] ss:$28 sps:$4 sm:$0xff]  }
 0x47e   :  { %7701 = vmatpush1.bf16.msra.mxu0 %v9731_v33  ;;  %v4950_v33 = vrot.slane %v13104_v60, %v10316_v18 }
 0x47f   :  { %9060 = vmatpush3.bf16.msra.mxu1 %v9735_v35  ;;  %7702 = vmatprep.subr.bf16.mxu0 %v9738_v55  ;;  %v9804_v35 = vld [vmem:[%s13204_s5 + $0xddc] ss:$28 sps:$4 sm:$0xff]  }
 0x482   :  { %7703 = vmatpush1.bf16.msra.mxu0 %v9736_v37  ;;  %7919 = vmatmul.mubr.bf16.vlgmr.msra.gmra.mrb[36].mxu1 %v12528_v5 }
 0x483   :  { %7704 = vmatprep.subr.bf16.mxu0 %v9741_v20 }
 0x486   :  { %7705 = vmatpush1.bf16.msra.mxu0 %v9739_v38 }
 0x487   :  { %7706 = vmatprep.subr.bf16.mxu0 %v9744_v40 }
 0x48a   :  { %7707 = vmatpush1.bf16.msra.mxu0 %v9742_v8 }
 0x48b   :  { %7708 = vmatprep.subr.bf16.mxu0 %v9747_v39 }
 0x48e   :  { %7709 = vmatpush1.bf16.msra.mxu0 %v9745_v41 }
 0x48f   :  { %7710 = vmatprep.subr.bf16.mxu0 %v9750_v46 }
 0x492   :  { %7711 = vmatpush1.bf16.msra.mxu0 %v9748_v2 }
 0x493   :  { %7712 = vmatprep.subr.bf16.mxu0 %v9753_v48 }
 0x496   :  { %7713 = vmatpush1.bf16.msra.mxu0 %v9751_v49 }
 0x497   :  { %7714 = vmatprep.subr.bf16.mxu0 %v9756_v50  ;;  %v4962_v50 = vrot.slane %v13104_v60, %v10721_v34 }
 0x49a   :  { %7715 = vmatpush1.bf16.msra.mxu0 %v9754_v61 }
 0x49b   :  { %7725 = vmatprep.subr.bf16.mxu0 %v9759_v53 }
 0x49d   :  { %7717 = vmatmul.mubr.bf16.vlgmr.msra.gmra.mrb[20].mxu0 %v12229_v21  ;;  %v9768_v21 = vld [vmem:[%s13204_s5 + $0xb3c] ss:$28 sps:$4 sm:$0xff]  }
 0x49e   :  { %7726 = vmatpush1.bf16.msra.mxu0 %v9757_v54  ;;  %7757 = vmatprep.mubr.bf16.mxu0 %v12520_v27  ;;  %v9766_v27 = vld [vmem:[%s13204_s5 + $0xb38] ss:$28 sps:$4 sm:$0xff]   ;;  %s9845_s5 = smov [#allocation2]  }
 0x49f   :  { %7727 = vmatprep.subr.bf16.mxu0 %v9762_v58  ;;  %s7947_s21 = sshll.u32 %s9845_s5, 4  ;;  %s7948_s21 = int_to_ptr.vmem [resolvable:$true] %s7947_s21 }
 0x4a0   :  { %s9820_s22 = scalar_lea.vmem %s7948_s21, 896  ;;  %p9825_p1 = scmp.lt.s32.totalorder %s7948_s21, %s7948_s21 }
 0x4a1   :  { %p9821_p0 = scmp.ne.s32.totalorder %s7948_s21, %s9820_s22  ;;  %p9826_p2 = scmp.lt.s32.totalorder %s9820_s22, %s9820_s22 }
 0x4a2   :  { %7728 = vmatpush1.bf16.msra.mxu0 %v9760_v59 }
 0x4a3   :  { %7729 = vmatprep.subr.bf16.mxu0 %v9765_v1  ;;  %p9827_p3 = por %p9826_p2, %p9825_p1 }
 0x4a5   :  { %p9828_p4 = pnand %p9827_p3, %p9821_p0 }
 0x4a6   :  { %7730 = vmatpush1.bf16.msra.mxu0 %v9763_v10 }
 0x4a7   :  { %7731 = vmatprep.subr.bf16.mxu0 %v9768_v21 }
 0x4aa   :  { %7732 = vmatpush1.bf16.msra.mxu0 %v9766_v27 }
 0x4ab   :  { %7733 = vmatprep.subr.bf16.mxu0 %v9771_v14 }
 0x4ae   :  { %7734 = vmatpush1.bf16.msra.mxu0 %v9769_v29 }
 0x4af   :  { %7735 = vmatprep.subr.bf16.mxu0 %v9774_v62 }
 0x4b0   :  { %v7431_v42 = vpop.f32.mrb[16].mxu0 }
 0x4b1   :  { %v9077_v3 = vadd.f32 %v7431_v42, %v4938_v63  ;;  %v7433_v4 = vpop.f32.mrb[17].mxu0 }
 0x4b2   :  { %v9078_v52 = vadd.f32 %v7433_v4, %v4942_v0  ;;  %7736 = vmatpush1.bf16.msra.mxu0 %v9772_v44  ;;  %v7435_v6 = vpop.f32.mrb[18].mxu0  ;;  %v4954_v4 = vrot.slane %v13104_v60, %v10510_v47 }
 0x4b3   :  { %9805 = vtanh.f32 %v9077_v3  ;;  %v7436_v7 = vpop.f32.mrb[19].mxu0  ;;  %7737 = vmatprep.subr.bf16.mxu0 %v9777_v32 }
 0x4b4   :  { %9807 = vtanh.f32 %v9078_v52  ;;  %v4958_v52 = vrot.slane %v13104_v60, %v10412_v28 }
 0x4b6   :  { %7738 = vmatpush1.bf16.msra.mxu0 %v9775_v15 }
 0x4b7   :  { %7739 = vmatprep.subr.bf16.mxu0 %v9780_v17 }
 0x4ba   :  { %7740 = vmatpush1.bf16.msra.mxu0 %v9778_v9 }
 0x4bb   :  { %7741 = vmatprep.subr.bf16.mxu0 %v9783_v11 }
 0x4bd   :  { %v9806_v45 = vpop.eup %9805 }
 0x4be   :  { %v9808_v22 = vpop.eup %9807  ;;  %7933 = vst [vmem:[#allocation2] sm:$0xff] %v9806_v45  ;;  %7742 = vmatpush1.bf16.msra.mxu0 %v9781_v12 }
 0x4bf   :  { %7934 = vst [vmem:[#allocation2 + $0x8] sm:$0xff] %v9808_v22  ;;  %7743 = vmatprep.subr.bf16.mxu0 %v9786_v19 }
 0x4c2   :  { %7744 = vmatpush1.bf16.msra.mxu0 %v9784_v23 }
 0x4c3   :  { %7745 = vmatprep.subr.bf16.mxu0 %v9789_v24 }
 0x4c6   :  { %7746 = vmatpush1.bf16.msra.mxu0 %v9787_v13 }
 0x4c7   :  { %7747 = vmatprep.subr.bf16.mxu0 %v9792_v36 }
 0x4ca   :  { %7748 = vmatpush1.bf16.msra.mxu0 %v9790_v57 }
 0x4cb   :  { %7749 = vmatprep.subr.bf16.mxu0 %v9795_v43 }
 0x4ce   :  { %7750 = vmatpush1.bf16.msra.mxu0 %v9793_v25 }
 0x4cf   :  { %7751 = vmatprep.subr.bf16.mxu0 %v9798_v26 }
 0x4d2   :  { %7752 = vmatpush1.bf16.msra.mxu0 %v9796_v56 }
 0x4d3   :  { %7753 = vmatprep.subr.bf16.mxu0 %v9801_v30 }
 0x4d4   :  { %v7595_v55 = vpop.f32.mrb[20].mxu1 }
 0x4d5   :  { %v9079_v37 = vadd.f32 %v7595_v55, %v4946_v51  ;;  %v7597_v20 = vpop.f32.mrb[21].mxu1 }
 0x4d6   :  { %v9080_v38 = vadd.f32 %v7597_v20, %v4950_v33  ;;  %7754 = vmatpush1.bf16.msra.mxu0 %v9799_v31  ;;  %v7599_v40 = vpop.f32.mrb[22].mxu1 }
 0x4d7   :  { %9809 = vtanh.f32 %v9079_v37  ;;  %v7600_v8 = vpop.f32.mrb[23].mxu1  ;;  %7755 = vmatprep.subr.bf16.mxu0 %v9804_v35 }
 0x4d8   :  { %9811 = vtanh.f32 %v9080_v38 }
 0x4da   :  { %7756 = vmatpush1.bf16.msra.mxu0 %v9802_v16 }
 0x4dd   :  { %7758 = vmatmul.mubr.bf16.vlgmr.msra.gmra.mrb[20].mxu0 %v12528_v5 }
 0x4e1   :  { %v9810_v18 = vpop.eup %9809 }
 0x4e2   :  { %v9812_v39 = vpop.eup %9811  ;;  %7935 = vst [vmem:[#allocation2 + $0x10] sm:$0xff] %v9810_v18 }
 0x4e3   :  { %7936 = vst [vmem:[#allocation2 + $0x18] sm:$0xff] %v9812_v39 }
 0x4f5   :  { %v8995_v41 = vpop.f32.mrb[24].mxu1 }
 0x4f6   :  { %v8996_v46 = vpop.f32.mrb[25].mxu1 }
 0x4f7   :  { %v8997_v2 = vadd.f32 %v8996_v46, %v8995_v41  ;;  %v8998_v48 = vpop.f32.mrb[26].mxu1 }
 0x4f8   :  { %v8999_v49 = vpop.f32.mrb[27].mxu1 }
 0x4f9   :  { %v7801_v54 = vadd.f32 %v8997_v2, %v4962_v50 }
 0x515   :  { %v9017_v61 = vpop.f32.mrb[28].mxu1 }
 0x516   :  { %v9018_v53 = vpop.f32.mrb[29].mxu1 }
 0x517   :  { %v9019_v58 = vadd.f32 %v9018_v53, %v9017_v61  ;;  %v9020_v59 = vpop.f32.mrb[30].mxu1 }
 0x518   :  { %v9021_v1 = vpop.f32.mrb[31].mxu1 }
 0x519   :  { %v7841_v10 = vadd.f32 %v9019_v58, %v7801_v54 }
 0x535   :  { %v9039_v5 = vpop.f32.mrb[32].mxu1 }
 0x536   :  { %v9040_v21 = vpop.f32.mrb[33].mxu1 }
 0x537   :  { %v9041_v27 = vadd.f32 %v9040_v21, %v9039_v5  ;;  %v9042_v14 = vpop.f32.mrb[34].mxu1 }
 0x538   :  { %v9043_v29 = vpop.f32.mrb[35].mxu1 }
 0x539   :  { %v7881_v62 = vadd.f32 %v9041_v27, %v7841_v10 }
 0x555   :  { %v9061_v63 = vpop.f32.mrb[36].mxu1 }
 0x556   :  { %v9062_v44 = vpop.f32.mrb[37].mxu1 }
 0x557   :  { %v9063_v0 = vadd.f32 %v9062_v44, %v9061_v63  ;;  %v9064_v32 = vpop.f32.mrb[38].mxu1 }
 0x558   :  { %v9065_v42 = vpop.f32.mrb[39].mxu1 }
 0x559   :  { %v7921_v3 = vadd.f32 %v9063_v0, %v7881_v62 }
 0x55b   :  { %9813 = vtanh.f32 %v7921_v3 }
 0x565   :  { %v9814_v34 = vpop.eup %9813 }
 0x566   :  { %7940 = vst.msk [vmem:[#allocation2 + $0x30] sm:$0xff] %vm7939_vm0, %v9814_v34 }
 0x5b0   :  { %v7759_v6 = vpop.f32.mrb[20].mxu0 }
 0x5b1   :  { %v9081_v15 = vadd.f32 %v7759_v6, %v4954_v4  ;;  %v7761_v7 = vpop.f32.mrb[21].mxu0 }
 0x5b2   :  { %v9082_v17 = vadd.f32 %v7761_v7, %v4958_v52  ;;  %v7763_v9 = vpop.f32.mrb[22].mxu0 }
 0x5b3   :  { %9815 = vtanh.f32 %v9081_v15  ;;  %v7764_v11 = vpop.f32.mrb[23].mxu0 }
 0x5b4   :  { %9817 = vtanh.f32 %v9082_v17 }
 0x5bd   :  { %v9816_v12 = vpop.eup %9815 }
 0x5be   :  { %v9818_v19 = vpop.eup %9817  ;;  %7937 = vst [vmem:[#allocation2 + $0x20] sm:$0xff] %v9816_v12 }
 0x5bf   :  { %7938 = vst [vmem:[#allocation2 + $0x28] sm:$0xff] %v9818_v19 }
 0x5c0   :  { %9831 = shalt.err (!%p9828_p4)
}
 0x5c1   :  { %s9832_s4 = scalar_lea.hbm %s13206_s7, 896 }
 0x5c2   :  { %p9833_p5 = scmp.ne.s32.totalorder %s13206_s7, %s9832_s4  ;;  %p9836_p6 = scmp.lt.u32.totalorder %s9832_s4, %s13206_s7 }
 0x5c4   :  { %p9838_p7 = pnand %p9836_p6, %p9833_p5 }
 0x5c6   :  { %9841 = shalt.err (!%p9838_p7)
}
 0x5c7   :  { %7950 = dma.vmem_to_hbm [thread:$0]  %s7948_s21, 896, %s13206_s7, [#allocation3]  }
 0x5c8   :  { %9842 = dma.done.wait [#allocation3], 896  }
 0x5c9   :  { %9843 = vsyncadd [#allocation3], 4294966400 }
 0x5ca   :  { %7954 = vsyncpa [#allocation3], 1 }

</bundles_post_ra>
